<compile_context>
chip_gen: v7x
topology: tpu7x:2x2x1
jax: 0.10.0
libtpu: 0.0.40
codegen_flags: <defaults>
</compile_context>

<pallas_src>
import numpy as np

import jax
import jax.numpy as jnp
from jax.experimental import pallas as pl
from jax.experimental.pallas import tpu as pltpu

# ---------------------------------------------------------------------------
# Model configuration (small, consistent with the module's __init__ contract)
# ---------------------------------------------------------------------------
LATENT = 32            # extractor.out_features
RNN_LATENT = 32        # RNN_LATENT_SIZE
SHAPES_PER_TYPE = 4
N_EVALUATORS = 2       # CompundEvaluator: circles + boxes
S_TOTAL = SHAPES_PER_TYPE * N_EVALUATORS          # num_output_shapes_from_evaluator = 8
OUT_SHAPES_PER_LAYER = 2
NUM_CSG_LAYERS = 2
BIN_THRESHOLD = 0.5    # unused in the soft (initial training) path


# ---------------------------------------------------------------------------
# The single fused Pallas kernel
# ---------------------------------------------------------------------------
def _csgnet_fused_kernel(
    # encoder (convs as dense Toeplitz matmuls + fc), all weights feature-major
    x_ref, m1_ref, b1_ref, m2_ref, b2_ref, encw_ref, encb_ref,
    # decoder MLP
    d1w_ref, d1b_ref, d2w_ref, d2b_ref,
    # points (2, B*P), batch-block indicator (B, B*P), scaler (SMEM scalar)
    pts_ref, eb_ref, scale_ref,
    # shared GRUCell
    h0_ref, wih_ref, whh_ref, bih_ref, bhh_ref,
    # CSG RelationLayer 0 (fused [left|right] head + emit projection)
    l0w_ref, l0b_ref, l0ew_ref, l0eb_ref,
    # CSG RelationLayer 1
    l1w_ref, l1b_ref, l1ew_ref, l1eb_ref,
    # output: (1, B*P) final clamped distances
    out_ref,
):
    f32 = jnp.float32
    eb = eb_ref[...]                       # (B, N); eb[b, n] = 1 iff point n is in batch b
    bsz = eb.shape[0]

    def dense(w_ref, b_ref, x, relu=False):
        # feature-major linear layer: (out, in) @ (in, B) + (out, 1)
        y = jnp.dot(w_ref[...], x, preferred_element_type=f32) + b_ref[...]
        return jnp.maximum(y, 0.0) if relu else y

    # ---- encoder: conv1 + conv2 (exact dense reformulation) + fc ---------------------
    h = dense(m1_ref, b1_ref, x_ref[...], relu=True)       # (512, B)
    h = dense(m2_ref, b2_ref, h, relu=True)                # (256, B)
    code = dense(encw_ref, encb_ref, h)                    # (LATENT, B)

    # ---- decoder MLP -> per-shape params, rows = [tx | ty | size_a | size_b] ---------
    d1 = dense(d1w_ref, d1b_ref, code, relu=True)          # (64, B)
    sp = dense(d2w_ref, d2b_ref, d1)                       # (4*S, B)

    # ---- CompundEvaluator (circle + box SDF) + Scaler, lane-dense (S, B*P) -----------
    # expand per-batch params to per-point columns via the 0/1 indicator (standard matmul)
    sp_n = jnp.dot(sp, eb, preferred_element_type=f32)     # (4*S, N)
    S = S_TOTAL
    tx = sp_n[0 * S:1 * S, :]
    ty = sp_n[1 * S:2 * S, :]
    sa = jnp.abs(sp_n[2 * S:3 * S, :])
    sb = jnp.abs(sp_n[3 * S:4 * S, :])
    pts = pts_ref[...]                                     # (2, N): row0 = x, row1 = y
    dx = pts[0:1, :] - tx                                  # (S, N)
    dy = pts[1:2, :] - ty
    # circle SDF (radius = sa); tiny epsilon keeps sqrt grad-safe, negligible for fwd
    d_circle = jnp.sqrt(dx * dx + dy * dy + 1e-12) - sa
    # axis-aligned box SDF (half extents sa, sb)
    qx = jnp.abs(dx) - sa
    qy = jnp.abs(dy) - sb
    outside = jnp.sqrt(jnp.maximum(qx, 0.0) ** 2 + jnp.maximum(qy, 0.0) ** 2 + 1e-12)
    inside = jnp.minimum(jnp.maximum(qx, qy), 0.0)
    d_box = outside + inside
    srow = jax.lax.broadcasted_iota(jnp.int32, dx.shape, 0)
    base = jnp.where(srow < SHAPES_PER_TYPE, d_circle, d_box)       # (S, N)
    # Scaler (initial training mode): 1 - clamp(d * m, 0, 1); m read from SMEM
    scaled = 1.0 - jnp.clip(base * scale_ref[0], 0.0, 1.0)          # (S, N)

    # ---- shared nn.GRUCell (gate order r, z, n), feature-major ------------------------
    H = RNN_LATENT

    def gru(x, hprev):
        gi = jnp.dot(wih_ref[...], x, preferred_element_type=f32) + bih_ref[...]      # (3H, B)
        gh = jnp.dot(whh_ref[...], hprev, preferred_element_type=f32) + bhh_ref[...]  # (3H, B)
        r = jax.nn.sigmoid(gi[0:H, :] + gh[0:H, :])
        z = jax.nn.sigmoid(gi[H:2 * H, :] + gh[H:2 * H, :])
        n = jnp.tanh(gi[2 * H:3 * H, :] + r * gh[2 * H:3 * H, :])
        return (1.0 - z) * n + z * hprev

    code = gru(code, jnp.broadcast_to(h0_ref[...], (H, bsz)))

    # ---- soft CSG relation layers (union / intersection / both differences) -----------
    def relation_layer(dist, code, lrw_ref, lrb_ref, emw_ref, emb_ref, out_s):
        in_s = dist.shape[0]
        # one fused matmul for BOTH operand-selection heads: rows = [left | right]
        logits = dense(lrw_ref, lrb_ref, code)             # (2*out_s*in_s, B)
        half = out_s * in_s
        left_rows, right_rows, probs = [], [], []
        for side in range(2):
            for o in range(out_s):
                off = side * half + o * in_s
                sl = logits[off:off + in_s, :]             # (in_s, B)
                sl = sl - jnp.max(sl, axis=0, keepdims=True)
                ex = jnp.exp(sl)
                pr = ex / jnp.sum(ex, axis=0, keepdims=True)   # soft operand selection
                probs.append(pr)                               # stays in VMEM only
                pr_n = jnp.dot(pr, eb, preferred_element_type=f32)   # (in_s, N)
                rowv = jnp.sum(pr_n * dist, axis=0, keepdims=True)   # (1, N)
                (left_rows if side == 0 else right_rows).append(rowv)
        left = jnp.concatenate(left_rows, axis=0)          # (out_s, N)
        right = jnp.concatenate(right_rows, axis=0)
        union = jnp.clip(left + right, 0.0, 1.0)
        inter = jnp.clip(left + right - 1.0, 0.0, 1.0)
        dlr = jnp.clip(left - right, 0.0, 1.0)
        drl = jnp.clip(right - left, 0.0, 1.0)
        out = jnp.concatenate([union, inter, dlr, drl], axis=0)      # (4*out_s, N)
        # emit_parameters(): project the operand-selection probs to LATENT (in VMEM)
        emit_in = jnp.concatenate(probs, axis=0)                     # (2*out_s*in_s, B)
        emitted = dense(emw_ref, emb_ref, emit_in)                   # (LATENT, B)
        return out, emitted

    layer_refs = ((l0w_ref, l0b_ref, l0ew_ref, l0eb_ref),
                  (l1w_ref, l1b_ref, l1ew_ref, l1eb_ref))
    dist = scaled
    out_s = OUT_SHAPES_PER_LAYER
    for idx, (lrw, lrb, emw, emb) in enumerate(layer_refs):
        if idx == NUM_CSG_LAYERS - 1:
            out_s = 1
        if idx > 0:
            dist = jnp.concatenate([dist, scaled], axis=0)   # re-append base shapes
        dist, emitted = relation_layer(dist, code, lrw, lrb, emw, emb, out_s)
        code = gru(emitted, code)   # mirrors the PyTorch loop (final update is unused)

    # last_distances[..., 0].clamp(0, 1)  -> lane-dense (1, B*P) store
    out_ref[...] = jnp.clip(dist[0:1, :], 0.0, 1.0)


# ---------------------------------------------------------------------------
# Parameter construction (synthetic, deterministic)
# ---------------------------------------------------------------------------
def _conv_as_dense(w_jnp, b_jnp, spatial_in, stride=2):
    """Exact reformulation of a 3x3 'SAME' stride-2 conv as one dense matmul.

    Feature maps are flattened channels-last: idx = (y*W + x)*C + c.  Returns the
    feature-major weight (out_feats, in_feats) and a bias column (out_feats, 1),
    so the conv becomes W @ x_col inside the fused kernel.
    """
    w = np.asarray(w_jnp)
    b = np.asarray(b_jnp)
    cout, cin, kh, kw = w.shape
    so = spatial_in // stride
    mat = np.zeros((spatial_in * spatial_in * cin, so * so * cout), np.float32)
    for oy in range(so):
        for ox in range(so):
            opos = oy * so + ox
            for ky in range(kh):
                iy = oy * stride + ky - 1
                if iy < 0 or iy >= spatial_in:
                    continue
                for kx in range(kw):
                    ix = ox * stride + kx - 1
                    if ix < 0 or ix >= spatial_in:
                        continue
                    ipos = iy * spatial_in + ix
                    mat[ipos * cin:(ipos + 1) * cin,
                        opos * cout:(opos + 1) * cout] += w[:, :, ky, kx].T
    bias = np.tile(b.astype(np.float32), so * so).reshape(-1, 1)
    return jnp.asarray(mat.T), jnp.asarray(bias)


def init_params(key):
    ks = iter(jax.random.split(key, 32))

    def w(shape, scale=0.1):
        return (scale * jax.random.normal(next(ks), shape)).astype(jnp.float32)

    p = {}
    # FeatureExtractor: conv(1->8, s2) + relu, conv(8->16, s2) + relu, fc(256 -> LATENT)
    conv1_w = w((8, 1, 3, 3))
    conv1_b = jnp.zeros((8,), jnp.float32)
    conv2_w = w((16, 8, 3, 3))
    conv2_b = jnp.zeros((16,), jnp.float32)
    p["m1"], p["b1"] = _conv_as_dense(conv1_w, conv1_b, spatial_in=16)   # (512,256),(512,1)
    p["m2"], p["b2"] = _conv_as_dense(conv2_w, conv2_b, spatial_in=8)    # (256,512),(256,1)
    p["enc_w"] = w((LATENT, 16 * 4 * 4))
    p["enc_b"] = jnp.zeros((LATENT, 1), jnp.float32)
    # decoder MLP -> shape params (4 rows per shape: tx, ty, size_a, size_b)
    p["dec1_w"] = w((64, LATENT))
    p["dec1_b"] = jnp.zeros((64, 1), jnp.float32)
    p["dec2_w"] = w((4 * S_TOTAL, 64))
    p["dec2_b"] = jnp.zeros((4 * S_TOTAL, 1), jnp.float32)
    # Scaler (scalar multiplier, lives in SMEM inside the kernel)
    p["scaler_m"] = jnp.ones((1,), jnp.float32)
    # shared GRUCell + learned initial hidden state (nn.init.constant_(..., 0.01))
    p["gru_h0"] = jnp.full((RNN_LATENT, 1), 0.01, jnp.float32)
    p["gru_wih"] = w((3 * RNN_LATENT, LATENT))
    p["gru_whh"] = w((3 * RNN_LATENT, RNN_LATENT))
    p["gru_bih"] = jnp.zeros((3 * RNN_LATENT, 1), jnp.float32)
    p["gru_bhh"] = jnp.zeros((3 * RNN_LATENT, 1), jnp.float32)
    # RelationLayers: fused [left|right] operand-selection head + emit projection
    layers = []
    in_s = S_TOTAL
    out_s = OUT_SHAPES_PER_LAYER
    for i in range(NUM_CSG_LAYERS):
        if i == NUM_CSG_LAYERS - 1:
            out_s = 1
        layers.append({
            "lr_w": w((2 * in_s * out_s, RNN_LATENT)),
            "lr_b": jnp.zeros((2 * in_s * out_s, 1), jnp.float32),
            "emit_w": w((LATENT, 2 * in_s * out_s)),
            "emit_b": jnp.zeros((LATENT, 1), jnp.float32),
        })
        in_s = out_s * 4 + S_TOTAL
    p["csg_layers"] = layers
    return p


# ---------------------------------------------------------------------------
# Forward wrapper: only layout glue stays outside the fused kernel
# ---------------------------------------------------------------------------
@jax.jit
def csgnet_forward(params, images, points):
    bsz = images.shape[0]
    npts = points.shape[1]
    n = bsz * npts

    x_t = images.reshape(bsz, -1).astype(jnp.float32).T                  # (256, B)
    pts = points.astype(jnp.float32).transpose(2, 0, 1).reshape(2, n)    # (2, B*P)
    # 0/1 batch-block indicator (constant-folded under jit): eb[b, n] = [n // P == b]
    eb = (jnp.arange(n, dtype=jnp.int32)[None, :] // npts
          == jnp.arange(bsz, dtype=jnp.int32)[:, None]).astype(jnp.float32)

    layer_args = []
    for lyr in params["csg_layers"]:
        layer_args += [lyr["lr_w"], lyr["lr_b"], lyr["emit_w"], lyr["emit_b"]]

    operands = (
        x_t, params["m1"], params["b1"], params["m2"], params["b2"],
        params["enc_w"], params["enc_b"],
        params["dec1_w"], params["dec1_b"], params["dec2_w"], params["dec2_b"],
        pts, eb, params["scaler_m"],
        params["gru_h0"], params["gru_wih"], params["gru_whh"],
        params["gru_bih"], params["gru_bhh"],
    ) + tuple(layer_args)

    vmem = pl.BlockSpec(memory_space=pltpu.MemorySpace.VMEM)
    smem = pl.BlockSpec(memory_space=pltpu.MemorySpace.SMEM)
    smem_idx = 13   # scaler_m rides the scalar path
    in_specs = [smem if i == smem_idx else vmem for i in range(len(operands))]

    out = pl.pallas_call(
        _csgnet_fused_kernel,
        out_shape=jax.ShapeDtypeStruct((1, n), jnp.float32),
        in_specs=in_specs,
        out_specs=vmem,
    )(*operands)

    return out.reshape(bsz, npts)


if __name__ == "__main__":
    key = jax.random.PRNGKey(0)
    k_img, k_pts = jax.random.split(key)
    images = jax.random.normal(k_img, (2, 1, 16, 16), dtype=jnp.float32)   # NCHW
    points = jax.random.uniform(k_pts, (2, 64, 2), dtype=jnp.float32,
                                minval=-1.0, maxval=1.0)
    params = init_params(jax.random.PRNGKey(42))

    out = csgnet_forward(params, images, points)
    jax.block_until_ready(out)
    assert out.shape == (2, 64) and out.dtype == jnp.float32
    assert bool(jnp.all(jnp.isfinite(out)))
    assert bool(jnp.all((out >= 0.0) & (out <= 1.0)))
    print("KERNEL_OK")
</pallas_src>

<mosaic_0001>
module attributes {stable_mosaic.version = 11 : i64} {
  func.func @_csgnet_fused_kernel(%arg0: memref<256x2xf32, #tpu.memory_space<vmem>>, %arg1: memref<512x256xf32, #tpu.memory_space<vmem>>, %arg2: memref<512x1xf32, #tpu.memory_space<vmem>>, %arg3: memref<256x512xf32, #tpu.memory_space<vmem>>, %arg4: memref<256x1xf32, #tpu.memory_space<vmem>>, %arg5: memref<32x256xf32, #tpu.memory_space<vmem>>, %arg6: memref<32x1xf32, #tpu.memory_space<vmem>>, %arg7: memref<64x32xf32, #tpu.memory_space<vmem>>, %arg8: memref<64x1xf32, #tpu.memory_space<vmem>>, %arg9: memref<32x64xf32, #tpu.memory_space<vmem>>, %arg10: memref<32x1xf32, #tpu.memory_space<vmem>>, %arg11: memref<2x128xf32, #tpu.memory_space<vmem>>, %arg12: memref<2x128xf32, #tpu.memory_space<vmem>>, %arg13: memref<1xf32, #tpu.memory_space<smem>>, %arg14: memref<32x1xf32, #tpu.memory_space<vmem>>, %arg15: memref<96x32xf32, #tpu.memory_space<vmem>>, %arg16: memref<96x32xf32, #tpu.memory_space<vmem>>, %arg17: memref<96x1xf32, #tpu.memory_space<vmem>>, %arg18: memref<96x1xf32, #tpu.memory_space<vmem>>, %arg19: memref<32x32xf32, #tpu.memory_space<vmem>>, %arg20: memref<32x1xf32, #tpu.memory_space<vmem>>, %arg21: memref<32x32xf32, #tpu.memory_space<vmem>>, %arg22: memref<32x1xf32, #tpu.memory_space<vmem>>, %arg23: memref<32x32xf32, #tpu.memory_space<vmem>>, %arg24: memref<32x1xf32, #tpu.memory_space<vmem>>, %arg25: memref<32x32xf32, #tpu.memory_space<vmem>>, %arg26: memref<32x1xf32, #tpu.memory_space<vmem>>, %arg27: memref<1x128xf32, #tpu.memory_space<vmem>>) attributes {dimension_semantics = [], scalar_prefetch = 0 : i64, scratch_operands = 0 : i64, tpu.core_type = #tpu.core_type<tc>} {
    %c0 = arith.constant 0 : index
    %c0_0 = arith.constant 0 : index
    %0 = vector.load %arg12[%c0, %c0_0] : memref<2x128xf32, #tpu.memory_space<vmem>>, vector<2x128xf32>
    %c0_1 = arith.constant 0 : index
    %c0_2 = arith.constant 0 : index
    %1 = vector.load %arg0[%c0_1, %c0_2] : memref<256x2xf32, #tpu.memory_space<vmem>>, vector<256x2xf32>
    %c0_3 = arith.constant 0 : index
    %c0_4 = arith.constant 0 : index
    %2 = vector.load %arg1[%c0_3, %c0_4] : memref<512x256xf32, #tpu.memory_space<vmem>>, vector<512x256xf32>
    %cst = arith.constant dense<0.000000e+00> : vector<512x2xf32>
    %3 = tpu.matmul %2, %1, %cst {dimension_numbers = #tpu.dot_dimension_numbers<[1], [0], [0], [1], [0, 0, 1, 1], [], []>} : vector<512x256xf32>, vector<256x2xf32>, vector<512x2xf32> -> vector<512x2xf32>
    %c0_5 = arith.constant 0 : index
    %c0_6 = arith.constant 0 : index
    %4 = vector.load %arg2[%c0_5, %c0_6] : memref<512x1xf32, #tpu.memory_space<vmem>>, vector<512x1xf32>
    %5 = vector.broadcast %4 : vector<512x1xf32> to vector<512x2xf32>
    %6 = arith.addf %3, %5 : vector<512x2xf32>
    %cst_7 = arith.constant 0.000000e+00 : f32
    %7 = vector.broadcast %cst_7 : f32 to vector<512x2xf32>
    %8 = arith.maximumf %6, %7 : vector<512x2xf32>
    %c0_8 = arith.constant 0 : index
    %c0_9 = arith.constant 0 : index
    %9 = vector.load %arg3[%c0_8, %c0_9] : memref<256x512xf32, #tpu.memory_space<vmem>>, vector<256x512xf32>
    %cst_10 = arith.constant dense<0.000000e+00> : vector<256x2xf32>
    %10 = tpu.matmul %9, %8, %cst_10 {dimension_numbers = #tpu.dot_dimension_numbers<[1], [0], [0], [1], [0, 0, 1, 1], [], []>} : vector<256x512xf32>, vector<512x2xf32>, vector<256x2xf32> -> vector<256x2xf32>
    %c0_11 = arith.constant 0 : index
    %c0_12 = arith.constant 0 : index
    %11 = vector.load %arg4[%c0_11, %c0_12] : memref<256x1xf32, #tpu.memory_space<vmem>>, vector<256x1xf32>
    %12 = vector.broadcast %11 : vector<256x1xf32> to vector<256x2xf32>
    %13 = arith.addf %10, %12 : vector<256x2xf32>
    %cst_13 = arith.constant 0.000000e+00 : f32
    %14 = vector.broadcast %cst_13 : f32 to vector<256x2xf32>
    %15 = arith.maximumf %13, %14 : vector<256x2xf32>
    %c0_14 = arith.constant 0 : index
    %c0_15 = arith.constant 0 : index
    %16 = vector.load %arg5[%c0_14, %c0_15] : memref<32x256xf32, #tpu.memory_space<vmem>>, vector<32x256xf32>
    %cst_16 = arith.constant dense<0.000000e+00> : vector<32x2xf32>
    %17 = tpu.matmul %16, %15, %cst_16 {dimension_numbers = #tpu.dot_dimension_numbers<[1], [0], [0], [1], [0, 0, 1, 1], [], []>} : vector<32x256xf32>, vector<256x2xf32>, vector<32x2xf32> -> vector<32x2xf32>
    %c0_17 = arith.constant 0 : index
    %c0_18 = arith.constant 0 : index
    %18 = vector.load %arg6[%c0_17, %c0_18] : memref<32x1xf32, #tpu.memory_space<vmem>>, vector<32x1xf32>
    %19 = vector.broadcast %18 : vector<32x1xf32> to vector<32x2xf32>
    %20 = arith.addf %17, %19 : vector<32x2xf32>
    %c0_19 = arith.constant 0 : index
    %c0_20 = arith.constant 0 : index
    %21 = vector.load %arg7[%c0_19, %c0_20] : memref<64x32xf32, #tpu.memory_space<vmem>>, vector<64x32xf32>
    %cst_21 = arith.constant dense<0.000000e+00> : vector<64x2xf32>
    %22 = tpu.matmul %21, %20, %cst_21 {dimension_numbers = #tpu.dot_dimension_numbers<[1], [0], [0], [1], [0, 0, 1, 1], [], []>} : vector<64x32xf32>, vector<32x2xf32>, vector<64x2xf32> -> vector<64x2xf32>
    %c0_22 = arith.constant 0 : index
    %c0_23 = arith.constant 0 : index
    %23 = vector.load %arg8[%c0_22, %c0_23] : memref<64x1xf32, #tpu.memory_space<vmem>>, vector<64x1xf32>
    %24 = vector.broadcast %23 : vector<64x1xf32> to vector<64x2xf32>
    %25 = arith.addf %22, %24 : vector<64x2xf32>
    %cst_24 = arith.constant 0.000000e+00 : f32
    %26 = vector.broadcast %cst_24 : f32 to vector<64x2xf32>
    %27 = arith.maximumf %25, %26 : vector<64x2xf32>
    %c0_25 = arith.constant 0 : index
    %c0_26 = arith.constant 0 : index
    %28 = vector.load %arg9[%c0_25, %c0_26] : memref<32x64xf32, #tpu.memory_space<vmem>>, vector<32x64xf32>
    %cst_27 = arith.constant dense<0.000000e+00> : vector<32x2xf32>
    %29 = tpu.matmul %28, %27, %cst_27 {dimension_numbers = #tpu.dot_dimension_numbers<[1], [0], [0], [1], [0, 0, 1, 1], [], []>} : vector<32x64xf32>, vector<64x2xf32>, vector<32x2xf32> -> vector<32x2xf32>
    %c0_28 = arith.constant 0 : index
    %c0_29 = arith.constant 0 : index
    %30 = vector.load %arg10[%c0_28, %c0_29] : memref<32x1xf32, #tpu.memory_space<vmem>>, vector<32x1xf32>
    %31 = vector.broadcast %30 : vector<32x1xf32> to vector<32x2xf32>
    %32 = arith.addf %29, %31 : vector<32x2xf32>
    %cst_30 = arith.constant dense<0.000000e+00> : vector<32x128xf32>
    %33 = tpu.matmul %32, %0, %cst_30 {dimension_numbers = #tpu.dot_dimension_numbers<[1], [0], [0], [1], [0, 0, 1, 1], [], []>} : vector<32x2xf32>, vector<2x128xf32>, vector<32x128xf32> -> vector<32x128xf32>
    %34 = vector.extract_strided_slice %33 {offsets = [0, 0], sizes = [8, 128], strides = [1, 1]} : vector<32x128xf32> to vector<8x128xf32>
    %35 = vector.extract_strided_slice %33 {offsets = [8, 0], sizes = [8, 128], strides = [1, 1]} : vector<32x128xf32> to vector<8x128xf32>
    %36 = vector.extract_strided_slice %33 {offsets = [16, 0], sizes = [8, 128], strides = [1, 1]} : vector<32x128xf32> to vector<8x128xf32>
    %37 = math.absf %36 : vector<8x128xf32>
    %38 = vector.extract_strided_slice %33 {offsets = [24, 0], sizes = [8, 128], strides = [1, 1]} : vector<32x128xf32> to vector<8x128xf32>
    %39 = math.absf %38 : vector<8x128xf32>
    %c0_31 = arith.constant 0 : index
    %c0_32 = arith.constant 0 : index
    %40 = vector.load %arg11[%c0_31, %c0_32] : memref<2x128xf32, #tpu.memory_space<vmem>>, vector<2x128xf32>
    %41 = vector.extract_strided_slice %40 {offsets = [0, 0], sizes = [1, 128], strides = [1, 1]} : vector<2x128xf32> to vector<1x128xf32>
    %42 = vector.broadcast %41 : vector<1x128xf32> to vector<8x128xf32>
    %43 = arith.subf %42, %34 : vector<8x128xf32>
    %44 = vector.extract_strided_slice %40 {offsets = [1, 0], sizes = [1, 128], strides = [1, 1]} : vector<2x128xf32> to vector<1x128xf32>
    %45 = vector.broadcast %44 : vector<1x128xf32> to vector<8x128xf32>
    %46 = arith.subf %45, %35 : vector<8x128xf32>
    %47 = arith.mulf %43, %43 : vector<8x128xf32>
    %48 = arith.mulf %46, %46 : vector<8x128xf32>
    %49 = arith.addf %47, %48 : vector<8x128xf32>
    %cst_33 = arith.constant 9.99999996E-13 : f32
    %50 = vector.broadcast %cst_33 : f32 to vector<8x128xf32>
    %51 = arith.addf %49, %50 : vector<8x128xf32>
    %52 = math.sqrt %51 : vector<8x128xf32>
    %53 = arith.subf %52, %37 : vector<8x128xf32>
    %54 = math.absf %43 : vector<8x128xf32>
    %55 = arith.subf %54, %37 : vector<8x128xf32>
    %56 = math.absf %46 : vector<8x128xf32>
    %57 = arith.subf %56, %39 : vector<8x128xf32>
    %cst_34 = arith.constant 0.000000e+00 : f32
    %58 = vector.broadcast %cst_34 : f32 to vector<8x128xf32>
    %59 = arith.maximumf %55, %58 : vector<8x128xf32>
    %60 = arith.mulf %59, %59 : vector<8x128xf32>
    %cst_35 = arith.constant 0.000000e+00 : f32
    %61 = vector.broadcast %cst_35 : f32 to vector<8x128xf32>
    %62 = arith.maximumf %57, %61 : vector<8x128xf32>
    %63 = arith.mulf %62, %62 : vector<8x128xf32>
    %64 = arith.addf %60, %63 : vector<8x128xf32>
    %cst_36 = arith.constant 9.99999996E-13 : f32
    %65 = vector.broadcast %cst_36 : f32 to vector<8x128xf32>
    %66 = arith.addf %64, %65 : vector<8x128xf32>
    %67 = math.sqrt %66 : vector<8x128xf32>
    %68 = arith.maximumf %55, %57 : vector<8x128xf32>
    %cst_37 = arith.constant 0.000000e+00 : f32
    %69 = vector.broadcast %cst_37 : f32 to vector<8x128xf32>
    %70 = arith.minimumf %68, %69 : vector<8x128xf32>
    %71 = arith.addf %67, %70 : vector<8x128xf32>
    %72 = tpu.iota {dimensions = array<i32: 0>} : vector<8x128xi32>
    %c4_i32 = arith.constant 4 : i32
    %73 = vector.broadcast %c4_i32 : i32 to vector<8x128xi32>
    %74 = arith.cmpi slt, %72, %73 : vector<8x128xi32>
    %75 = arith.select %74, %53, %71 : vector<8x128xi1>, vector<8x128xf32>
    %c0_38 = arith.constant 0 : index
    %76 = memref.load %arg13[%c0_38] : memref<1xf32, #tpu.memory_space<smem>>
    %77 = vector.broadcast %76 : f32 to vector<8x128xf32>
    %78 = arith.mulf %75, %77 : vector<8x128xf32>
    %cst_39 = arith.constant 0.000000e+00 : f32
    %cst_40 = arith.constant 1.000000e+00 : f32
    %79 = vector.broadcast %cst_39 : f32 to vector<8x128xf32>
    %80 = arith.maximumf %79, %78 : vector<8x128xf32>
    %81 = vector.broadcast %cst_40 : f32 to vector<8x128xf32>
    %82 = arith.minimumf %81, %80 : vector<8x128xf32>
    %cst_41 = arith.constant 1.000000e+00 : f32
    %83 = vector.broadcast %cst_41 : f32 to vector<8x128xf32>
    %84 = arith.subf %83, %82 : vector<8x128xf32>
    %c0_42 = arith.constant 0 : index
    %c0_43 = arith.constant 0 : index
    %85 = vector.load %arg14[%c0_42, %c0_43] : memref<32x1xf32, #tpu.memory_space<vmem>>, vector<32x1xf32>
    %86 = vector.shape_cast %85 : vector<32x1xf32> to vector<32x1xf32>
    %87 = vector.broadcast %86 : vector<32x1xf32> to vector<32x2xf32>
    %c0_44 = arith.constant 0 : index
    %c0_45 = arith.constant 0 : index
    %88 = vector.load %arg15[%c0_44, %c0_45] : memref<96x32xf32, #tpu.memory_space<vmem>>, vector<96x32xf32>
    %cst_46 = arith.constant dense<0.000000e+00> : vector<96x2xf32>
    %89 = tpu.matmul %88, %20, %cst_46 {dimension_numbers = #tpu.dot_dimension_numbers<[1], [0], [0], [1], [0, 0, 1, 1], [], []>} : vector<96x32xf32>, vector<32x2xf32>, vector<96x2xf32> -> vector<96x2xf32>
    %c0_47 = arith.constant 0 : index
    %c0_48 = arith.constant 0 : index
    %90 = vector.load %arg17[%c0_47, %c0_48] : memref<96x1xf32, #tpu.memory_space<vmem>>, vector<96x1xf32>
    %91 = vector.broadcast %90 : vector<96x1xf32> to vector<96x2xf32>
    %92 = arith.addf %89, %91 : vector<96x2xf32>
    %c0_49 = arith.constant 0 : index
    %c0_50 = arith.constant 0 : index
    %93 = vector.load %arg16[%c0_49, %c0_50] : memref<96x32xf32, #tpu.memory_space<vmem>>, vector<96x32xf32>
    %cst_51 = arith.constant dense<0.000000e+00> : vector<96x2xf32>
    %94 = tpu.matmul %93, %87, %cst_51 {dimension_numbers = #tpu.dot_dimension_numbers<[1], [0], [0], [1], [0, 0, 1, 1], [], []>} : vector<96x32xf32>, vector<32x2xf32>, vector<96x2xf32> -> vector<96x2xf32>
    %c0_52 = arith.constant 0 : index
    %c0_53 = arith.constant 0 : index
    %95 = vector.load %arg18[%c0_52, %c0_53] : memref<96x1xf32, #tpu.memory_space<vmem>>, vector<96x1xf32>
    %96 = vector.broadcast %95 : vector<96x1xf32> to vector<96x2xf32>
    %97 = arith.addf %94, %96 : vector<96x2xf32>
    %98 = vector.extract_strided_slice %92 {offsets = [0, 0], sizes = [32, 2], strides = [1, 1]} : vector<96x2xf32> to vector<32x2xf32>
    %99 = vector.extract_strided_slice %97 {offsets = [0, 0], sizes = [32, 2], strides = [1, 1]} : vector<96x2xf32> to vector<32x2xf32>
    %100 = arith.addf %98, %99 : vector<32x2xf32>
    %101 = arith.negf %100 : vector<32x2xf32>
    %102 = math.exp %101 : vector<32x2xf32>
    %cst_54 = arith.constant 1.000000e+00 : f32
    %103 = vector.broadcast %cst_54 : f32 to vector<32x2xf32>
    %104 = arith.addf %103, %102 : vector<32x2xf32>
    %105 = arith.divf %103, %104 : vector<32x2xf32>
    %106 = vector.extract_strided_slice %92 {offsets = [32, 0], sizes = [32, 2], strides = [1, 1]} : vector<96x2xf32> to vector<32x2xf32>
    %107 = vector.extract_strided_slice %97 {offsets = [32, 0], sizes = [32, 2], strides = [1, 1]} : vector<96x2xf32> to vector<32x2xf32>
    %108 = arith.addf %106, %107 : vector<32x2xf32>
    %109 = arith.negf %108 : vector<32x2xf32>
    %110 = math.exp %109 : vector<32x2xf32>
    %cst_55 = arith.constant 1.000000e+00 : f32
    %111 = vector.broadcast %cst_55 : f32 to vector<32x2xf32>
    %112 = arith.addf %111, %110 : vector<32x2xf32>
    %113 = arith.divf %111, %112 : vector<32x2xf32>
    %114 = vector.extract_strided_slice %92 {offsets = [64, 0], sizes = [32, 2], strides = [1, 1]} : vector<96x2xf32> to vector<32x2xf32>
    %115 = vector.extract_strided_slice %97 {offsets = [64, 0], sizes = [32, 2], strides = [1, 1]} : vector<96x2xf32> to vector<32x2xf32>
    %116 = arith.mulf %105, %115 : vector<32x2xf32>
    %117 = arith.addf %114, %116 : vector<32x2xf32>
    %118 = math.tanh %117 : vector<32x2xf32>
    %cst_56 = arith.constant 1.000000e+00 : f32
    %119 = vector.broadcast %cst_56 : f32 to vector<32x2xf32>
    %120 = arith.subf %119, %113 : vector<32x2xf32>
    %121 = arith.mulf %120, %118 : vector<32x2xf32>
    %122 = arith.mulf %113, %87 : vector<32x2xf32>
    %123 = arith.addf %121, %122 : vector<32x2xf32>
    %c0_57 = arith.constant 0 : index
    %c0_58 = arith.constant 0 : index
    %124 = vector.load %arg19[%c0_57, %c0_58] : memref<32x32xf32, #tpu.memory_space<vmem>>, vector<32x32xf32>
    %cst_59 = arith.constant dense<0.000000e+00> : vector<32x2xf32>
    %125 = tpu.matmul %124, %123, %cst_59 {dimension_numbers = #tpu.dot_dimension_numbers<[1], [0], [0], [1], [0, 0, 1, 1], [], []>} : vector<32x32xf32>, vector<32x2xf32>, vector<32x2xf32> -> vector<32x2xf32>
    %c0_60 = arith.constant 0 : index
    %c0_61 = arith.constant 0 : index
    %126 = vector.load %arg20[%c0_60, %c0_61] : memref<32x1xf32, #tpu.memory_space<vmem>>, vector<32x1xf32>
    %127 = vector.broadcast %126 : vector<32x1xf32> to vector<32x2xf32>
    %128 = arith.addf %125, %127 : vector<32x2xf32>
    %129 = vector.extract_strided_slice %128 {offsets = [0, 0], sizes = [8, 2], strides = [1, 1]} : vector<32x2xf32> to vector<8x2xf32>
    %cst_62 = arith.constant dense<0xFF800000> : vector<2xf32>
    %130 = vector.multi_reduction <maximumf>, %129, %cst_62 [0] : vector<8x2xf32> to vector<2xf32>
    %131 = vector.shape_cast %130 : vector<2xf32> to vector<1x2xf32>
    %132 = vector.broadcast %131 : vector<1x2xf32> to vector<8x2xf32>
    %133 = arith.subf %129, %132 : vector<8x2xf32>
    %134 = math.exp %133 : vector<8x2xf32>
    %cst_63 = arith.constant dense<0.000000e+00> : vector<2xf32>
    %135 = vector.multi_reduction <add>, %134, %cst_63 [0] : vector<8x2xf32> to vector<2xf32>
    %136 = vector.shape_cast %135 : vector<2xf32> to vector<1x2xf32>
    %137 = vector.broadcast %136 : vector<1x2xf32> to vector<8x2xf32>
    %138 = arith.divf %134, %137 : vector<8x2xf32>
    %cst_64 = arith.constant dense<0.000000e+00> : vector<8x128xf32>
    %139 = tpu.matmul %138, %0, %cst_64 {dimension_numbers = #tpu.dot_dimension_numbers<[1], [0], [0], [1], [0, 0, 1, 1], [], []>} : vector<8x2xf32>, vector<2x128xf32>, vector<8x128xf32> -> vector<8x128xf32>
    %140 = arith.mulf %139, %84 : vector<8x128xf32>
    %cst_65 = arith.constant dense<0.000000e+00> : vector<128xf32>
    %141 = vector.multi_reduction <add>, %140, %cst_65 [0] : vector<8x128xf32> to vector<128xf32>
    %142 = vector.shape_cast %141 : vector<128xf32> to vector<1x128xf32>
    %143 = vector.extract_strided_slice %128 {offsets = [8, 0], sizes = [8, 2], strides = [1, 1]} : vector<32x2xf32> to vector<8x2xf32>
    %cst_66 = arith.constant dense<0xFF800000> : vector<2xf32>
    %144 = vector.multi_reduction <maximumf>, %143, %cst_66 [0] : vector<8x2xf32> to vector<2xf32>
    %145 = vector.shape_cast %144 : vector<2xf32> to vector<1x2xf32>
    %146 = vector.broadcast %145 : vector<1x2xf32> to vector<8x2xf32>
    %147 = arith.subf %143, %146 : vector<8x2xf32>
    %148 = math.exp %147 : vector<8x2xf32>
    %cst_67 = arith.constant dense<0.000000e+00> : vector<2xf32>
    %149 = vector.multi_reduction <add>, %148, %cst_67 [0] : vector<8x2xf32> to vector<2xf32>
    %150 = vector.shape_cast %149 : vector<2xf32> to vector<1x2xf32>
    %151 = vector.broadcast %150 : vector<1x2xf32> to vector<8x2xf32>
    %152 = arith.divf %148, %151 : vector<8x2xf32>
    %cst_68 = arith.constant dense<0.000000e+00> : vector<8x128xf32>
    %153 = tpu.matmul %152, %0, %cst_68 {dimension_numbers = #tpu.dot_dimension_numbers<[1], [0], [0], [1], [0, 0, 1, 1], [], []>} : vector<8x2xf32>, vector<2x128xf32>, vector<8x128xf32> -> vector<8x128xf32>
    %154 = arith.mulf %153, %84 : vector<8x128xf32>
    %cst_69 = arith.constant dense<0.000000e+00> : vector<128xf32>
    %155 = vector.multi_reduction <add>, %154, %cst_69 [0] : vector<8x128xf32> to vector<128xf32>
    %156 = vector.shape_cast %155 : vector<128xf32> to vector<1x128xf32>
    %157 = vector.extract_strided_slice %128 {offsets = [16, 0], sizes = [8, 2], strides = [1, 1]} : vector<32x2xf32> to vector<8x2xf32>
    %cst_70 = arith.constant dense<0xFF800000> : vector<2xf32>
    %158 = vector.multi_reduction <maximumf>, %157, %cst_70 [0] : vector<8x2xf32> to vector<2xf32>
    %159 = vector.shape_cast %158 : vector<2xf32> to vector<1x2xf32>
    %160 = vector.broadcast %159 : vector<1x2xf32> to vector<8x2xf32>
    %161 = arith.subf %157, %160 : vector<8x2xf32>
    %162 = math.exp %161 : vector<8x2xf32>
    %cst_71 = arith.constant dense<0.000000e+00> : vector<2xf32>
    %163 = vector.multi_reduction <add>, %162, %cst_71 [0] : vector<8x2xf32> to vector<2xf32>
    %164 = vector.shape_cast %163 : vector<2xf32> to vector<1x2xf32>
    %165 = vector.broadcast %164 : vector<1x2xf32> to vector<8x2xf32>
    %166 = arith.divf %162, %165 : vector<8x2xf32>
    %cst_72 = arith.constant dense<0.000000e+00> : vector<8x128xf32>
    %167 = tpu.matmul %166, %0, %cst_72 {dimension_numbers = #tpu.dot_dimension_numbers<[1], [0], [0], [1], [0, 0, 1, 1], [], []>} : vector<8x2xf32>, vector<2x128xf32>, vector<8x128xf32> -> vector<8x128xf32>
    %168 = arith.mulf %167, %84 : vector<8x128xf32>
    %cst_73 = arith.constant dense<0.000000e+00> : vector<128xf32>
    %169 = vector.multi_reduction <add>, %168, %cst_73 [0] : vector<8x128xf32> to vector<128xf32>
    %170 = vector.shape_cast %169 : vector<128xf32> to vector<1x128xf32>
    %171 = vector.extract_strided_slice %128 {offsets = [24, 0], sizes = [8, 2], strides = [1, 1]} : vector<32x2xf32> to vector<8x2xf32>
    %cst_74 = arith.constant dense<0xFF800000> : vector<2xf32>
    %172 = vector.multi_reduction <maximumf>, %171, %cst_74 [0] : vector<8x2xf32> to vector<2xf32>
    %173 = vector.shape_cast %172 : vector<2xf32> to vector<1x2xf32>
    %174 = vector.broadcast %173 : vector<1x2xf32> to vector<8x2xf32>
    %175 = arith.subf %171, %174 : vector<8x2xf32>
    %176 = math.exp %175 : vector<8x2xf32>
    %cst_75 = arith.constant dense<0.000000e+00> : vector<2xf32>
    %177 = vector.multi_reduction <add>, %176, %cst_75 [0] : vector<8x2xf32> to vector<2xf32>
    %178 = vector.shape_cast %177 : vector<2xf32> to vector<1x2xf32>
    %179 = vector.broadcast %178 : vector<1x2xf32> to vector<8x2xf32>
    %180 = arith.divf %176, %179 : vector<8x2xf32>
    %cst_76 = arith.constant dense<0.000000e+00> : vector<8x128xf32>
    %181 = tpu.matmul %180, %0, %cst_76 {dimension_numbers = #tpu.dot_dimension_numbers<[1], [0], [0], [1], [0, 0, 1, 1], [], []>} : vector<8x2xf32>, vector<2x128xf32>, vector<8x128xf32> -> vector<8x128xf32>
    %182 = arith.mulf %181, %84 : vector<8x128xf32>
    %cst_77 = arith.constant dense<0.000000e+00> : vector<128xf32>
    %183 = vector.multi_reduction <add>, %182, %cst_77 [0] : vector<8x128xf32> to vector<128xf32>
    %184 = vector.shape_cast %183 : vector<128xf32> to vector<1x128xf32>
    %185 = tpu.concatenate %142, %156 in 0 : vector<1x128xf32>, vector<1x128xf32> -> vector<2x128xf32>
    %186 = tpu.concatenate %170, %184 in 0 : vector<1x128xf32>, vector<1x128xf32> -> vector<2x128xf32>
    %187 = arith.addf %185, %186 : vector<2x128xf32>
    %cst_78 = arith.constant 0.000000e+00 : f32
    %cst_79 = arith.constant 1.000000e+00 : f32
    %188 = vector.broadcast %cst_78 : f32 to vector<2x128xf32>
    %189 = arith.maximumf %188, %187 : vector<2x128xf32>
    %190 = vector.broadcast %cst_79 : f32 to vector<2x128xf32>
    %191 = arith.minimumf %190, %189 : vector<2x128xf32>
    %192 = arith.addf %185, %186 : vector<2x128xf32>
    %cst_80 = arith.constant 1.000000e+00 : f32
    %193 = vector.broadcast %cst_80 : f32 to vector<2x128xf32>
    %194 = arith.subf %192, %193 : vector<2x128xf32>
    %cst_81 = arith.constant 0.000000e+00 : f32
    %cst_82 = arith.constant 1.000000e+00 : f32
    %195 = vector.broadcast %cst_81 : f32 to vector<2x128xf32>
    %196 = arith.maximumf %195, %194 : vector<2x128xf32>
    %197 = vector.broadcast %cst_82 : f32 to vector<2x128xf32>
    %198 = arith.minimumf %197, %196 : vector<2x128xf32>
    %199 = arith.subf %185, %186 : vector<2x128xf32>
    %cst_83 = arith.constant 0.000000e+00 : f32
    %cst_84 = arith.constant 1.000000e+00 : f32
    %200 = vector.broadcast %cst_83 : f32 to vector<2x128xf32>
    %201 = arith.maximumf %200, %199 : vector<2x128xf32>
    %202 = vector.broadcast %cst_84 : f32 to vector<2x128xf32>
    %203 = arith.minimumf %202, %201 : vector<2x128xf32>
    %204 = arith.subf %186, %185 : vector<2x128xf32>
    %cst_85 = arith.constant 0.000000e+00 : f32
    %cst_86 = arith.constant 1.000000e+00 : f32
    %205 = vector.broadcast %cst_85 : f32 to vector<2x128xf32>
    %206 = arith.maximumf %205, %204 : vector<2x128xf32>
    %207 = vector.broadcast %cst_86 : f32 to vector<2x128xf32>
    %208 = arith.minimumf %207, %206 : vector<2x128xf32>
    %209 = tpu.concatenate %191, %198, %203, %208 in 0 : vector<2x128xf32>, vector<2x128xf32>, vector<2x128xf32>, vector<2x128xf32> -> vector<8x128xf32>
    %210 = tpu.concatenate %138, %152, %166, %180 in 0 : vector<8x2xf32>, vector<8x2xf32>, vector<8x2xf32>, vector<8x2xf32> -> vector<32x2xf32>
    %c0_87 = arith.constant 0 : index
    %c0_88 = arith.constant 0 : index
    %211 = vector.load %arg21[%c0_87, %c0_88] : memref<32x32xf32, #tpu.memory_space<vmem>>, vector<32x32xf32>
    %cst_89 = arith.constant dense<0.000000e+00> : vector<32x2xf32>
    %212 = tpu.matmul %211, %210, %cst_89 {dimension_numbers = #tpu.dot_dimension_numbers<[1], [0], [0], [1], [0, 0, 1, 1], [], []>} : vector<32x32xf32>, vector<32x2xf32>, vector<32x2xf32> -> vector<32x2xf32>
    %c0_90 = arith.constant 0 : index
    %c0_91 = arith.constant 0 : index
    %213 = vector.load %arg22[%c0_90, %c0_91] : memref<32x1xf32, #tpu.memory_space<vmem>>, vector<32x1xf32>
    %214 = vector.broadcast %213 : vector<32x1xf32> to vector<32x2xf32>
    %215 = arith.addf %212, %214 : vector<32x2xf32>
    %c0_92 = arith.constant 0 : index
    %c0_93 = arith.constant 0 : index
    %216 = vector.load %arg15[%c0_92, %c0_93] : memref<96x32xf32, #tpu.memory_space<vmem>>, vector<96x32xf32>
    %cst_94 = arith.constant dense<0.000000e+00> : vector<96x2xf32>
    %217 = tpu.matmul %216, %215, %cst_94 {dimension_numbers = #tpu.dot_dimension_numbers<[1], [0], [0], [1], [0, 0, 1, 1], [], []>} : vector<96x32xf32>, vector<32x2xf32>, vector<96x2xf32> -> vector<96x2xf32>
    %c0_95 = arith.constant 0 : index
    %c0_96 = arith.constant 0 : index
    %218 = vector.load %arg17[%c0_95, %c0_96] : memref<96x1xf32, #tpu.memory_space<vmem>>, vector<96x1xf32>
    %219 = vector.broadcast %218 : vector<96x1xf32> to vector<96x2xf32>
    %220 = arith.addf %217, %219 : vector<96x2xf32>
    %c0_97 = arith.constant 0 : index
    %c0_98 = arith.constant 0 : index
    %221 = vector.load %arg16[%c0_97, %c0_98] : memref<96x32xf32, #tpu.memory_space<vmem>>, vector<96x32xf32>
    %cst_99 = arith.constant dense<0.000000e+00> : vector<96x2xf32>
    %222 = tpu.matmul %221, %123, %cst_99 {dimension_numbers = #tpu.dot_dimension_numbers<[1], [0], [0], [1], [0, 0, 1, 1], [], []>} : vector<96x32xf32>, vector<32x2xf32>, vector<96x2xf32> -> vector<96x2xf32>
    %c0_100 = arith.constant 0 : index
    %c0_101 = arith.constant 0 : index
    %223 = vector.load %arg18[%c0_100, %c0_101] : memref<96x1xf32, #tpu.memory_space<vmem>>, vector<96x1xf32>
    %224 = vector.broadcast %223 : vector<96x1xf32> to vector<96x2xf32>
    %225 = arith.addf %222, %224 : vector<96x2xf32>
    %226 = vector.extract_strided_slice %220 {offsets = [0, 0], sizes = [32, 2], strides = [1, 1]} : vector<96x2xf32> to vector<32x2xf32>
    %227 = vector.extract_strided_slice %225 {offsets = [0, 0], sizes = [32, 2], strides = [1, 1]} : vector<96x2xf32> to vector<32x2xf32>
    %228 = arith.addf %226, %227 : vector<32x2xf32>
    %229 = arith.negf %228 : vector<32x2xf32>
    %230 = math.exp %229 : vector<32x2xf32>
    %cst_102 = arith.constant 1.000000e+00 : f32
    %231 = vector.broadcast %cst_102 : f32 to vector<32x2xf32>
    %232 = arith.addf %231, %230 : vector<32x2xf32>
    %233 = arith.divf %231, %232 : vector<32x2xf32>
    %234 = vector.extract_strided_slice %220 {offsets = [32, 0], sizes = [32, 2], strides = [1, 1]} : vector<96x2xf32> to vector<32x2xf32>
    %235 = vector.extract_strided_slice %225 {offsets = [32, 0], sizes = [32, 2], strides = [1, 1]} : vector<96x2xf32> to vector<32x2xf32>
    %236 = arith.addf %234, %235 : vector<32x2xf32>
    %237 = arith.negf %236 : vector<32x2xf32>
    %238 = math.exp %237 : vector<32x2xf32>
    %cst_103 = arith.constant 1.000000e+00 : f32
    %239 = vector.broadcast %cst_103 : f32 to vector<32x2xf32>
    %240 = arith.addf %239, %238 : vector<32x2xf32>
    %241 = arith.divf %239, %240 : vector<32x2xf32>
    %242 = vector.extract_strided_slice %220 {offsets = [64, 0], sizes = [32, 2], strides = [1, 1]} : vector<96x2xf32> to vector<32x2xf32>
    %243 = vector.extract_strided_slice %225 {offsets = [64, 0], sizes = [32, 2], strides = [1, 1]} : vector<96x2xf32> to vector<32x2xf32>
    %244 = arith.mulf %233, %243 : vector<32x2xf32>
    %245 = arith.addf %242, %244 : vector<32x2xf32>
    %246 = math.tanh %245 : vector<32x2xf32>
    %cst_104 = arith.constant 1.000000e+00 : f32
    %247 = vector.broadcast %cst_104 : f32 to vector<32x2xf32>
    %248 = arith.subf %247, %241 : vector<32x2xf32>
    %249 = arith.mulf %248, %246 : vector<32x2xf32>
    %250 = arith.mulf %241, %123 : vector<32x2xf32>
    %251 = arith.addf %249, %250 : vector<32x2xf32>
    %252 = tpu.concatenate %209, %84 in 0 : vector<8x128xf32>, vector<8x128xf32> -> vector<16x128xf32>
    %c0_105 = arith.constant 0 : index
    %c0_106 = arith.constant 0 : index
    %253 = vector.load %arg23[%c0_105, %c0_106] : memref<32x32xf32, #tpu.memory_space<vmem>>, vector<32x32xf32>
    %cst_107 = arith.constant dense<0.000000e+00> : vector<32x2xf32>
    %254 = tpu.matmul %253, %251, %cst_107 {dimension_numbers = #tpu.dot_dimension_numbers<[1], [0], [0], [1], [0, 0, 1, 1], [], []>} : vector<32x32xf32>, vector<32x2xf32>, vector<32x2xf32> -> vector<32x2xf32>
    %c0_108 = arith.constant 0 : index
    %c0_109 = arith.constant 0 : index
    %255 = vector.load %arg24[%c0_108, %c0_109] : memref<32x1xf32, #tpu.memory_space<vmem>>, vector<32x1xf32>
    %256 = vector.broadcast %255 : vector<32x1xf32> to vector<32x2xf32>
    %257 = arith.addf %254, %256 : vector<32x2xf32>
    %258 = vector.extract_strided_slice %257 {offsets = [0, 0], sizes = [16, 2], strides = [1, 1]} : vector<32x2xf32> to vector<16x2xf32>
    %cst_110 = arith.constant dense<0xFF800000> : vector<2xf32>
    %259 = vector.multi_reduction <maximumf>, %258, %cst_110 [0] : vector<16x2xf32> to vector<2xf32>
    %260 = vector.shape_cast %259 : vector<2xf32> to vector<1x2xf32>
    %261 = vector.broadcast %260 : vector<1x2xf32> to vector<16x2xf32>
    %262 = arith.subf %258, %261 : vector<16x2xf32>
    %263 = math.exp %262 : vector<16x2xf32>
    %cst_111 = arith.constant dense<0.000000e+00> : vector<2xf32>
    %264 = vector.multi_reduction <add>, %263, %cst_111 [0] : vector<16x2xf32> to vector<2xf32>
    %265 = vector.shape_cast %264 : vector<2xf32> to vector<1x2xf32>
    %266 = vector.broadcast %265 : vector<1x2xf32> to vector<16x2xf32>
    %267 = arith.divf %263, %266 : vector<16x2xf32>
    %cst_112 = arith.constant dense<0.000000e+00> : vector<16x128xf32>
    %268 = tpu.matmul %267, %0, %cst_112 {dimension_numbers = #tpu.dot_dimension_numbers<[1], [0], [0], [1], [0, 0, 1, 1], [], []>} : vector<16x2xf32>, vector<2x128xf32>, vector<16x128xf32> -> vector<16x128xf32>
    %269 = arith.mulf %268, %252 : vector<16x128xf32>
    %cst_113 = arith.constant dense<0.000000e+00> : vector<128xf32>
    %270 = vector.multi_reduction <add>, %269, %cst_113 [0] : vector<16x128xf32> to vector<128xf32>
    %271 = vector.shape_cast %270 : vector<128xf32> to vector<1x128xf32>
    %272 = vector.extract_strided_slice %257 {offsets = [16, 0], sizes = [16, 2], strides = [1, 1]} : vector<32x2xf32> to vector<16x2xf32>
    %cst_114 = arith.constant dense<0xFF800000> : vector<2xf32>
    %273 = vector.multi_reduction <maximumf>, %272, %cst_114 [0] : vector<16x2xf32> to vector<2xf32>
    %274 = vector.shape_cast %273 : vector<2xf32> to vector<1x2xf32>
    %275 = vector.broadcast %274 : vector<1x2xf32> to vector<16x2xf32>
    %276 = arith.subf %272, %275 : vector<16x2xf32>
    %277 = math.exp %276 : vector<16x2xf32>
    %cst_115 = arith.constant dense<0.000000e+00> : vector<2xf32>
    %278 = vector.multi_reduction <add>, %277, %cst_115 [0] : vector<16x2xf32> to vector<2xf32>
    %279 = vector.shape_cast %278 : vector<2xf32> to vector<1x2xf32>
    %280 = vector.broadcast %279 : vector<1x2xf32> to vector<16x2xf32>
    %281 = arith.divf %277, %280 : vector<16x2xf32>
    %cst_116 = arith.constant dense<0.000000e+00> : vector<16x128xf32>
    %282 = tpu.matmul %281, %0, %cst_116 {dimension_numbers = #tpu.dot_dimension_numbers<[1], [0], [0], [1], [0, 0, 1, 1], [], []>} : vector<16x2xf32>, vector<2x128xf32>, vector<16x128xf32> -> vector<16x128xf32>
    %283 = arith.mulf %282, %252 : vector<16x128xf32>
    %cst_117 = arith.constant dense<0.000000e+00> : vector<128xf32>
    %284 = vector.multi_reduction <add>, %283, %cst_117 [0] : vector<16x128xf32> to vector<128xf32>
    %285 = vector.shape_cast %284 : vector<128xf32> to vector<1x128xf32>
    %286 = arith.addf %271, %285 : vector<1x128xf32>
    %cst_118 = arith.constant 0.000000e+00 : f32
    %cst_119 = arith.constant 1.000000e+00 : f32
    %287 = vector.broadcast %cst_118 : f32 to vector<1x128xf32>
    %288 = arith.maximumf %287, %286 : vector<1x128xf32>
    %289 = vector.broadcast %cst_119 : f32 to vector<1x128xf32>
    %290 = arith.minimumf %289, %288 : vector<1x128xf32>
    %291 = arith.addf %271, %285 : vector<1x128xf32>
    %cst_120 = arith.constant 1.000000e+00 : f32
    %292 = vector.broadcast %cst_120 : f32 to vector<1x128xf32>
    %293 = arith.subf %291, %292 : vector<1x128xf32>
    %cst_121 = arith.constant 0.000000e+00 : f32
    %cst_122 = arith.constant 1.000000e+00 : f32
    %294 = vector.broadcast %cst_121 : f32 to vector<1x128xf32>
    %295 = arith.maximumf %294, %293 : vector<1x128xf32>
    %296 = vector.broadcast %cst_122 : f32 to vector<1x128xf32>
    %297 = arith.minimumf %296, %295 : vector<1x128xf32>
    %298 = arith.subf %271, %285 : vector<1x128xf32>
    %cst_123 = arith.constant 0.000000e+00 : f32
    %cst_124 = arith.constant 1.000000e+00 : f32
    %299 = vector.broadcast %cst_123 : f32 to vector<1x128xf32>
    %300 = arith.maximumf %299, %298 : vector<1x128xf32>
    %301 = vector.broadcast %cst_124 : f32 to vector<1x128xf32>
    %302 = arith.minimumf %301, %300 : vector<1x128xf32>
    %303 = arith.subf %285, %271 : vector<1x128xf32>
    %cst_125 = arith.constant 0.000000e+00 : f32
    %cst_126 = arith.constant 1.000000e+00 : f32
    %304 = vector.broadcast %cst_125 : f32 to vector<1x128xf32>
    %305 = arith.maximumf %304, %303 : vector<1x128xf32>
    %306 = vector.broadcast %cst_126 : f32 to vector<1x128xf32>
    %307 = arith.minimumf %306, %305 : vector<1x128xf32>
    %308 = tpu.concatenate %290, %297, %302, %307 in 0 : vector<1x128xf32>, vector<1x128xf32>, vector<1x128xf32>, vector<1x128xf32> -> vector<4x128xf32>
    %309 = vector.extract_strided_slice %308 {offsets = [0, 0], sizes = [1, 128], strides = [1, 1]} : vector<4x128xf32> to vector<1x128xf32>
    %cst_127 = arith.constant 0.000000e+00 : f32
    %cst_128 = arith.constant 1.000000e+00 : f32
    %310 = vector.broadcast %cst_127 : f32 to vector<1x128xf32>
    %311 = arith.maximumf %310, %309 : vector<1x128xf32>
    %312 = vector.broadcast %cst_128 : f32 to vector<1x128xf32>
    %313 = arith.minimumf %312, %311 : vector<1x128xf32>
    %c0_129 = arith.constant 0 : index
    %c0_130 = arith.constant 0 : index
    %314 = vector.load %arg27[%c0_129, %c0_130] : memref<1x128xf32, #tpu.memory_space<vmem>>, vector<1x128xf32>
    tpu.vector_store %arg27[%c0_129, %c0_130], %313 {strides = array<i32>} : memref<1x128xf32, #tpu.memory_space<vmem>>, vector<1x128xf32>,
    return
  }
}

</mosaic_0001>

<bundles_post_ra>
// kernel: csgnet_forward.1
= control target key start
LH: loop header
LB: loop body
LE: loop exit
PB: predicated region body
PF: predicated region fallthrough
CT: control target
= control target key end

     0   :  { %s7495_s0 = inlined_call_operand.vmem [shape: f32[256,2], index: 0, kind: input, shape index: {}]   ;;  %s7496_s1 = inlined_call_operand.vmem [shape: f32[512,256], index: 1, kind: input, shape index: {}]   ;;  %s7497_s2 = inlined_call_operand.vmem [shape: f32[512,1], index: 2, kind: input, shape index: {}]   ;;  %s7498_s3 = inlined_call_operand.hbm [shape: f32[256,512], index: 3, kind: input, shape index: {}]   ;;  %s7499_s4 = inlined_call_operand.vmem [shape: f32[256,1], index: 4, kind: input, shape index: {}]   ;;  %s7500_s5 = inlined_call_operand.vmem [shape: f32[32,256], index: 5, kind: input, shape index: {}]   ;;  %s7501_s6 = inlined_call_operand.vmem [shape: f32[32,1], index: 6, kind: input, shape index: {}]   ;;  %s7502_s7 = inlined_call_operand.vmem [shape: f32[64,32], index: 7, kind: input, shape index: {}]   ;;  %s7503_s8 = inlined_call_operand.vmem [shape: f32[64,1], index: 8, kind: input, shape index: {}]   ;;  %s7504_s9 = inlined_call_operand.vmem [shape: f32[32,64], index: 9, kind: input, shape index: {}]   ;;  %s7505_s10 = inlined_call_operand.vmem [shape: f32[32,1], index: 10, kind: input, shape index: {}]   ;;  %s7506_s11 = inlined_call_operand.vmem [shape: f32[2,128], index: 11, kind: input, shape index: {}]   ;;  %s7507_s12 = inlined_call_operand.vmem [shape: f32[2,128], index: 12, kind: input, shape index: {}]   ;;  %s7508_s13 = inlined_call_operand.<no memory space> [shape: f32[1], index: 13, kind: input, shape index: {}]   ;;  %s7509_s14 = inlined_call_operand.vmem [shape: f32[32,1], index: 14, kind: input, shape index: {}]   ;;  %s7510_s15 = inlined_call_operand.vmem [shape: f32[96,32], index: 15, kind: input, shape index: {}]   ;;  %s7511_s16 = inlined_call_operand.vmem [shape: f32[96,32], index: 16, kind: input, shape index: {}]   ;;  %s7512_s17 = inlined_call_operand.vmem [shape: f32[96,1], index: 17, kind: input, shape index: {}]   ;;  %s7513_s18 = inlined_call_operand.vmem [shape: f32[96,1], index: 18, kind: input, shape index: {}]   ;;  %s7514_s19 = inlined_call_operand.vmem [shape: f32[32,32], index: 19, kind: input, shape index: {}]   ;;  %s7515_s20 = inlined_call_operand.vmem [shape: f32[32,1], index: 20, kind: input, shape index: {}]   ;;  %s7516_s21 = inlined_call_operand.vmem [shape: f32[32,32], index: 21, kind: input, shape index: {}]   ;;  %s7517_s22 = inlined_call_operand.vmem [shape: f32[32,1], index: 22, kind: input, shape index: {}]   ;;  %s7518_s23 = inlined_call_operand.vmem [shape: f32[32,32], index: 23, kind: input, shape index: {}]   ;;  %s7519_s24 = inlined_call_operand.vmem [shape: f32[32,1], index: 24, kind: input, shape index: {}]   ;;  %s7520_s25 = inlined_call_operand.vmem [shape: f32[32,32], index: 25, kind: input, shape index: {}]   ;;  %s7521_s26 = inlined_call_operand.vmem [shape: f32[32,1], index: 26, kind: input, shape index: {}]   ;;  %s7522_s27 = inlined_call_operand.vmem [shape: f32[1,128], index: 27, kind: output, shape index: {}]  }
   0x1   :  { %7553 = sst [smem:[#allocation22_spill]] %s7495_s0 }
   0x2   :  { %7554 = sst [smem:[#allocation23_spill]] %s7496_s1 }
   0x3   :  { %7555 = sst [smem:[#allocation24_spill]] %s7497_s2 }
   0x4   :  { %7556 = sst [smem:[#allocation25_spill]] %s7498_s3 }
   0x5   :  { %7557 = sst [smem:[#allocation26_spill]] %s7499_s4 }
   0x6   :  { %7558 = sst [smem:[#allocation27_spill]] %s7500_s5 }
   0x7   :  { %7559 = sst [smem:[#allocation28_spill]] %s7501_s6 }
   0x8   :  { %7560 = sst [smem:[#allocation29_spill]] %s7502_s7 }
   0x9   :  { %7561 = sst [smem:[#allocation30_spill]] %s7503_s8 }
   0xa   :  { %7562 = sst [smem:[#allocation31_spill]] %s7504_s9 }
   0xb   :  { %7563 = sst [smem:[#allocation32_spill]] %s7505_s10 }
   0xc   :  { %7564 = sst [smem:[#allocation33_spill]] %s7506_s11 }
   0xd   :  { %7565 = sst [smem:[#allocation34_spill]] %s7518_s23 }
   0xe   :  { %33 = vsyncpa [#allocation4], 0  ;;  %s5537_s7 = smov [#allocation3]   ;;  %s7566_s9 = sld [smem:[#allocation25_spill]] }
   0xf   :  { %s45_s4 = sshll.u32 %s5537_s7, 4  ;;  %s46_s4 = int_to_ptr.vmem [resolvable:$true] %s45_s4 }
  0x14   :  { %s5513_s5 = scalar_lea.hbm %s7566_s9, 16384 }
  0x15   :  { %p5514_p0 = scmp.ne.s32.totalorder %s7566_s9, %s5513_s5  ;;  %p5517_p1 = scmp.lt.u32.totalorder %s5513_s5, %s7566_s9 }
  0x17   :  { %p5519_p2 = pnand %p5517_p1, %p5514_p0 }
  0x19   :  { %5522 = shalt.err (!%p5519_p2)
}
  0x1a   :  { %s5523_s26 = scalar_lea.vmem %s46_s4, 16384  ;;  %p5528_p4 = scmp.lt.s32.totalorder %s46_s4, %s46_s4 }
  0x1b   :  { %p5524_p3 = scmp.ne.s32.totalorder %s46_s4, %s5523_s26  ;;  %p5529_p5 = scmp.lt.s32.totalorder %s5523_s26, %s5523_s26 }
  0x1d   :  { %p5530_p6 = por %p5529_p5, %p5528_p4 }
  0x1f   :  { %p5531_p7 = pnand %p5530_p6, %p5524_p3 }
  0x21   :  { %5534 = shalt.err (!%p5531_p7)
}
  0x22   :  { %s5538_s10 = smov 512   ;;  %s5539_s29 = smov 32  }
  0x23   :  { %51 = dma.hbm_to_vmem [thread:$0]  %s7566_s9, 16384, %s46_s4, [#allocation4], %s5538_s10, %s5538_s10, %s5539_s29  }
  0x24   :  { %5535 = dma.done.wait [#allocation4], 16384  }
  0x25   :  { %5536 = vsyncadd [#allocation4], 4294950912  ;;  %v5540_v0 = vmov 0   ;;  %v5541_v1 = vmov 0.0|0.0   ;;  %s7567_s2 = sld [smem:[#allocation24_spill]]  ;;  %s7568_s30 = sld [smem:[#allocation22_spill]] }
  0x26   :  { %5399 = vset.pattern.permute.xlu1 %v5540_v0  ;;  %5398 = vset.pattern.permute.xlu0 %v5540_v0  ;;  %s7569_s25 = sld [smem:[#allocation23_spill]]  ;;  %s7571_s0 = sld [smem:[#allocation28_spill]]  ;;  %vm2070_vm0 = vcmask 261120   ;;  %vm2236_vm1 = vcmask 523264   ;;  %vm2347_vm2 = vcmask 1041408   ;;  %vm2334_vm3 = vcmask 15360  }
  0x27   :  { %4991 = vmatprep.subr.bf16.mxu0 %v5541_v1  ;;  %5039 = vmatprep.subr.bf16.mxu1 %v5541_v1  ;;  %s7573_s26 = sld [smem:[#allocation32_spill]]  ;;  %s7576_s1 = sld [smem:[#allocation31_spill]]  ;;  %vm5543_vm9 = vmmov 0   ;;  %vm3610_vm10 = vcmask 1040384   ;;  %vm3635_vm11 = vcmask 1043456   ;;  %vm3637_vm12 = vcmask 1045504  }
  0x28   :  { %s7595_s23 = sld [smem:[#allocation34_spill]]  ;;  %vm4471_vm13 = vcmask 1042432  }
  0x2b   :  { %v264_v2 = vld [vmem:[%s7567_s2 + $0x10] sm:$0xff]  ;;  %v262_v3 = vld [vmem:[%s7567_s2] sm:$0xff]  ;;  %v103_v5 = vld [vmem:[%s7568_s30 + $0x8] sm:$0xff] }
  0x2c   :  { %v102_v4 = vld [vmem:[%s7568_s30] sm:$0xff]  ;;  %338 = vperm.xlu1 %5399, %v264_v2   ;;  %328 = vperm.xlu0 %5398, %v262_v3   ;;  %v265_v6 = vld [vmem:[%s7567_s2 + $0x18] sm:$0xff]  ;;  %v263_v8 = vld [vmem:[%s7567_s2 + $0x8] sm:$0xff] }
  0x2d   :  { %v4992_v7 = vpack.c.bf16 %v103_v5, %v102_v4  ;;  %v104_v9 = vld [vmem:[%s7568_s30 + $0x10] sm:$0xff]  ;;  %v105_v10 = vld [vmem:[%s7568_s30 + $0x18] sm:$0xff]  ;;  %v106_v12 = vld [vmem:[%s7568_s30 + $0x20] sm:$0xff] }
  0x2e   :  { %v4995_v11 = vpack.c.bf16 %v105_v10, %v104_v9  ;;  %v107_v13 = vld [vmem:[%s7568_s30 + $0x28] sm:$0xff]  ;;  %v266_v15 = vld [vmem:[%s7567_s2 + $0x20] sm:$0xff]  ;;  %v108_v17 = vld [vmem:[%s7568_s30 + $0x30] sm:$0xff] }
  0x2f   :  { %4993 = vmatpush1.bf16.msra.mxu0 %v4992_v7  ;;  %v267_v14 = vld [vmem:[%s7567_s2 + $0x28] sm:$0xff]  ;;  %v4998_v16 = vpack.c.bf16 %v107_v13, %v106_v12  ;;  %v109_v18 = vld [vmem:[%s7568_s30 + $0x38] sm:$0xff]  ;;  %v268_v20 = vld [vmem:[%s7567_s2 + $0x30] sm:$0xff] }
  0x30   :  { %343 = vperm.xlu1 %5399, %v265_v6   ;;  %333 = vperm.xlu0 %5398, %v263_v8   ;;  %v269_v19 = vld [vmem:[%s7567_s2 + $0x38] sm:$0xff]  ;;  %v5001_v21 = vpack.c.bf16 %v109_v18, %v108_v17  ;;  %v110_v22 = vld [vmem:[%s7568_s30 + $0x40] sm:$0xff]  ;;  %v111_v23 = vld [vmem:[%s7568_s30 + $0x48] sm:$0xff] }
  0x31   :  { %4994 = vmatprep.subr.bf16.mxu0 %v5541_v1  ;;  %v271_v24 = vld [vmem:[%s7567_s2 + $0x48] sm:$0xff]  ;;  %v270_v25 = vld [vmem:[%s7567_s2 + $0x40] sm:$0xff]  ;;  %v5004_v26 = vpack.c.bf16 %v111_v23, %v110_v22  ;;  %v112_v27 = vld [vmem:[%s7568_s30 + $0x50] sm:$0xff] }
  0x32   :  { %v113_v28 = vld [vmem:[%s7568_s30 + $0x58] sm:$0xff]  ;;  %v272_v30 = vld [vmem:[%s7567_s2 + $0x50] sm:$0xff]  ;;  %v114_v32 = vld [vmem:[%s7568_s30 + $0x60] sm:$0xff] }
  0x33   :  { %4996 = vmatpush1.bf16.msra.mxu0 %v4995_v11  ;;  %v273_v29 = vld [vmem:[%s7567_s2 + $0x58] sm:$0xff]  ;;  %v5007_v31 = vpack.c.bf16 %v113_v28, %v112_v27  ;;  %v115_v33 = vld [vmem:[%s7568_s30 + $0x68] sm:$0xff]  ;;  %v274_v35 = vld [vmem:[%s7567_s2 + $0x60] sm:$0xff] }
  0x34   :  { %353 = vperm.xlu1 %5399, %v267_v14   ;;  %348 = vperm.xlu0 %5398, %v266_v15   ;;  %v275_v34 = vld [vmem:[%s7567_s2 + $0x68] sm:$0xff]  ;;  %v5010_v37 = vpack.c.bf16 %v115_v33, %v114_v32  ;;  %v116_v38 = vld [vmem:[%s7568_s30 + $0x70] sm:$0xff]  ;;  %v117_v39 = vld [vmem:[%s7568_s30 + $0x78] sm:$0xff] }
  0x35   :  { %4997 = vmatprep.subr.bf16.mxu0 %v5541_v1  ;;  %v135_v36 = vld [vmem:[%s7569_s25 + $0x8] sm:$0xff]  ;;  %v277_v40 = vld [vmem:[%s7567_s2 + $0x78] sm:$0xff]  ;;  %v276_v41 = vld [vmem:[%s7567_s2 + $0x70] sm:$0xff]  ;;  %v5013_v42 = vpack.c.bf16 %v117_v39, %v116_v38 }
  0x36   :  { %710 = vmatprep.mubr.f32.mxu0 %v135_v36  ;;  %v118_v43 = vld [vmem:[%s7568_s30 + $0x80] sm:$0xff]  ;;  %v119_v44 = vld [vmem:[%s7568_s30 + $0x88] sm:$0xff]  ;;  %v120_v48 = vld [vmem:[%s7568_s30 + $0x90] sm:$0xff] }
  0x37   :  { %4999 = vmatpush1.bf16.msra.mxu0 %v4998_v16  ;;  %v279_v45 = vld [vmem:[%s7567_s2 + $0x88] sm:$0xff]  ;;  %v278_v46 = vld [vmem:[%s7567_s2 + $0x80] sm:$0xff]  ;;  %v5016_v47 = vpack.c.bf16 %v119_v44, %v118_v43  ;;  %v121_v49 = vld [vmem:[%s7568_s30 + $0x98] sm:$0xff] }
  0x38   :  { %363 = vperm.xlu1 %5399, %v269_v19   ;;  %358 = vperm.xlu0 %5398, %v268_v20   ;;  %v281_v50 = vld [vmem:[%s7567_s2 + $0x98] sm:$0xff]  ;;  %v280_v51 = vld [vmem:[%s7567_s2 + $0x90] sm:$0xff]  ;;  %v5019_v52 = vpack.c.bf16 %v121_v49, %v120_v48  ;;  %v122_v53 = vld [vmem:[%s7568_s30 + $0xa0] sm:$0xff] }
  0x39   :  { %5000 = vmatprep.subr.bf16.mxu0 %v5541_v1  ;;  %v123_v54 = vld [vmem:[%s7568_s30 + $0xa8] sm:$0xff]  ;;  %v282_v56 = vld [vmem:[%s7567_s2 + $0xa0] sm:$0xff]  ;;  %v124_v58 = vld [vmem:[%s7568_s30 + $0xb0] sm:$0xff] }
  0x3a   :  { %v283_v55 = vld [vmem:[%s7567_s2 + $0xa8] sm:$0xff]  ;;  %v5022_v57 = vpack.c.bf16 %v123_v54, %v122_v53  ;;  %v125_v59 = vld [vmem:[%s7568_s30 + $0xb8] sm:$0xff]  ;;  %v284_v61 = vld [vmem:[%s7567_s2 + $0xb0] sm:$0xff] }
  0x3b   :  { %5002 = vmatpush1.bf16.msra.mxu0 %v5001_v21  ;;  %v285_v60 = vld [vmem:[%s7567_s2 + $0xb8] sm:$0xff]  ;;  %v5025_v62 = vpack.c.bf16 %v125_v59, %v124_v58  ;;  %v126_v63 = vld [vmem:[%s7568_s30 + $0xc0] sm:$0xff]  ;;  %v127_v0 = vld [vmem:[%s7568_s30 + $0xc8] sm:$0xff] }
  0x3c   :  { %373 = vperm.xlu1 %5399, %v271_v24   ;;  %368 = vperm.xlu0 %5398, %v270_v25   ;;  %v287_v2 = vld [vmem:[%s7567_s2 + $0xc8] sm:$0xff]  ;;  %v286_v3 = vld [vmem:[%s7567_s2 + $0xc0] sm:$0xff]  ;;  %v5028_v4 = vpack.c.bf16 %v127_v0, %v126_v63  ;;  %v128_v5 = vld [vmem:[%s7568_s30 + $0xd0] sm:$0xff] }
  0x3d   :  { %5003 = vmatprep.subr.bf16.mxu0 %v5541_v1  ;;  %v129_v6 = vld [vmem:[%s7568_s30 + $0xd8] sm:$0xff]  ;;  %v288_v8 = vld [vmem:[%s7567_s2 + $0xd0] sm:$0xff]  ;;  %v130_v10 = vld [vmem:[%s7568_s30 + $0xe0] sm:$0xff] }
  0x3e   :  { %v289_v7 = vld [vmem:[%s7567_s2 + $0xd8] sm:$0xff]  ;;  %v5031_v9 = vpack.c.bf16 %v129_v6, %v128_v5  ;;  %v131_v11 = vld [vmem:[%s7568_s30 + $0xe8] sm:$0xff]  ;;  %v290_v13 = vld [vmem:[%s7567_s2 + $0xe0] sm:$0xff] }
  0x3f   :  { %5005 = vmatpush1.bf16.msra.mxu0 %v5004_v26  ;;  %v291_v12 = vld [vmem:[%s7567_s2 + $0xe8] sm:$0xff]  ;;  %v5034_v14 = vpack.c.bf16 %v131_v11, %v130_v10  ;;  %v132_v15 = vld [vmem:[%s7568_s30 + $0xf0] sm:$0xff]  ;;  %v133_v16 = vld [vmem:[%s7568_s30 + $0xf8] sm:$0xff]  ;;  %s7570_s30 = sld [smem:[#allocation26_spill]] }
  0x40   :  { %383 = vperm.xlu1 %5399, %v273_v29   ;;  %378 = vperm.xlu0 %5398, %v272_v30   ;;  %v293_v17 = vld [vmem:[%s7567_s2 + $0xf8] sm:$0xff]  ;;  %v292_v18 = vld [vmem:[%s7567_s2 + $0xf0] sm:$0xff]  ;;  %v5037_v19 = vpack.c.bf16 %v133_v16, %v132_v15  ;;  %v295_v20 = vld [vmem:[%s7567_s2 + $0x108] sm:$0xff] }
  0x41   :  { %5006 = vmatprep.subr.bf16.mxu0 %v5541_v1  ;;  %v294_v21 = vld [vmem:[%s7567_s2 + $0x100] sm:$0xff]  ;;  %v137_v23 = vld [vmem:[%s7569_s25 + $0x18] sm:$0xff]  ;;  %v296_v25 = vld [vmem:[%s7567_s2 + $0x110] sm:$0xff] }
  0x42   :  { %v134_v22 = vld [vmem:[%s7569_s25] sm:$0xff]  ;;  %v297_v24 = vld [vmem:[%s7567_s2 + $0x118] sm:$0xff]  ;;  %v136_v26 = vld [vmem:[%s7569_s25 + $0x10] sm:$0xff] }
  0x43   :  { %5008 = vmatpush1.bf16.msra.mxu0 %v5007_v31  ;;  %v139_v27 = vld [vmem:[%s7569_s25 + $0x28] sm:$0xff]  ;;  %v298_v29 = vld [vmem:[%s7567_s2 + $0x120] sm:$0xff]  ;;  %v141_v31 = vld [vmem:[%s7569_s25 + $0x38] sm:$0xff] }
  0x44   :  { %393 = vperm.xlu1 %5399, %v275_v34   ;;  %388 = vperm.xlu0 %5398, %v274_v35   ;;  %v299_v28 = vld [vmem:[%s7567_s2 + $0x128] sm:$0xff]  ;;  %v138_v30 = vld [vmem:[%s7569_s25 + $0x20] sm:$0xff]  ;;  %v301_v32 = vld [vmem:[%s7567_s2 + $0x138] sm:$0xff] }
  0x45   :  { %5009 = vmatprep.subr.bf16.mxu0 %v5541_v1  ;;  %v300_v33 = vld [vmem:[%s7567_s2 + $0x130] sm:$0xff]  ;;  %v143_v35 = vld [vmem:[%s7569_s25 + $0x48] sm:$0xff]  ;;  %v142_v38 = vld [vmem:[%s7569_s25 + $0x40] sm:$0xff] }
  0x46   :  { %v140_v34 = vld [vmem:[%s7569_s25 + $0x30] sm:$0xff]  ;;  %v303_v36 = vld [vmem:[%s7567_s2 + $0x148] sm:$0xff]  ;;  %v145_v39 = vld [vmem:[%s7569_s25 + $0x58] sm:$0xff] }
  0x47   :  { %5011 = vmatpush1.bf16.msra.mxu0 %v5010_v37  ;;  %v302_v37 = vld [vmem:[%s7567_s2 + $0x140] sm:$0xff]  ;;  %v147_v43 = vld [vmem:[%s7569_s25 + $0x68] sm:$0xff]  ;;  %v309_v48 = vld [vmem:[%s7567_s2 + $0x178] sm:$0xff] }
  0x48   :  { %403 = vperm.xlu1 %5399, %v277_v40   ;;  %398 = vperm.xlu0 %5398, %v276_v41   ;;  %v305_v40 = vld [vmem:[%s7567_s2 + $0x158] sm:$0xff]  ;;  %v304_v41 = vld [vmem:[%s7567_s2 + $0x150] sm:$0xff]  ;;  %v307_v44 = vld [vmem:[%s7567_s2 + $0x168] sm:$0xff] }
  0x49   :  { %5012 = vmatprep.subr.bf16.mxu0 %v5541_v1  ;;  %v308_v49 = vld [vmem:[%s7567_s2 + $0x170] sm:$0xff]  ;;  %v310_v53 = vld [vmem:[%s7567_s2 + $0x180] sm:$0xff]  ;;  %v155_v59 = vld [vmem:[%s7569_s25 + $0xa8] sm:$0xff] }
  0x4a   :  { %v150_v54 = vld [vmem:[%s7569_s25 + $0x80] sm:$0xff]  ;;  %v152_v58 = vld [vmem:[%s7569_s25 + $0x90] sm:$0xff]  ;;  %v157_v63 = vld [vmem:[%s7569_s25 + $0xb8] sm:$0xff] }
  0x4b   :  { %5014 = vmatpush1.bf16.msra.mxu0 %v5013_v42  ;;  %v144_v42 = vld [vmem:[%s7569_s25 + $0x50] sm:$0xff]  ;;  %v317_v0 = vld [vmem:[%s7567_s2 + $0x1b8] sm:$0xff]  ;;  %v319_v5 = vld [vmem:[%s7567_s2 + $0x1c8] sm:$0xff] }
  0x4c   :  { %413 = vperm.xlu1 %5399, %v279_v45   ;;  %408 = vperm.xlu0 %5398, %v278_v46   ;;  %v306_v45 = vld [vmem:[%s7567_s2 + $0x160] sm:$0xff]  ;;  %v320_v10 = vld [vmem:[%s7567_s2 + $0x1d0] sm:$0xff]  ;;  %v165_v16 = vld [vmem:[%s7569_s25 + $0xf8] sm:$0xff] }
  0x4d   :  { %5015 = vmatprep.subr.bf16.mxu0 %v5541_v1  ;;  %v146_v46 = vld [vmem:[%s7569_s25 + $0x60] sm:$0xff]  ;;  %v160_v11 = vld [vmem:[%s7569_s25 + $0xd0] sm:$0xff] }
  0x4e   :  { %v318_v6 = vld [vmem:[%s7567_s2 + $0x1c0] sm:$0xff] }
  0x4f   :  { %5017 = vmatpush1.bf16.msra.mxu0 %v5016_v47  ;;  %v149_v47 = vld [vmem:[%s7569_s25 + $0x78] sm:$0xff]  ;;  %v162_v15 = vld [vmem:[%s7569_s25 + $0xe0] sm:$0xff] }
  0x50   :  { %423 = vperm.xlu1 %5399, %v281_v50   ;;  %418 = vperm.xlu0 %5398, %v280_v51   ;;  %v148_v50 = vld [vmem:[%s7569_s25 + $0x70] sm:$0xff]  ;;  %v151_v51 = vld [vmem:[%s7569_s25 + $0x88] sm:$0xff] }
  0x51   :  { %5018 = vmatprep.subr.bf16.mxu0 %v5541_v1 }
  0x53   :  { %5020 = vmatpush1.bf16.msra.mxu0 %v5019_v52  ;;  %v311_v52 = vld [vmem:[%s7567_s2 + $0x188] sm:$0xff] }
  0x54   :  { %433 = vperm.xlu1 %5399, %v283_v55   ;;  %428 = vperm.xlu0 %5398, %v282_v56   ;;  %v153_v55 = vld [vmem:[%s7569_s25 + $0x98] sm:$0xff] }
  0x55   :  { %5021 = vmatprep.subr.bf16.mxu0 %v5541_v1  ;;  %v313_v56 = vld [vmem:[%s7567_s2 + $0x198] sm:$0xff] }
  0x57   :  { %5023 = vmatpush1.bf16.msra.mxu0 %v5022_v57  ;;  %v312_v57 = vld [vmem:[%s7567_s2 + $0x190] sm:$0xff] }
  0x58   :  { %443 = vperm.xlu1 %5399, %v285_v60   ;;  %438 = vperm.xlu0 %5398, %v284_v61   ;;  %v315_v60 = vld [vmem:[%s7567_s2 + $0x1a8] sm:$0xff]  ;;  %v314_v61 = vld [vmem:[%s7567_s2 + $0x1a0] sm:$0xff] }
  0x59   :  { %5024 = vmatprep.subr.bf16.mxu0 %v5541_v1 }
  0x5b   :  { %5026 = vmatpush1.bf16.msra.mxu0 %v5025_v62  ;;  %v154_v62 = vld [vmem:[%s7569_s25 + $0xa0] sm:$0xff] }
  0x5c   :  { %453 = vperm.xlu1 %5399, %v287_v2   ;;  %448 = vperm.xlu0 %5398, %v286_v3   ;;  %v316_v2 = vld [vmem:[%s7567_s2 + $0x1b0] sm:$0xff] }
  0x5d   :  { %5027 = vmatprep.subr.bf16.mxu0 %v5541_v1  ;;  %v156_v3 = vld [vmem:[%s7569_s25 + $0xb0] sm:$0xff] }
  0x5f   :  { %5029 = vmatpush1.bf16.msra.mxu0 %v5028_v4  ;;  %v159_v4 = vld [vmem:[%s7569_s25 + $0xc8] sm:$0xff] }
  0x60   :  { %463 = vperm.xlu1 %5399, %v289_v7   ;;  %458 = vperm.xlu0 %5398, %v288_v8   ;;  %v158_v7 = vld [vmem:[%s7569_s25 + $0xc0] sm:$0xff]  ;;  %v161_v8 = vld [vmem:[%s7569_s25 + $0xd8] sm:$0xff] }
  0x61   :  { %5030 = vmatprep.subr.bf16.mxu0 %v5541_v1 }
  0x63   :  { %5032 = vmatpush1.bf16.msra.mxu0 %v5031_v9  ;;  %v321_v9 = vld [vmem:[%s7567_s2 + $0x1d8] sm:$0xff] }
  0x64   :  { %473 = vperm.xlu1 %5399, %v291_v12   ;;  %468 = vperm.xlu0 %5398, %v290_v13   ;;  %v163_v12 = vld [vmem:[%s7569_s25 + $0xe8] sm:$0xff] }
  0x65   :  { %5033 = vmatprep.subr.bf16.mxu0 %v5541_v1  ;;  %v323_v13 = vld [vmem:[%s7567_s2 + $0x1e8] sm:$0xff] }
  0x67   :  { %5035 = vmatpush1.bf16.msra.mxu0 %v5034_v14  ;;  %v322_v14 = vld [vmem:[%s7567_s2 + $0x1e0] sm:$0xff] }
  0x68   :  { %483 = vperm.xlu1 %5399, %v293_v17   ;;  %478 = vperm.xlu0 %5398, %v292_v18   ;;  %v325_v17 = vld [vmem:[%s7567_s2 + $0x1f8] sm:$0xff]  ;;  %v324_v18 = vld [vmem:[%s7567_s2 + $0x1f0] sm:$0xff] }
  0x69   :  { %5036 = vmatprep.subr.bf16.mxu0 %v5541_v1 }
  0x6b   :  { %5038 = vmatpush1.bf16.msra.mxu0 %v5037_v19  ;;  %v164_v19 = vld [vmem:[%s7569_s25 + $0xf0] sm:$0xff] }
  0x6c   :  { %493 = vperm.xlu1 %5399, %v295_v20   ;;  %488 = vperm.xlu0 %5398, %v294_v21   ;;  %v167_v20 = vld [vmem:[%s7569_s25 + $0x108] sm:$0xff] }
  0x6d   :  { %v1240_v21 = vld [vmem:[%s7570_s30 + $0x88] sm:$0xff] }
  0x6e   :  { %711 = vmatmul.mubr.f32.vlgmr.msra.gmra.mrb[0].mxu0 %v134_v22  ;;  %v1239_v22 = vld [vmem:[%s7570_s30 + $0x80] sm:$0xff] }
  0x6f   :  { %715 = vmatprep.mubr.f32.mxu0 %v137_v23  ;;  %v166_v23 = vld [vmem:[%s7569_s25 + $0x100] sm:$0xff] }
  0x70   :  { %503 = vperm.xlu1 %5399, %v297_v24   ;;  %498 = vperm.xlu0 %5398, %v296_v25   ;;  %v169_v24 = vld [vmem:[%s7569_s25 + $0x118] sm:$0xff]  ;;  %v1224_v25 = vld [vmem:[%s7570_s30 + $0x8] sm:$0xff] }
  0x72   :  { %716 = vmatmul.mubr.f32.gmra.mrb[2].mxu0 %v136_v26  ;;  %v1223_v26 = vld [vmem:[%s7570_s30] sm:$0xff] }
  0x73   :  { %720 = vmatprep.mubr.f32.mxu0 %v139_v27  ;;  %v168_v27 = vld [vmem:[%s7569_s25 + $0x110] sm:$0xff] }
  0x74   :  { %513 = vperm.xlu1 %5399, %v299_v28   ;;  %508 = vperm.xlu0 %5398, %v298_v29   ;;  %v171_v28 = vld [vmem:[%s7569_s25 + $0x128] sm:$0xff]  ;;  %v1242_v29 = vld [vmem:[%s7570_s30 + $0x98] sm:$0xff] }
  0x76   :  { %721 = vmatmul.mubr.f32.gmra.mrb[4].mxu0 %v138_v30  ;;  %v1241_v30 = vld [vmem:[%s7570_s30 + $0x90] sm:$0xff] }
  0x77   :  { %725 = vmatprep.mubr.f32.mxu0 %v141_v31  ;;  %v170_v31 = vld [vmem:[%s7569_s25 + $0x120] sm:$0xff] }
  0x78   :  { %523 = vperm.xlu1 %5399, %v301_v32   ;;  %518 = vperm.xlu0 %5398, %v300_v33   ;;  %v173_v32 = vld [vmem:[%s7569_s25 + $0x138] sm:$0xff] }
  0x79   :  { %v1226_v33 = vld [vmem:[%s7570_s30 + $0x18] sm:$0xff] }
  0x7a   :  { %726 = vmatmul.mubr.f32.gmra.mrb[6].mxu0 %v140_v34  ;;  %v1225_v34 = vld [vmem:[%s7570_s30 + $0x10] sm:$0xff] }
  0x7b   :  { %730 = vmatprep.mubr.f32.mxu0 %v143_v35  ;;  %v172_v35 = vld [vmem:[%s7569_s25 + $0x130] sm:$0xff] }
  0x7c   :  { %533 = vperm.xlu1 %5399, %v303_v36   ;;  %528 = vperm.xlu0 %5398, %v302_v37   ;;  %v175_v36 = vld [vmem:[%s7569_s25 + $0x148] sm:$0xff] }
  0x7d   :  { %v1244_v37 = vld [vmem:[%s7570_s30 + $0xa8] sm:$0xff] }
  0x7e   :  { %731 = vmatmul.mubr.f32.gmra.mrb[8].mxu0 %v142_v38  ;;  %v1243_v38 = vld [vmem:[%s7570_s30 + $0xa0] sm:$0xff] }
  0x7f   :  { %735 = vmatprep.mubr.f32.mxu0 %v145_v39  ;;  %v174_v39 = vld [vmem:[%s7569_s25 + $0x140] sm:$0xff] }
  0x80   :  { %543 = vperm.xlu1 %5399, %v305_v40   ;;  %538 = vperm.xlu0 %5398, %v304_v41   ;;  %v177_v41 = vld [vmem:[%s7569_s25 + $0x158] sm:$0xff] }
  0x82   :  { %736 = vmatmul.mubr.f32.gmra.mrb[10].mxu0 %v144_v42 }
  0x83   :  { %740 = vmatprep.mubr.f32.mxu0 %v147_v43  ;;  %v1228_v43 = vld [vmem:[%s7570_s30 + $0x28] sm:$0xff] }
  0x84   :  { %553 = vperm.xlu1 %5399, %v307_v44   ;;  %548 = vperm.xlu0 %5398, %v306_v45   ;;  %v1227_v44 = vld [vmem:[%s7570_s30 + $0x20] sm:$0xff]  ;;  %v176_v45 = vld [vmem:[%s7569_s25 + $0x150] sm:$0xff] }
  0x86   :  { %741 = vmatmul.mubr.f32.gmra.mrb[12].mxu0 %v146_v46  ;;  %v179_v46 = vld [vmem:[%s7569_s25 + $0x168] sm:$0xff] }
  0x87   :  { %745 = vmatprep.mubr.f32.mxu0 %v149_v47  ;;  %v1246_v47 = vld [vmem:[%s7570_s30 + $0xb8] sm:$0xff] }
  0x88   :  { %563 = vperm.xlu1 %5399, %v309_v48   ;;  %558 = vperm.xlu0 %5398, %v308_v49   ;;  %v1245_v48 = vld [vmem:[%s7570_s30 + $0xb0] sm:$0xff] }
  0x8a   :  { %746 = vmatmul.mubr.f32.gmra.mrb[14].mxu0 %v148_v50 }
  0x8b   :  { %750 = vmatprep.mubr.f32.mxu0 %v151_v51  ;;  %v178_v51 = vld [vmem:[%s7569_s25 + $0x160] sm:$0xff] }
  0x8c   :  { %573 = vperm.xlu1 %5399, %v311_v52   ;;  %568 = vperm.xlu0 %5398, %v310_v53   ;;  %v181_v52 = vld [vmem:[%s7569_s25 + $0x178] sm:$0xff] }
  0x8d   :  { %v1230_v53 = vld [vmem:[%s7570_s30 + $0x38] sm:$0xff] }
  0x8e   :  { %751 = vmatmul.mubr.f32.gmra.mrb[16].mxu0 %v150_v54  ;;  %v1229_v54 = vld [vmem:[%s7570_s30 + $0x30] sm:$0xff] }
  0x8f   :  { %755 = vmatprep.mubr.f32.mxu0 %v153_v55  ;;  %v180_v55 = vld [vmem:[%s7569_s25 + $0x170] sm:$0xff] }
  0x90   :  { %583 = vperm.xlu1 %5399, %v313_v56   ;;  %578 = vperm.xlu0 %5398, %v312_v57   ;;  %v183_v57 = vld [vmem:[%s7569_s25 + $0x188] sm:$0xff] }
  0x92   :  { %756 = vmatmul.mubr.f32.gmra.mrb[18].mxu0 %v152_v58 }
  0x93   :  { %760 = vmatprep.mubr.f32.mxu0 %v155_v59  ;;  %v1248_v59 = vld [vmem:[%s7570_s30 + $0xc8] sm:$0xff] }
  0x94   :  { %593 = vperm.xlu1 %5399, %v315_v60   ;;  %588 = vperm.xlu0 %5398, %v314_v61   ;;  %v1247_v60 = vld [vmem:[%s7570_s30 + $0xc0] sm:$0xff] }
  0x95   :  { %v182_v61 = vld [vmem:[%s7569_s25 + $0x180] sm:$0xff] }
  0x96   :  { %761 = vmatmul.mubr.f32.gmra.mrb[20].mxu0 %v154_v62  ;;  %v185_v62 = vld [vmem:[%s7569_s25 + $0x198] sm:$0xff] }
  0x97   :  { %765 = vmatprep.mubr.f32.mxu0 %v157_v63  ;;  %v1232_v63 = vld [vmem:[%s7570_s30 + $0x48] sm:$0xff] }
  0x98   :  { %603 = vperm.xlu1 %5399, %v317_v0   ;;  %598 = vperm.xlu0 %5398, %v316_v2   ;;  %v1231_v0 = vld [vmem:[%s7570_s30 + $0x40] sm:$0xff] }
  0x9a   :  { %766 = vmatmul.mubr.f32.gmra.mrb[22].mxu0 %v156_v3 }
  0x9b   :  { %770 = vmatprep.mubr.f32.mxu0 %v159_v4  ;;  %v184_v4 = vld [vmem:[%s7569_s25 + $0x190] sm:$0xff] }
  0x9c   :  { %613 = vperm.xlu1 %5399, %v319_v5   ;;  %608 = vperm.xlu0 %5398, %v318_v6   ;;  %v187_v5 = vld [vmem:[%s7569_s25 + $0x1a8] sm:$0xff]  ;;  %v1250_v6 = vld [vmem:[%s7570_s30 + $0xd8] sm:$0xff] }
  0x9e   :  { %771 = vmatmul.mubr.f32.gmra.mrb[24].mxu0 %v158_v7  ;;  %v1249_v7 = vld [vmem:[%s7570_s30 + $0xd0] sm:$0xff] }
  0x9f   :  { %775 = vmatprep.mubr.f32.mxu0 %v161_v8  ;;  %v186_v8 = vld [vmem:[%s7569_s25 + $0x1a0] sm:$0xff] }
  0xa0   :  { %623 = vperm.xlu1 %5399, %v321_v9   ;;  %618 = vperm.xlu0 %5398, %v320_v10   ;;  %v189_v10 = vld [vmem:[%s7569_s25 + $0x1b8] sm:$0xff] }
  0xa2   :  { %776 = vmatmul.mubr.f32.gmra.mrb[26].mxu0 %v160_v11 }
  0xa3   :  { %780 = vmatprep.mubr.f32.mxu0 %v163_v12  ;;  %v1234_v12 = vld [vmem:[%s7570_s30 + $0x58] sm:$0xff] }
  0xa4   :  { %633 = vperm.xlu1 %5399, %v323_v13   ;;  %628 = vperm.xlu0 %5398, %v322_v14   ;;  %v1233_v13 = vld [vmem:[%s7570_s30 + $0x50] sm:$0xff] }
  0xa5   :  { %v188_v14 = vld [vmem:[%s7569_s25 + $0x1b0] sm:$0xff] }
  0xa6   :  { %781 = vmatmul.mubr.f32.gmra.mrb[28].mxu0 %v162_v15  ;;  %v191_v15 = vld [vmem:[%s7569_s25 + $0x1c8] sm:$0xff] }
  0xa7   :  { %785 = vmatprep.mubr.f32.mxu0 %v165_v16  ;;  %v1252_v16 = vld [vmem:[%s7570_s30 + $0xe8] sm:$0xff] }
  0xa8   :  { %643 = vperm.xlu1 %5399, %v325_v17   ;;  %638 = vperm.xlu0 %5398, %v324_v18   ;;  %v1251_v17 = vld [vmem:[%s7570_s30 + $0xe0] sm:$0xff] }
  0xaa   :  { %786 = vmatmul.mubr.f32.gmra.mrb[30].mxu0 %v164_v19 }
  0xab   :  { %790 = vmatprep.mubr.f32.mxu0 %v167_v20  ;;  %v6157_v40 = vpop.permute.xlu1 %338  ;;  %v6162_v42 = vpop.permute.xlu0 %328  ;;  %v190_v20 = vld [vmem:[%s7569_s25 + $0x1c0] sm:$0xff] }
  0xac   :  { %1342 = vperm.xlu1 %5399, %v1240_v21   ;;  %1337 = vperm.xlu0 %5398, %v1239_v22   ;;  %v193_v21 = vld [vmem:[%s7569_s25 + $0x1d8] sm:$0xff]  ;;  %v1236_v22 = vld [vmem:[%s7570_s30 + $0x68] sm:$0xff] }
  0xae   :  { %791 = vmatmul.mubr.f32.gmra.mrb[32].mxu0 %v166_v23  ;;  %v1235_v23 = vld [vmem:[%s7570_s30 + $0x60] sm:$0xff] }
  0xaf   :  { %795 = vmatprep.mubr.f32.mxu0 %v169_v24  ;;  %v6182_v49 = vpop.permute.xlu1 %343  ;;  %v6184_v50 = vpop.permute.xlu0 %333  ;;  %v192_v24 = vld [vmem:[%s7569_s25 + $0x1d0] sm:$0xff] }
  0xb0   :  { %1262 = vperm.xlu1 %5399, %v1224_v25   ;;  %1257 = vperm.xlu0 %5398, %v1223_v26   ;;  %v195_v26 = vld [vmem:[%s7569_s25 + $0x1e8] sm:$0xff] }
  0xb2   :  { %796 = vmatmul.mubr.f32.gmra.mrb[34].mxu0 %v168_v27 }
  0xb3   :  { %800 = vmatprep.mubr.f32.mxu0 %v171_v28  ;;  %v6201_v56 = vpop.permute.xlu1 %353  ;;  %v6206_v58 = vpop.permute.xlu0 %348  ;;  %v1254_v28 = vld [vmem:[%s7570_s30 + $0xf8] sm:$0xff] }
  0xb4   :  { %1352 = vperm.xlu1 %5399, %v1242_v29   ;;  %1347 = vperm.xlu0 %5398, %v1241_v30   ;;  %v1253_v29 = vld [vmem:[%s7570_s30 + $0xf0] sm:$0xff]  ;;  %v194_v30 = vld [vmem:[%s7569_s25 + $0x1e0] sm:$0xff] }
  0xb6   :  { %801 = vmatmul.mubr.f32.gmra.mrb[36].mxu0 %v170_v31  ;;  %v197_v31 = vld [vmem:[%s7569_s25 + $0x1f8] sm:$0xff] }
  0xb7   :  { %805 = vmatprep.mubr.f32.mxu0 %v173_v32  ;;  %v6226_v2 = vpop.permute.xlu1 %363  ;;  %v6228_v3 = vpop.permute.xlu0 %358  ;;  %v1238_v32 = vld [vmem:[%s7570_s30 + $0x78] sm:$0xff] }
  0xb8   :  { %1272 = vperm.xlu1 %5399, %v1226_v33   ;;  %1267 = vperm.xlu0 %5398, %v1225_v34   ;;  %v1237_v33 = vld [vmem:[%s7570_s30 + $0x70] sm:$0xff]  ;;  %s7572_s30 = sld [smem:[#allocation30_spill]] }
  0xba   :  { %806 = vmatmul.mubr.f32.gmra.mrb[38].mxu0 %v172_v35 }
  0xbb   :  { %810 = vmatprep.mubr.f32.mxu0 %v175_v36  ;;  %v6245_v9 = vpop.permute.xlu1 %373  ;;  %v6250_v11 = vpop.permute.xlu0 %368  ;;  %v196_v36 = vld [vmem:[%s7569_s25 + $0x1f0] sm:$0xff] }
  0xbc   :  { %1362 = vperm.xlu1 %5399, %v1244_v37   ;;  %1357 = vperm.xlu0 %5398, %v1243_v38   ;;  %v199_v37 = vld [vmem:[%s7569_s25 + $0x208] sm:$0xff] }
  0xbd   :  { %v1906_v38 = vld [vmem:[%s7571_s0 + $0x8] sm:$0xff] }
  0xbe   :  { %811 = vmatmul.mubr.f32.gmra.mrb[40].mxu0 %v174_v39  ;;  %v1905_v39 = vld [vmem:[%s7571_s0] sm:$0xff] }
  0xbf   :  { %815 = vmatprep.mubr.f32.mxu0 %v177_v41  ;;  %v6270_v18 = vpop.permute.xlu1 %383  ;;  %v6272_v19 = vpop.permute.xlu0 %378  ;;  %v198_v41 = vld [vmem:[%s7569_s25 + $0x200] sm:$0xff] }
  0xc0   :  { %1282 = vperm.xlu1 %5399, %v1228_v43   ;;  %1277 = vperm.xlu0 %5398, %v1227_v44   ;;  %v201_v44 = vld [vmem:[%s7569_s25 + $0x218] sm:$0xff] }
  0xc2   :  { %816 = vmatmul.mubr.f32.gmra.mrb[42].mxu0 %v176_v45 }
  0xc3   :  { %820 = vmatprep.mubr.f32.mxu0 %v179_v46  ;;  %v6289_v25 = vpop.permute.xlu1 %393  ;;  %v6294_v27 = vpop.permute.xlu0 %388  ;;  %v1908_v46 = vld [vmem:[%s7571_s0 + $0x18] sm:$0xff] }
  0xc4   :  { %1372 = vperm.xlu1 %5399, %v1246_v47   ;;  %1367 = vperm.xlu0 %5398, %v1245_v48   ;;  %v1907_v47 = vld [vmem:[%s7571_s0 + $0x10] sm:$0xff] }
  0xc5   :  { %v200_v48 = vld [vmem:[%s7569_s25 + $0x210] sm:$0xff] }
  0xc6   :  { %821 = vmatmul.mubr.f32.gmra.mrb[44].mxu0 %v178_v51  ;;  %v203_v51 = vld [vmem:[%s7569_s25 + $0x228] sm:$0xff] }
  0xc7   :  { %825 = vmatprep.mubr.f32.mxu0 %v181_v52  ;;  %v6314_v34 = vpop.permute.xlu1 %403  ;;  %v6316_v35 = vpop.permute.xlu0 %398  ;;  %v2023_v52 = vld [vmem:[%s7572_s30 + $0x8] sm:$0xff] }
  0xc8   :  { %1292 = vperm.xlu1 %5399, %v1230_v53   ;;  %1287 = vperm.xlu0 %5398, %v1229_v54   ;;  %v2022_v53 = vld [vmem:[%s7572_s30] sm:$0xff] }
  0xca   :  { %826 = vmatmul.mubr.f32.gmra.mrb[46].mxu0 %v180_v55 }
  0xcb   :  { %830 = vmatprep.mubr.f32.mxu0 %v183_v57  ;;  %v6333_v43 = vpop.permute.xlu1 %413  ;;  %v6338_v45 = vpop.permute.xlu0 %408  ;;  %v202_v57 = vld [vmem:[%s7569_s25 + $0x220] sm:$0xff] }
  0xcc   :  { %1382 = vperm.xlu1 %5399, %v1248_v59   ;;  %1377 = vperm.xlu0 %5398, %v1247_v60   ;;  %v205_v59 = vld [vmem:[%s7569_s25 + $0x238] sm:$0xff] }
  0xcd   :  { %v2025_v60 = vld [vmem:[%s7572_s30 + $0x18] sm:$0xff] }
  0xce   :  { %831 = vmatmul.mubr.f32.gmra.mrb[48].mxu0 %v182_v61  ;;  %v2024_v61 = vld [vmem:[%s7572_s30 + $0x10] sm:$0xff] }
  0xcf   :  { %835 = vmatprep.mubr.f32.mxu0 %v185_v62  ;;  %v6358_v54 = vpop.permute.xlu1 %423  ;;  %v6360_v55 = vpop.permute.xlu0 %418  ;;  %v204_v62 = vld [vmem:[%s7569_s25 + $0x230] sm:$0xff] }
  0xd0   :  { %1302 = vperm.xlu1 %5399, %v1232_v63   ;;  %1297 = vperm.xlu0 %5398, %v1231_v0   ;;  %v207_v0 = vld [vmem:[%s7569_s25 + $0x248] sm:$0xff] }
  0xd2   :  { %836 = vmatmul.mubr.f32.gmra.mrb[50].mxu0 %v184_v4 }
  0xd3   :  { %840 = vmatprep.mubr.f32.mxu0 %v187_v5  ;;  %v6377_v63 = vpop.permute.xlu1 %433  ;;  %v6382_v4 = vpop.permute.xlu0 %428  ;;  %v2027_v5 = vld [vmem:[%s7572_s30 + $0x28] sm:$0xff] }
  0xd4   :  { %1392 = vperm.xlu1 %5399, %v1250_v6   ;;  %1387 = vperm.xlu0 %5398, %v1249_v7   ;;  %v2026_v6 = vld [vmem:[%s7572_s30 + $0x20] sm:$0xff] }
  0xd5   :  { %v206_v7 = vld [vmem:[%s7569_s25 + $0x240] sm:$0xff] }
  0xd6   :  { %841 = vmatmul.mubr.f32.gmra.mrb[52].mxu0 %v186_v8  ;;  %v209_v8 = vld [vmem:[%s7569_s25 + $0x258] sm:$0xff] }
  0xd7   :  { %845 = vmatprep.mubr.f32.mxu0 %v189_v10  ;;  %v2029_v10 = vld [vmem:[%s7572_s30 + $0x38] sm:$0xff] }
  0xd8   :  { %1312 = vperm.xlu1 %5399, %v1234_v12   ;;  %1307 = vperm.xlu0 %5398, %v1233_v13   ;;  %v2028_v12 = vld [vmem:[%s7572_s30 + $0x30] sm:$0xff]  ;;  %v6402_v13 = vpop.permute.xlu1 %443 }
  0xda   :  { %846 = vmatmul.mubr.f32.gmra.mrb[54].mxu0 %v188_v14  ;;  %v6404_v14 = vpop.permute.xlu0 %438 }
  0xdb   :  { %850 = vmatprep.mubr.f32.mxu0 %v191_v15  ;;  %v208_v15 = vld [vmem:[%s7569_s25 + $0x250] sm:$0xff] }
  0xdc   :  { %1402 = vperm.xlu1 %5399, %v1252_v16   ;;  %1397 = vperm.xlu0 %5398, %v1251_v17   ;;  %v211_v16 = vld [vmem:[%s7569_s25 + $0x268] sm:$0xff] }
  0xdd   :  { %v2213_v17 = vld [vmem:[%s7573_s26 + $0x8] sm:$0xff] }
  0xde   :  { %851 = vmatmul.mubr.f32.gmra.mrb[56].mxu0 %v190_v20  ;;  %v2212_v20 = vld [vmem:[%s7573_s26] sm:$0xff] }
  0xdf   :  { %855 = vmatprep.mubr.f32.mxu0 %v193_v21  ;;  %v210_v21 = vld [vmem:[%s7569_s25 + $0x260] sm:$0xff] }
  0xe0   :  { %1322 = vperm.xlu1 %5399, %v1236_v22   ;;  %1317 = vperm.xlu0 %5398, %v1235_v23   ;;  %v6421_v22 = vpop.permute.xlu1 %453  ;;  %v213_v23 = vld [vmem:[%s7569_s25 + $0x278] sm:$0xff] }
  0xe2   :  { %856 = vmatmul.mubr.f32.gmra.mrb[58].mxu0 %v192_v24  ;;  %v6426_v24 = vpop.permute.xlu0 %448 }
  0xe3   :  { %860 = vmatprep.mubr.f32.mxu0 %v195_v26  ;;  %v2215_v26 = vld [vmem:[%s7573_s26 + $0x18] sm:$0xff] }
  0xe4   :  { %1412 = vperm.xlu1 %5399, %v1254_v28   ;;  %1407 = vperm.xlu0 %5398, %v1253_v29   ;;  %v2214_v28 = vld [vmem:[%s7573_s26 + $0x10] sm:$0xff] }
  0xe5   :  { %v212_v29 = vld [vmem:[%s7569_s25 + $0x270] sm:$0xff] }
  0xe6   :  { %861 = vmatmul.mubr.f32.gmra.mrb[60].mxu0 %v194_v30  ;;  %v215_v30 = vld [vmem:[%s7569_s25 + $0x288] sm:$0xff] }
  0xe7   :  { %865 = vmatprep.mubr.f32.mxu0 %v197_v31  ;;  %v2492_v31 = vld [vmem:[%s7509_s14 + $0x8] sm:$0xff] }
  0xe8   :  { %1332 = vperm.xlu1 %5399, %v1238_v32   ;;  %1327 = vperm.xlu0 %5398, %v1237_v33   ;;  %v2491_v32 = vld [vmem:[%s7509_s14] sm:$0xff]  ;;  %v6446_v33 = vpop.permute.xlu1 %463 }
  0xea   :  { %866 = vmatmul.mubr.f32.gmra.mrb[62].mxu0 %v196_v36  ;;  %v6448_v36 = vpop.permute.xlu0 %458 }
  0xeb   :  { %870 = vmatprep.mubr.f32.mxu0 %v199_v37  ;;  %v214_v37 = vld [vmem:[%s7569_s25 + $0x280] sm:$0xff] }
  0xec   :  { %1916 = vperm.xlu1 %5399, %v1906_v38   ;;  %1911 = vperm.xlu0 %5398, %v1905_v39   ;;  %v217_v38 = vld [vmem:[%s7569_s25 + $0x298] sm:$0xff] }
  0xed   :  { %v2494_v39 = vld [vmem:[%s7509_s14 + $0x18] sm:$0xff] }
  0xee   :  { %871 = vmatmul.mubr.f32.gmra.mrb[64].mxu0 %v198_v41  ;;  %v2493_v41 = vld [vmem:[%s7509_s14 + $0x10] sm:$0xff]  ;;  %s7574_s14 = sld [smem:[#allocation27_spill]] }
  0xef   :  { %875 = vmatprep.mubr.f32.mxu0 %v201_v44  ;;  %v216_v44 = vld [vmem:[%s7569_s25 + $0x290] sm:$0xff] }
  0xf0   :  { %1926 = vperm.xlu1 %5399, %v1908_v46   ;;  %1921 = vperm.xlu0 %5398, %v1907_v47   ;;  %v6465_v46 = vpop.permute.xlu1 %473  ;;  %v219_v47 = vld [vmem:[%s7569_s25 + $0x2a8] sm:$0xff] }
  0xf2   :  { %876 = vmatmul.mubr.f32.gmra.mrb[66].mxu0 %v200_v48  ;;  %v6470_v48 = vpop.permute.xlu0 %468 }
  0xf3   :  { %880 = vmatprep.mubr.f32.mxu0 %v203_v51  ;;  %v2528_v51 = vld [vmem:[%s7512_s17 + $0x8] sm:$0xff] }
  0xf4   :  { %2037 = vperm.xlu1 %5399, %v2023_v52   ;;  %2032 = vperm.xlu0 %5398, %v2022_v53   ;;  %v2527_v52 = vld [vmem:[%s7512_s17] sm:$0xff] }
  0xf5   :  { %v218_v53 = vld [vmem:[%s7569_s25 + $0x2a0] sm:$0xff] }
  0xf6   :  { %881 = vmatmul.mubr.f32.gmra.mrb[68].mxu0 %v202_v57  ;;  %v221_v57 = vld [vmem:[%s7569_s25 + $0x2b8] sm:$0xff] }
  0xf7   :  { %885 = vmatprep.mubr.f32.mxu0 %v205_v59  ;;  %v2773_v59 = vld [vmem:[%s7513_s18 + $0x8] sm:$0xff] }
  0xf8   :  { %2047 = vperm.xlu1 %5399, %v2025_v60   ;;  %2042 = vperm.xlu0 %5398, %v2024_v61   ;;  %v2772_v60 = vld [vmem:[%s7513_s18] sm:$0xff]  ;;  %v6490_v61 = vpop.permute.xlu1 %483 }
  0xfa   :  { %886 = vmatmul.mubr.f32.gmra.mrb[70].mxu0 %v204_v62  ;;  %v6492_v62 = vpop.permute.xlu0 %478 }
  0xfb   :  { %890 = vmatprep.mubr.f32.mxu0 %v207_v0  ;;  %v220_v0 = vld [vmem:[%s7569_s25 + $0x2b0] sm:$0xff] }
  0xfc   :  { %2057 = vperm.xlu1 %5399, %v2027_v5   ;;  %2052 = vperm.xlu0 %5398, %v2026_v6   ;;  %v223_v5 = vld [vmem:[%s7569_s25 + $0x2c8] sm:$0xff]  ;;  %v2530_v6 = vld [vmem:[%s7512_s17 + $0x18] sm:$0xff] }
  0xfe   :  { %891 = vmatmul.mubr.f32.gmra.mrb[72].mxu0 %v206_v7  ;;  %v2529_v7 = vld [vmem:[%s7512_s17 + $0x10] sm:$0xff] }
  0xff   :  { %895 = vmatprep.mubr.f32.mxu0 %v209_v8  ;;  %v222_v8 = vld [vmem:[%s7569_s25 + $0x2c0] sm:$0xff] }
 0x100   :  { %2067 = vperm.xlu1 %5399, %v2029_v10   ;;  %2062 = vperm.xlu0 %5398, %v2028_v12   ;;  %v6509_v10 = vpop.permute.xlu1 %493  ;;  %v225_v12 = vld [vmem:[%s7569_s25 + $0x2d8] sm:$0xff] }
 0x102   :  { %896 = vmatmul.mubr.f32.gmra.mrb[74].mxu0 %v208_v15  ;;  %v6514_v15 = vpop.permute.xlu0 %488 }
 0x103   :  { %900 = vmatprep.mubr.f32.mxu0 %v211_v16  ;;  %v2775_v16 = vld [vmem:[%s7513_s18 + $0x18] sm:$0xff] }
 0x104   :  { %2223 = vperm.xlu1 %5399, %v2213_v17   ;;  %2218 = vperm.xlu0 %5398, %v2212_v20   ;;  %v2774_v17 = vld [vmem:[%s7513_s18 + $0x10] sm:$0xff] }
 0x105   :  { %v224_v20 = vld [vmem:[%s7569_s25 + $0x2d0] sm:$0xff] }
 0x106   :  { %901 = vmatmul.mubr.f32.gmra.mrb[76].mxu0 %v210_v21  ;;  %v227_v21 = vld [vmem:[%s7569_s25 + $0x2e8] sm:$0xff] }
 0x107   :  { %905 = vmatprep.mubr.f32.mxu0 %v213_v23  ;;  %v2532_v23 = vld [vmem:[%s7512_s17 + $0x28] sm:$0xff] }
 0x108   :  { %2233 = vperm.xlu1 %5399, %v2215_v26   ;;  %2228 = vperm.xlu0 %5398, %v2214_v28   ;;  %v2531_v26 = vld [vmem:[%s7512_s17 + $0x20] sm:$0xff]  ;;  %v6534_v28 = vpop.permute.xlu1 %503 }
 0x10a   :  { %906 = vmatmul.mubr.f32.gmra.mrb[78].mxu0 %v212_v29  ;;  %v6536_v29 = vpop.permute.xlu0 %498 }
 0x10b   :  { %910 = vmatprep.mubr.f32.mxu0 %v215_v30  ;;  %v226_v30 = vld [vmem:[%s7569_s25 + $0x2e0] sm:$0xff] }
 0x10c   :  { %2502 = vperm.xlu1 %5399, %v2492_v31   ;;  %2497 = vperm.xlu0 %5398, %v2491_v32   ;;  %v229_v31 = vld [vmem:[%s7569_s25 + $0x2f8] sm:$0xff]  ;;  %v2777_v32 = vld [vmem:[%s7513_s18 + $0x28] sm:$0xff] }
 0x10e   :  { %911 = vmatmul.mubr.f32.gmra.mrb[80].mxu0 %v214_v37  ;;  %v2776_v37 = vld [vmem:[%s7513_s18 + $0x20] sm:$0xff] }
 0x10f   :  { %915 = vmatprep.mubr.f32.mxu0 %v217_v38  ;;  %v228_v38 = vld [vmem:[%s7569_s25 + $0x2f0] sm:$0xff] }
 0x110   :  { %2512 = vperm.xlu1 %5399, %v2494_v39   ;;  %2507 = vperm.xlu0 %5398, %v2493_v41   ;;  %v6553_v39 = vpop.permute.xlu1 %513  ;;  %v231_v41 = vld [vmem:[%s7569_s25 + $0x308] sm:$0xff] }
 0x112   :  { %916 = vmatmul.mubr.f32.gmra.mrb[82].mxu0 %v216_v44  ;;  %v6558_v44 = vpop.permute.xlu0 %508 }
 0x113   :  { %920 = vmatprep.mubr.f32.mxu0 %v219_v47  ;;  %v2534_v47 = vld [vmem:[%s7512_s17 + $0x38] sm:$0xff] }
 0x114   :  { %2546 = vperm.xlu1 %5399, %v2528_v51   ;;  %2541 = vperm.xlu0 %5398, %v2527_v52   ;;  %v2533_v51 = vld [vmem:[%s7512_s17 + $0x30] sm:$0xff]  ;;  %v230_v52 = vld [vmem:[%s7569_s25 + $0x300] sm:$0xff] }
 0x116   :  { %921 = vmatmul.mubr.f32.gmra.mrb[84].mxu0 %v218_v53  ;;  %v233_v53 = vld [vmem:[%s7569_s25 + $0x318] sm:$0xff] }
 0x117   :  { %925 = vmatprep.mubr.f32.mxu0 %v221_v57  ;;  %v2779_v57 = vld [vmem:[%s7513_s18 + $0x38] sm:$0xff] }
 0x118   :  { %2791 = vperm.xlu1 %5399, %v2773_v59   ;;  %2786 = vperm.xlu0 %5398, %v2772_v60   ;;  %v2778_v59 = vld [vmem:[%s7513_s18 + $0x30] sm:$0xff]  ;;  %v6578_v60 = vpop.permute.xlu1 %523 }
 0x11a   :  { %926 = vmatmul.mubr.f32.gmra.mrb[86].mxu0 %v220_v0  ;;  %v6580_v0 = vpop.permute.xlu0 %518 }
 0x11b   :  { %930 = vmatprep.mubr.f32.mxu0 %v223_v5  ;;  %v232_v5 = vld [vmem:[%s7569_s25 + $0x310] sm:$0xff] }
 0x11c   :  { %2556 = vperm.xlu1 %5399, %v2530_v6   ;;  %2551 = vperm.xlu0 %5398, %v2529_v7   ;;  %v235_v6 = vld [vmem:[%s7569_s25 + $0x328] sm:$0xff] }
 0x11d   :  { %v2781_v7 = vld [vmem:[%s7513_s18 + $0x48] sm:$0xff] }
 0x11e   :  { %931 = vmatmul.mubr.f32.gmra.mrb[88].mxu0 %v222_v8  ;;  %v2780_v8 = vld [vmem:[%s7513_s18 + $0x40] sm:$0xff] }
 0x11f   :  { %935 = vmatprep.mubr.f32.mxu0 %v225_v12  ;;  %v234_v12 = vld [vmem:[%s7569_s25 + $0x320] sm:$0xff] }
 0x120   :  { %2801 = vperm.xlu1 %5399, %v2775_v16   ;;  %2796 = vperm.xlu0 %5398, %v2774_v17   ;;  %v6597_v16 = vpop.permute.xlu1 %533  ;;  %v237_v17 = vld [vmem:[%s7569_s25 + $0x338] sm:$0xff] }
 0x122   :  { %936 = vmatmul.mubr.f32.gmra.mrb[90].mxu0 %v224_v20  ;;  %v6602_v20 = vpop.permute.xlu0 %528 }
 0x123   :  { %940 = vmatprep.mubr.f32.mxu0 %v227_v21  ;;  %v2536_v21 = vld [vmem:[%s7512_s17 + $0x48] sm:$0xff] }
 0x124   :  { %2566 = vperm.xlu1 %5399, %v2532_v23   ;;  %2561 = vperm.xlu0 %5398, %v2531_v26   ;;  %v2535_v23 = vld [vmem:[%s7512_s17 + $0x40] sm:$0xff]  ;;  %v236_v26 = vld [vmem:[%s7569_s25 + $0x330] sm:$0xff] }
 0x126   :  { %941 = vmatmul.mubr.f32.gmra.mrb[92].mxu0 %v226_v30  ;;  %v239_v30 = vld [vmem:[%s7569_s25 + $0x348] sm:$0xff] }
 0x127   :  { %945 = vmatprep.mubr.f32.mxu0 %v229_v31  ;;  %v2783_v31 = vld [vmem:[%s7513_s18 + $0x58] sm:$0xff] }
 0x128   :  { %2811 = vperm.xlu1 %5399, %v2777_v32   ;;  %2806 = vperm.xlu0 %5398, %v2776_v37   ;;  %v2782_v32 = vld [vmem:[%s7513_s18 + $0x50] sm:$0xff]  ;;  %v6622_v37 = vpop.permute.xlu1 %543 }
 0x12a   :  { %946 = vmatmul.mubr.f32.gmra.mrb[94].mxu0 %v228_v38  ;;  %v6624_v38 = vpop.permute.xlu0 %538 }
 0x12b   :  { %950 = vmatprep.mubr.f32.mxu0 %v231_v41  ;;  %v238_v41 = vld [vmem:[%s7569_s25 + $0x340] sm:$0xff] }
 0x12c   :  { %2576 = vperm.xlu1 %5399, %v2534_v47   ;;  %2571 = vperm.xlu0 %5398, %v2533_v51   ;;  %v241_v47 = vld [vmem:[%s7569_s25 + $0x358] sm:$0xff] }
 0x12d   :  { %v2538_v51 = vld [vmem:[%s7512_s17 + $0x58] sm:$0xff] }
 0x12e   :  { %951 = vmatmul.mubr.f32.gmra.mrb[96].mxu0 %v230_v52  ;;  %v2537_v52 = vld [vmem:[%s7512_s17 + $0x50] sm:$0xff] }
 0x12f   :  { %955 = vmatprep.mubr.f32.mxu0 %v233_v53  ;;  %v240_v53 = vld [vmem:[%s7569_s25 + $0x350] sm:$0xff] }
 0x130   :  { %2821 = vperm.xlu1 %5399, %v2779_v57   ;;  %2816 = vperm.xlu0 %5398, %v2778_v59   ;;  %v6641_v57 = vpop.permute.xlu1 %553  ;;  %v243_v59 = vld [vmem:[%s7569_s25 + $0x368] sm:$0xff] }
 0x132   :  { %956 = vmatmul.mubr.f32.gmra.mrb[98].mxu0 %v232_v5  ;;  %v6646_v5 = vpop.permute.xlu0 %548 }
 0x133   :  { %960 = vmatprep.mubr.f32.mxu0 %v235_v6 }
 0x134   :  { %2831 = vperm.xlu1 %5399, %v2781_v7   ;;  %2826 = vperm.xlu0 %5398, %v2780_v8   ;;  %v3094_v7 = vld [vmem:[%s7515_s20 + $0x8] sm:$0xff]  ;;  %v3093_v8 = vld [vmem:[%s7515_s20] sm:$0xff] }
 0x136   :  { %961 = vmatmul.mubr.f32.gmra.mrb[100].mxu0 %v234_v12 }
 0x137   :  { %965 = vmatprep.mubr.f32.mxu0 %v237_v17  ;;  %v242_v17 = vld [vmem:[%s7569_s25 + $0x360] sm:$0xff] }
 0x138   :  { %2586 = vperm.xlu1 %5399, %v2536_v21   ;;  %2581 = vperm.xlu0 %5398, %v2535_v23   ;;  %v245_v23 = vld [vmem:[%s7569_s25 + $0x378] sm:$0xff] }
 0x13a   :  { %966 = vmatmul.mubr.f32.gmra.mrb[102].mxu0 %v236_v26 }
 0x13b   :  { %970 = vmatprep.mubr.f32.mxu0 %v239_v30  ;;  %v3096_v30 = vld [vmem:[%s7515_s20 + $0x18] sm:$0xff] }
 0x13c   :  { %2841 = vperm.xlu1 %5399, %v2783_v31   ;;  %2836 = vperm.xlu0 %5398, %v2782_v32   ;;  %v3095_v31 = vld [vmem:[%s7515_s20 + $0x10] sm:$0xff]  ;;  %v1096_v32 = vld [vmem:[#allocation3 + $0x8] sm:$0xff] }
 0x13d   :  { %1479 = vmatprep.mubr.f32.mxu1 %v1096_v32 }
 0x13e   :  { %971 = vmatmul.mubr.f32.gmra.mrb[104].mxu0 %v238_v41  ;;  %v6667_v41 = vpop.permute.xlu1 %563 }
 0x13f   :  { %975 = vmatprep.mubr.f32.mxu0 %v241_v47 }
 0x140   :  { %2596 = vperm.xlu1 %5399, %v2538_v51   ;;  %2591 = vperm.xlu0 %5398, %v2537_v52   ;;  %v6670_v51 = vpop.permute.xlu0 %558  ;;  %v244_v52 = vld [vmem:[%s7569_s25 + $0x370] sm:$0xff] }
 0x141   :  { %v712_v6 = vpop.f32.mrb[0].mxu0 }
 0x142   :  { %v714_v12 = vpop.f32.mrb[1].mxu0  ;;  %976 = vmatmul.mubr.f32.gmra.mrb[106].mxu0 %v240_v53  ;;  %v713_v21 = vadd.f32 %v712_v6, %v6162_v42  ;;  %v247_v6 = vld [vmem:[%s7569_s25 + $0x388] sm:$0xff] }
 0x143   :  { %980 = vmatprep.mubr.f32.mxu0 %v243_v59 }
 0x144   :  { %3104 = vperm.xlu1 %5399, %v3094_v7   ;;  %3099 = vperm.xlu0 %5398, %v3093_v8   ;;  %v1031_v53 = vmax.f32 %v713_v21, 0.0  ;;  %v246_v21 = vld [vmem:[%s7569_s25 + $0x380] sm:$0xff] }
 0x145   :  { %v717_v26 = vpop.f32.mrb[2].mxu0 }
 0x146   :  { %v718_v42 = vadd.f32 %v717_v26, %v6184_v50  ;;  %v719_v47 = vpop.f32.mrb[3].mxu0  ;;  %981 = vmatmul.mubr.f32.gmra.mrb[108].mxu0 %v242_v17  ;;  %v3644_v50 = vld [vmem:[%s7517_s22 + $0x8] sm:$0xff]  ;;  %v3643_v17 = vld [vmem:[%s7517_s22] sm:$0xff] }
 0x147   :  { %985 = vmatprep.mubr.f32.mxu0 %v245_v23  ;;  %v6687_v23 = vpop.permute.xlu1 %573 }
 0x148   :  { %v1032_v59 = vmax.f32 %v718_v42, 0.0  ;;  %3114 = vperm.xlu1 %5399, %v3096_v30   ;;  %3109 = vperm.xlu0 %5398, %v3095_v31   ;;  %v249_v30 = vld [vmem:[%s7569_s25 + $0x398] sm:$0xff]  ;;  %v6693_v31 = vpop.permute.xlu0 %568 }
 0x149   :  { %v722_v7 = vpop.f32.mrb[4].mxu0  ;;  %v3646_v42 = vld [vmem:[%s7517_s22 + $0x18] sm:$0xff] }
 0x14a   :  { %v724_v8 = vpop.f32.mrb[5].mxu0  ;;  %986 = vmatmul.mubr.f32.gmra.mrb[110].mxu0 %v244_v52  ;;  %v5040_v12 = vpack.c.bf16 %v1032_v59, %v1031_v53  ;;  %v723_v26 = vadd.f32 %v722_v7, %v6157_v40  ;;  %v3645_v40 = vld [vmem:[%s7517_s22 + $0x10] sm:$0xff]  ;;  %v251_v7 = vld [vmem:[%s7569_s25 + $0x3a8] sm:$0xff]  ;;  %s7575_s22 = sld [smem:[#allocation29_spill]] }
 0x14b   :  { %990 = vmatprep.mubr.f32.mxu0 %v247_v6  ;;  %v248_v53 = vld [vmem:[%s7569_s25 + $0x390] sm:$0xff]  ;;  %v6712_v8 = vpop.permute.xlu1 %583 }
 0x14c   :  { %5041 = vmatpush1.bf16.msra.mxu1 %v5040_v12  ;;  %3654 = vperm.xlu1 %5399, %v3644_v50   ;;  %v1033_v59 = vmax.f32 %v723_v26, 0.0  ;;  %v4103_v50 = vld [vmem:[%s7519_s24 + $0x8] sm:$0xff]  ;;  %v6717_v26 = vpop.permute.xlu0 %578 }
 0x14d   :  { %3649 = vperm.xlu0 %5398, %v3643_v17   ;;  %v727_v32 = vpop.f32.mrb[6].mxu0  ;;  %5042 = vmatprep.subr.bf16.mxu1 %v5541_v1 }
 0x14e   :  { %v728_v47 = vadd.f32 %v727_v32, %v6182_v49  ;;  %v729_v52 = vpop.f32.mrb[7].mxu0  ;;  %991 = vmatmul.mubr.f32.gmra.mrb[112].mxu0 %v246_v21  ;;  %v4102_v21 = vld [vmem:[%s7519_s24] sm:$0xff] }
 0x14f   :  { %995 = vmatprep.mubr.f32.mxu0 %v249_v30  ;;  %v250_v30 = vld [vmem:[%s7569_s25 + $0x3a0] sm:$0xff]  ;;  %v4105_v52 = vld [vmem:[%s7519_s24 + $0x18] sm:$0xff] }
 0x150   :  { %v1034_v6 = vmax.f32 %v728_v47, 0.0  ;;  %3664 = vperm.xlu1 %5399, %v3646_v42   ;;  %v253_v42 = vld [vmem:[%s7569_s25 + $0x3b8] sm:$0xff] }
 0x151   :  { %3659 = vperm.xlu0 %5398, %v3645_v40   ;;  %v732_v49 = vpop.f32.mrb[8].mxu0 }
 0x152   :  { %v5043_v12 = vpack.c.bf16 %v1034_v6, %v1033_v59  ;;  %v734_v17 = vpop.f32.mrb[9].mxu0  ;;  %996 = vmatmul.mubr.f32.gmra.mrb[114].mxu0 %v248_v53  ;;  %v733_v32 = vadd.f32 %v732_v49, %v6206_v58  ;;  %v4104_v58 = vld [vmem:[%s7519_s24 + $0x10] sm:$0xff]  ;;  %v6737_v6 = vpop.permute.xlu1 %593 }
 0x153   :  { %1000 = vmatprep.mubr.f32.mxu0 %v251_v7  ;;  %v252_v59 = vld [vmem:[%s7569_s25 + $0x3b0] sm:$0xff] }
 0x154   :  { %5044 = vmatpush1.bf16.msra.mxu1 %v5043_v12  ;;  %4113 = vperm.xlu1 %5399, %v4103_v50   ;;  %v1035_v7 = vmax.f32 %v733_v32, 0.0  ;;  %v6742_v50 = vpop.permute.xlu0 %588 }
 0x155   :  { %4108 = vperm.xlu0 %5398, %v4102_v21   ;;  %v737_v47 = vpop.f32.mrb[10].mxu0  ;;  %5045 = vmatprep.subr.bf16.mxu1 %v5541_v1 }
 0x156   :  { %v738_v40 = vadd.f32 %v737_v47, %v6201_v56  ;;  %v739_v53 = vpop.f32.mrb[11].mxu0  ;;  %1001 = vmatmul.mubr.f32.gmra.mrb[116].mxu0 %v250_v30  ;;  %v255_v56 = vld [vmem:[%s7569_s25 + $0x3c8] sm:$0xff]  ;;  %v254_v30 = vld [vmem:[%s7569_s25 + $0x3c0] sm:$0xff] }
 0x157   :  { %1005 = vmatprep.mubr.f32.mxu0 %v253_v42  ;;  %v257_v42 = vld [vmem:[%s7569_s25 + $0x3d8] sm:$0xff]  ;;  %v256_v53 = vld [vmem:[%s7569_s25 + $0x3d0] sm:$0xff] }
 0x158   :  { %v1036_v49 = vmax.f32 %v738_v40, 0.0  ;;  %4123 = vperm.xlu1 %5399, %v4105_v52  }
 0x159   :  { %4118 = vperm.xlu0 %5398, %v4104_v58   ;;  %v742_v12 = vpop.f32.mrb[12].mxu0 }
 0x15a   :  { %v5046_v17 = vpack.c.bf16 %v1036_v49, %v1035_v7  ;;  %v744_v21 = vpop.f32.mrb[13].mxu0  ;;  %1006 = vmatmul.mubr.f32.gmra.mrb[118].mxu0 %v252_v59  ;;  %v743_v32 = vadd.f32 %v742_v12, %v6228_v3  ;;  %v259_v3 = vld [vmem:[%s7569_s25 + $0x3e8] sm:$0xff] }
 0x15b   :  { %1010 = vmatprep.mubr.f32.mxu0 %v255_v56 }
 0x15c   :  { %5047 = vmatpush1.bf16.msra.mxu1 %v5046_v17  ;;  %v1037_v58 = vmax.f32 %v743_v32, 0.0  ;;  %v261_v17 = vld [vmem:[%s7569_s25 + $0x3f8] sm:$0xff] }
 0x15d   :  { %v747_v47 = vpop.f32.mrb[14].mxu0  ;;  %5048 = vmatprep.subr.bf16.mxu1 %v5541_v1 }
 0x15e   :  { %v748_v52 = vadd.f32 %v747_v47, %v6226_v2  ;;  %v749_v40 = vpop.f32.mrb[15].mxu0  ;;  %1011 = vmatmul.mubr.f32.gmra.mrb[120].mxu0 %v254_v30  ;;  %v258_v2 = vld [vmem:[%s7569_s25 + $0x3e0] sm:$0xff] }
 0x15f   :  { %1015 = vmatprep.mubr.f32.mxu0 %v257_v42  ;;  %v260_v42 = vld [vmem:[%s7569_s25 + $0x3f0] sm:$0xff]  ;;  %s7577_s25 = sld [smem:[#allocation33_spill]] }
 0x160   :  { %v1038_v59 = vmax.f32 %v748_v52, 0.0 }
 0x161   :  { %v752_v7 = vpop.f32.mrb[16].mxu0 }
 0x162   :  { %v5049_v49 = vpack.c.bf16 %v1038_v59, %v1037_v58  ;;  %v754_v56 = vpop.f32.mrb[17].mxu0  ;;  %1016 = vmatmul.mubr.f32.gmra.mrb[122].mxu0 %v256_v53  ;;  %v753_v12 = vadd.f32 %v752_v7, %v6250_v11 }
 0x163   :  { %1020 = vmatprep.mubr.f32.mxu0 %v259_v3 }
 0x164   :  { %5050 = vmatpush1.bf16.msra.mxu1 %v5049_v49  ;;  %v1039_v47 = vmax.f32 %v753_v12, 0.0 }
 0x165   :  { %v757_v21 = vpop.f32.mrb[18].mxu0  ;;  %5051 = vmatprep.subr.bf16.mxu1 %v5541_v1 }
 0x166   :  { %v758_v30 = vadd.f32 %v757_v21, %v6245_v9  ;;  %v759_v32 = vpop.f32.mrb[19].mxu0  ;;  %1021 = vmatmul.mubr.f32.gmra.mrb[124].mxu0 %v258_v2 }
 0x167   :  { %1025 = vmatprep.mubr.f32.mxu0 %v261_v17 }
 0x168   :  { %v1040_v52 = vmax.f32 %v758_v30, 0.0 }
 0x169   :  { %v762_v11 = vpop.f32.mrb[20].mxu0 }
 0x16a   :  { %v5052_v40 = vpack.c.bf16 %v1040_v52, %v1039_v47  ;;  %v764_v53 = vpop.f32.mrb[21].mxu0  ;;  %1026 = vmatmul.mubr.f32.gmra.mrb[126].mxu0 %v260_v42  ;;  %v763_v58 = vadd.f32 %v762_v11, %v6272_v19 }
 0x16c   :  { %5053 = vmatpush1.bf16.msra.mxu1 %v5052_v40  ;;  %v1041_v7 = vmax.f32 %v763_v58, 0.0 }
 0x16d   :  { %v767_v59 = vpop.f32.mrb[22].mxu0  ;;  %5054 = vmatprep.subr.bf16.mxu1 %v5541_v1 }
 0x16e   :  { %v768_v9 = vadd.f32 %v767_v59, %v6270_v18  ;;  %v769_v3 = vpop.f32.mrb[23].mxu0 }
 0x170   :  { %v1042_v49 = vmax.f32 %v768_v9, 0.0 }
 0x171   :  { %v772_v56 = vpop.f32.mrb[24].mxu0 }
 0x172   :  { %v5055_v2 = vpack.c.bf16 %v1042_v49, %v1041_v7  ;;  %v774_v17 = vpop.f32.mrb[25].mxu0  ;;  %v773_v12 = vadd.f32 %v772_v56, %v6294_v27 }
 0x174   :  { %5056 = vmatpush1.bf16.msra.mxu1 %v5055_v2  ;;  %v1043_v32 = vmax.f32 %v773_v12, 0.0 }
 0x175   :  { %v777_v21 = vpop.f32.mrb[26].mxu0  ;;  %5057 = vmatprep.subr.bf16.mxu1 %v5541_v1 }
 0x176   :  { %v778_v19 = vadd.f32 %v777_v21, %v6289_v25  ;;  %v779_v30 = vpop.f32.mrb[27].mxu0 }
 0x178   :  { %v1044_v42 = vmax.f32 %v778_v19, 0.0 }
 0x179   :  { %v782_v47 = vpop.f32.mrb[28].mxu0 }
 0x17a   :  { %v5058_v52 = vpack.c.bf16 %v1044_v42, %v1043_v32  ;;  %v784_v18 = vpop.f32.mrb[29].mxu0  ;;  %v783_v11 = vadd.f32 %v782_v47, %v6316_v35 }
 0x17c   :  { %5059 = vmatpush1.bf16.msra.mxu1 %v5058_v52  ;;  %v1045_v58 = vmax.f32 %v783_v11, 0.0 }
 0x17d   :  { %v787_v40 = vpop.f32.mrb[30].mxu0  ;;  %5060 = vmatprep.subr.bf16.mxu1 %v5541_v1 }
 0x17e   :  { %v788_v27 = vadd.f32 %v787_v40, %v6314_v34  ;;  %v789_v53 = vpop.f32.mrb[31].mxu0 }
 0x180   :  { %v1046_v59 = vmax.f32 %v788_v27, 0.0 }
 0x181   :  { %v792_v9 = vpop.f32.mrb[32].mxu0 }
 0x182   :  { %v5061_v3 = vpack.c.bf16 %v1046_v59, %v1045_v58  ;;  %v794_v25 = vpop.f32.mrb[33].mxu0  ;;  %v793_v7 = vadd.f32 %v792_v9, %v6338_v45 }
 0x184   :  { %5062 = vmatpush1.bf16.msra.mxu1 %v5061_v3  ;;  %v1047_v2 = vmax.f32 %v793_v7, 0.0 }
 0x185   :  { %v797_v49 = vpop.f32.mrb[34].mxu0  ;;  %5063 = vmatprep.subr.bf16.mxu1 %v5541_v1 }
 0x186   :  { %v798_v35 = vadd.f32 %v797_v49, %v6333_v43  ;;  %v799_v56 = vpop.f32.mrb[35].mxu0 }
 0x188   :  { %v1048_v17 = vmax.f32 %v798_v35, 0.0 }
 0x189   :  { %v802_v12 = vpop.f32.mrb[36].mxu0 }
 0x18a   :  { %v5064_v21 = vpack.c.bf16 %v1048_v17, %v1047_v2  ;;  %v804_v34 = vpop.f32.mrb[37].mxu0  ;;  %v803_v19 = vadd.f32 %v802_v12, %v6360_v55 }
 0x18c   :  { %5065 = vmatpush1.bf16.msra.mxu1 %v5064_v21  ;;  %v1049_v42 = vmax.f32 %v803_v19, 0.0 }
 0x18d   :  { %v807_v30 = vpop.f32.mrb[38].mxu0  ;;  %5066 = vmatprep.subr.bf16.mxu1 %v5541_v1 }
 0x18e   :  { %v808_v45 = vadd.f32 %v807_v30, %v6358_v54  ;;  %v809_v32 = vpop.f32.mrb[39].mxu0 }
 0x190   :  { %v1050_v47 = vmax.f32 %v808_v45, 0.0 }
 0x191   :  { %v812_v52 = vpop.f32.mrb[40].mxu0 }
 0x192   :  { %v5067_v18 = vpack.c.bf16 %v1050_v47, %v1049_v42  ;;  %v814_v43 = vpop.f32.mrb[41].mxu0  ;;  %v813_v11 = vadd.f32 %v812_v52, %v6382_v4 }
 0x194   :  { %5068 = vmatpush1.bf16.msra.mxu1 %v5067_v18  ;;  %v1051_v53 = vmax.f32 %v813_v11, 0.0 }
 0x195   :  { %v817_v40 = vpop.f32.mrb[42].mxu0  ;;  %5069 = vmatprep.subr.bf16.mxu1 %v5541_v1 }
 0x196   :  { %v818_v55 = vadd.f32 %v817_v40, %v6377_v63  ;;  %v819_v27 = vpop.f32.mrb[43].mxu0 }
 0x198   :  { %v1052_v58 = vmax.f32 %v818_v55, 0.0 }
 0x199   :  { %v822_v59 = vpop.f32.mrb[44].mxu0 }
 0x19a   :  { %v5070_v9 = vpack.c.bf16 %v1052_v58, %v1051_v53  ;;  %v824_v54 = vpop.f32.mrb[45].mxu0  ;;  %v823_v3 = vadd.f32 %v822_v59, %v6404_v14 }
 0x19c   :  { %5071 = vmatpush1.bf16.msra.mxu1 %v5070_v9  ;;  %v1053_v49 = vmax.f32 %v823_v3, 0.0 }
 0x19d   :  { %v827_v25 = vpop.f32.mrb[46].mxu0  ;;  %5072 = vmatprep.subr.bf16.mxu1 %v5541_v1 }
 0x19e   :  { %v828_v4 = vadd.f32 %v827_v25, %v6402_v13  ;;  %v829_v7 = vpop.f32.mrb[47].mxu0 }
 0x1a0   :  { %v1054_v35 = vmax.f32 %v828_v4, 0.0 }
 0x1a1   :  { %v832_v56 = vpop.f32.mrb[48].mxu0 }
 0x1a2   :  { %v5073_v2 = vpack.c.bf16 %v1054_v35, %v1053_v49  ;;  %v834_v63 = vpop.f32.mrb[49].mxu0  ;;  %v833_v17 = vadd.f32 %v832_v56, %v6426_v24 }
 0x1a4   :  { %5074 = vmatpush1.bf16.msra.mxu1 %v5073_v2  ;;  %v1055_v34 = vmax.f32 %v833_v17, 0.0  ;;  %v1095_v2 = vld [vmem:[#allocation3] sm:$0xff]  ;;  %v1100_v17 = vld [vmem:[#allocation3 + $0x28] sm:$0xff] }
 0x1a5   :  { %v837_v12 = vpop.f32.mrb[50].mxu0  ;;  %5075 = vmatprep.subr.bf16.mxu1 %v5541_v1 }
 0x1a6   :  { %v838_v14 = vadd.f32 %v837_v12, %v6421_v22  ;;  %v839_v21 = vpop.f32.mrb[51].mxu0 }
 0x1a7   :  { %v1099_v21 = vld [vmem:[#allocation3 + $0x20] sm:$0xff] }
 0x1a8   :  { %v1056_v19 = vmax.f32 %v838_v14, 0.0 }
 0x1a9   :  { %v842_v30 = vpop.f32.mrb[52].mxu0 }
 0x1aa   :  { %v5076_v45 = vpack.c.bf16 %v1056_v19, %v1055_v34  ;;  %v844_v13 = vpop.f32.mrb[53].mxu0  ;;  %v843_v32 = vadd.f32 %v842_v30, %v6448_v36  ;;  %v1104_v19 = vld [vmem:[#allocation3 + $0x48] sm:$0xff] }
 0x1ab   :  { %v1103_v13 = vld [vmem:[#allocation3 + $0x40] sm:$0xff] }
 0x1ac   :  { %5077 = vmatpush1.bf16.msra.mxu1 %v5076_v45  ;;  %v1057_v52 = vmax.f32 %v843_v32, 0.0 }
 0x1ad   :  { %v847_v42 = vpop.f32.mrb[54].mxu0  ;;  %5078 = vmatprep.subr.bf16.mxu1 %v5541_v1 }
 0x1ae   :  { %v848_v24 = vadd.f32 %v847_v42, %v6446_v33  ;;  %v849_v47 = vpop.f32.mrb[55].mxu0  ;;  %v1108_v42 = vld [vmem:[#allocation3 + $0x68] sm:$0xff] }
 0x1b0   :  { %v1058_v18 = vmax.f32 %v848_v24, 0.0 }
 0x1b1   :  { %v852_v43 = vpop.f32.mrb[56].mxu0 }
 0x1b2   :  { %v5079_v11 = vpack.c.bf16 %v1058_v18, %v1057_v52  ;;  %v854_v22 = vpop.f32.mrb[57].mxu0  ;;  %v853_v40 = vadd.f32 %v852_v43, %v6470_v48  ;;  %v1107_v18 = vld [vmem:[#allocation3 + $0x60] sm:$0xff] }
 0x1b4   :  { %5080 = vmatpush1.bf16.msra.mxu1 %v5079_v11  ;;  %v1059_v53 = vmax.f32 %v853_v40, 0.0  ;;  %v1112_v11 = vld [vmem:[#allocation3 + $0x88] sm:$0xff] }
 0x1b5   :  { %v857_v55 = vpop.f32.mrb[58].mxu0  ;;  %5081 = vmatprep.subr.bf16.mxu1 %v5541_v1 }
 0x1b6   :  { %v858_v36 = vadd.f32 %v857_v55, %v6465_v46  ;;  %v859_v27 = vpop.f32.mrb[59].mxu0  ;;  %v1111_v55 = vld [vmem:[#allocation3 + $0x80] sm:$0xff] }
 0x1b7   :  { %v1116_v27 = vld [vmem:[#allocation3 + $0xa8] sm:$0xff] }
 0x1b8   :  { %v1060_v58 = vmax.f32 %v858_v36, 0.0 }
 0x1b9   :  { %v862_v59 = vpop.f32.mrb[60].mxu0 }
 0x1ba   :  { %v5082_v9 = vpack.c.bf16 %v1060_v58, %v1059_v53  ;;  %v864_v33 = vpop.f32.mrb[61].mxu0  ;;  %v863_v54 = vadd.f32 %v862_v59, %v6492_v62 }
 0x1bc   :  { %5083 = vmatpush1.bf16.msra.mxu1 %v5082_v9  ;;  %v1061_v4 = vmax.f32 %v863_v54, 0.0  ;;  %v1115_v9 = vld [vmem:[#allocation3 + $0xa0] sm:$0xff]  ;;  %v1120_v54 = vld [vmem:[#allocation3 + $0xc8] sm:$0xff] }
 0x1bd   :  { %v867_v3 = vpop.f32.mrb[62].mxu0  ;;  %5084 = vmatprep.subr.bf16.mxu1 %v5541_v1 }
 0x1be   :  { %v868_v48 = vadd.f32 %v867_v3, %v6490_v61  ;;  %v869_v25 = vpop.f32.mrb[63].mxu0 }
 0x1bf   :  { %v1119_v25 = vld [vmem:[#allocation3 + $0xc0] sm:$0xff] }
 0x1c0   :  { %v1062_v7 = vmax.f32 %v868_v48, 0.0 }
 0x1c1   :  { %v872_v49 = vpop.f32.mrb[64].mxu0 }
 0x1c2   :  { %v5085_v35 = vpack.c.bf16 %v1062_v7, %v1061_v4  ;;  %v874_v46 = vpop.f32.mrb[65].mxu0  ;;  %v873_v56 = vadd.f32 %v872_v49, %v6514_v15  ;;  %v1124_v7 = vld [vmem:[#allocation3 + $0xe8] sm:$0xff] }
 0x1c4   :  { %5086 = vmatpush1.bf16.msra.mxu1 %v5085_v35  ;;  %v1063_v14 = vmax.f32 %v873_v56, 0.0  ;;  %v1123_v56 = vld [vmem:[#allocation3 + $0xe0] sm:$0xff] }
 0x1c5   :  { %v877_v63 = vpop.f32.mrb[66].mxu0  ;;  %5087 = vmatprep.subr.bf16.mxu1 %v5541_v1 }
 0x1c6   :  { %v878_v62 = vadd.f32 %v877_v63, %v6509_v10  ;;  %v879_v12 = vpop.f32.mrb[67].mxu0  ;;  %v1128_v63 = vld [vmem:[#allocation3 + $0x108] sm:$0xff] }
 0x1c7   :  { %1480 = vmatmul.mubr.f32.vlgmr.msra.gmra.mrb[0].mxu1 %v1095_v2  ;;  %v1127_v12 = vld [vmem:[#allocation3 + $0x100] sm:$0xff] }
 0x1c8   :  { %v1064_v61 = vmax.f32 %v878_v62, 0.0  ;;  %1484 = vmatprep.mubr.f32.mxu1 %v1100_v17 }
 0x1c9   :  { %v882_v34 = vpop.f32.mrb[68].mxu0 }
 0x1ca   :  { %v5088_v30 = vpack.c.bf16 %v1064_v61, %v1063_v14  ;;  %v884_v45 = vpop.f32.mrb[69].mxu0  ;;  %v883_v15 = vadd.f32 %v882_v34, %v6536_v29  ;;  %v1132_v61 = vld [vmem:[#allocation3 + $0x128] sm:$0xff] }
 0x1cb   :  { %1485 = vmatmul.mubr.f32.gmra.mrb[2].mxu1 %v1099_v21 }
 0x1cc   :  { %5089 = vmatpush1.bf16.msra.mxu1 %v5088_v30  ;;  %1489 = vmatprep.mubr.f32.mxu1 %v1104_v19  ;;  %v1065_v47 = vmax.f32 %v883_v15, 0.0  ;;  %v1131_v30 = vld [vmem:[#allocation3 + $0x120] sm:$0xff]  ;;  %v1136_v15 = vld [vmem:[#allocation3 + $0x148] sm:$0xff] }
 0x1cd   :  { %v887_v32 = vpop.f32.mrb[70].mxu0  ;;  %5090 = vmatprep.subr.bf16.mxu1 %v5541_v1 }
 0x1ce   :  { %v888_v10 = vadd.f32 %v887_v32, %v6534_v28  ;;  %v889_v24 = vpop.f32.mrb[71].mxu0 }
 0x1cf   :  { %1490 = vmatmul.mubr.f32.gmra.mrb[4].mxu1 %v1103_v13  ;;  %v1140_v24 = vld [vmem:[#allocation3 + $0x168] sm:$0xff] }
 0x1d0   :  { %v1066_v52 = vmax.f32 %v888_v10, 0.0  ;;  %1494 = vmatprep.mubr.f32.mxu1 %v1108_v42  ;;  %v1135_v42 = vld [vmem:[#allocation3 + $0x140] sm:$0xff] }
 0x1d1   :  { %v892_v43 = vpop.f32.mrb[72].mxu0 }
 0x1d2   :  { %v5091_v22 = vpack.c.bf16 %v1066_v52, %v1065_v47  ;;  %v894_v40 = vpop.f32.mrb[73].mxu0  ;;  %v893_v29 = vadd.f32 %v892_v43, %v6558_v44  ;;  %v1139_v43 = vld [vmem:[#allocation3 + $0x160] sm:$0xff] }
 0x1d3   :  { %1495 = vmatmul.mubr.f32.gmra.mrb[6].mxu1 %v1107_v18 }
 0x1d4   :  { %5092 = vmatpush1.bf16.msra.mxu1 %v5091_v22  ;;  %1499 = vmatprep.mubr.f32.mxu1 %v1112_v11  ;;  %v1067_v58 = vmax.f32 %v893_v29, 0.0  ;;  %v1144_v22 = vld [vmem:[#allocation3 + $0x188] sm:$0xff] }
 0x1d5   :  { %v897_v36 = vpop.f32.mrb[74].mxu0  ;;  %5093 = vmatprep.subr.bf16.mxu1 %v5541_v1 }
 0x1d6   :  { %v898_v28 = vadd.f32 %v897_v36, %v6553_v39  ;;  %v899_v53 = vpop.f32.mrb[75].mxu0 }
 0x1d7   :  { %1500 = vmatmul.mubr.f32.gmra.mrb[8].mxu1 %v1111_v55  ;;  %v1143_v55 = vld [vmem:[#allocation3 + $0x180] sm:$0xff] }
 0x1d8   :  { %v1068_v59 = vmax.f32 %v898_v28, 0.0  ;;  %1504 = vmatprep.mubr.f32.mxu1 %v1116_v27  ;;  %v1148_v27 = vld [vmem:[#allocation3 + $0x1a8] sm:$0xff] }
 0x1d9   :  { %v902_v33 = vpop.f32.mrb[76].mxu0 }
 0x1da   :  { %v5094_v3 = vpack.c.bf16 %v1068_v59, %v1067_v58  ;;  %v904_v48 = vpop.f32.mrb[77].mxu0  ;;  %v903_v44 = vadd.f32 %v902_v33, %v6580_v0  ;;  %v1147_v59 = vld [vmem:[#allocation3 + $0x1a0] sm:$0xff]  ;;  %v1152_v33 = vld [vmem:[#allocation3 + $0x1c8] sm:$0xff] }
 0x1db   :  { %1505 = vmatmul.mubr.f32.gmra.mrb[10].mxu1 %v1115_v9  ;;  %v1151_v48 = vld [vmem:[#allocation3 + $0x1c0] sm:$0xff] }
 0x1dc   :  { %5095 = vmatpush1.bf16.msra.mxu1 %v5094_v3  ;;  %1509 = vmatprep.mubr.f32.mxu1 %v1120_v54  ;;  %v1069_v35 = vmax.f32 %v903_v44, 0.0 }
 0x1dd   :  { %v907_v4 = vpop.f32.mrb[78].mxu0  ;;  %5096 = vmatprep.subr.bf16.mxu1 %v5541_v1 }
 0x1de   :  { %v908_v39 = vadd.f32 %v907_v4, %v6578_v60  ;;  %v909_v49 = vpop.f32.mrb[79].mxu0 }
 0x1df   :  { %1510 = vmatmul.mubr.f32.gmra.mrb[12].mxu1 %v1119_v25  ;;  %v1156_v25 = vld [vmem:[#allocation3 + $0x1e8] sm:$0xff]  ;;  %v1155_v49 = vld [vmem:[#allocation3 + $0x1e0] sm:$0xff] }
 0x1e0   :  { %v1070_v46 = vmax.f32 %v908_v39, 0.0  ;;  %1514 = vmatprep.mubr.f32.mxu1 %v1124_v7 }
 0x1e1   :  { %v912_v2 = vpop.f32.mrb[80].mxu0 }
 0x1e2   :  { %v5097_v17 = vpack.c.bf16 %v1070_v46, %v1069_v35  ;;  %v914_v62 = vpop.f32.mrb[81].mxu0  ;;  %v913_v0 = vadd.f32 %v912_v2, %v6602_v20  ;;  %v1160_v46 = vld [vmem:[#allocation3 + $0x208] sm:$0xff] }
 0x1e3   :  { %1515 = vmatmul.mubr.f32.gmra.mrb[14].mxu1 %v1123_v56  ;;  %v1164_v62 = vld [vmem:[#allocation3 + $0x228] sm:$0xff] }
 0x1e4   :  { %5098 = vmatpush1.bf16.msra.mxu1 %v5097_v17  ;;  %1519 = vmatprep.mubr.f32.mxu1 %v1128_v63  ;;  %v1071_v34 = vmax.f32 %v913_v0, 0.0  ;;  %v1159_v63 = vld [vmem:[#allocation3 + $0x200] sm:$0xff] }
 0x1e5   :  { %v917_v14 = vpop.f32.mrb[82].mxu0  ;;  %5099 = vmatprep.subr.bf16.mxu1 %v5541_v1 }
 0x1e6   :  { %v918_v60 = vadd.f32 %v917_v14, %v6597_v16  ;;  %v919_v21 = vpop.f32.mrb[83].mxu0 }
 0x1e7   :  { %1520 = vmatmul.mubr.f32.gmra.mrb[16].mxu1 %v1127_v12  ;;  %v1168_v21 = vld [vmem:[#allocation3 + $0x248] sm:$0xff] }
 0x1e8   :  { %v1072_v19 = vmax.f32 %v918_v60, 0.0  ;;  %1524 = vmatprep.mubr.f32.mxu1 %v1132_v61  ;;  %v1163_v61 = vld [vmem:[#allocation3 + $0x220] sm:$0xff] }
 0x1e9   :  { %v922_v45 = vpop.f32.mrb[84].mxu0 }
 0x1ea   :  { %v5100_v13 = vpack.c.bf16 %v1072_v19, %v1071_v34  ;;  %v924_v32 = vpop.f32.mrb[85].mxu0  ;;  %v923_v20 = vadd.f32 %v922_v45, %v6624_v38 }
 0x1eb   :  { %1525 = vmatmul.mubr.f32.gmra.mrb[18].mxu1 %v1131_v30  ;;  %v1167_v30 = vld [vmem:[#allocation3 + $0x240] sm:$0xff] }
 0x1ec   :  { %5101 = vmatpush1.bf16.msra.mxu1 %v5100_v13  ;;  %1529 = vmatprep.mubr.f32.mxu1 %v1136_v15  ;;  %v1073_v52 = vmax.f32 %v923_v20, 0.0  ;;  %v1172_v15 = vld [vmem:[#allocation3 + $0x268] sm:$0xff] }
 0x1ed   :  { %v927_v10 = vpop.f32.mrb[86].mxu0  ;;  %5102 = vmatprep.subr.bf16.mxu1 %v5541_v1 }
 0x1ee   :  { %v928_v16 = vadd.f32 %v927_v10, %v6622_v37  ;;  %v929_v47 = vpop.f32.mrb[87].mxu0 }
 0x1ef   :  { %1530 = vmatmul.mubr.f32.gmra.mrb[20].mxu1 %v1135_v42  ;;  %v1171_v42 = vld [vmem:[#allocation3 + $0x260] sm:$0xff] }
 0x1f0   :  { %v1074_v18 = vmax.f32 %v928_v16, 0.0  ;;  %1534 = vmatprep.mubr.f32.mxu1 %v1140_v24  ;;  %v1176_v24 = vld [vmem:[#allocation3 + $0x288] sm:$0xff] }
 0x1f1   :  { %v932_v11 = vpop.f32.mrb[88].mxu0 }
 0x1f2   :  { %v5103_v40 = vpack.c.bf16 %v1074_v18, %v1073_v52  ;;  %v934_v29 = vpop.f32.mrb[89].mxu0  ;;  %v933_v38 = vadd.f32 %v932_v11, %v6646_v5  ;;  %v1175_v52 = vld [vmem:[#allocation3 + $0x280] sm:$0xff] }
 0x1f3   :  { %1535 = vmatmul.mubr.f32.gmra.mrb[22].mxu1 %v1139_v43  ;;  %v1180_v43 = vld [vmem:[#allocation3 + $0x2a8] sm:$0xff]  ;;  %v1179_v29 = vld [vmem:[#allocation3 + $0x2a0] sm:$0xff] }
 0x1f4   :  { %5104 = vmatpush1.bf16.msra.mxu1 %v5103_v40  ;;  %1539 = vmatprep.mubr.f32.mxu1 %v1144_v22  ;;  %v1075_v53 = vmax.f32 %v933_v38, 0.0 }
 0x1f5   :  { %v937_v36 = vpop.f32.mrb[90].mxu0  ;;  %5105 = vmatprep.subr.bf16.mxu1 %v5541_v1 }
 0x1f6   :  { %v938_v37 = vadd.f32 %v937_v36, %v6641_v57  ;;  %v939_v28 = vpop.f32.mrb[91].mxu0 }
 0x1f7   :  { %1540 = vmatmul.mubr.f32.gmra.mrb[24].mxu1 %v1143_v55  ;;  %v1184_v55 = vld [vmem:[#allocation3 + $0x2c8] sm:$0xff]  ;;  %v1183_v28 = vld [vmem:[#allocation3 + $0x2c0] sm:$0xff] }
 0x1f8   :  { %v1076_v58 = vmax.f32 %v938_v37, 0.0  ;;  %1544 = vmatprep.mubr.f32.mxu1 %v1148_v27 }
 0x1f9   :  { %v942_v9 = vpop.f32.mrb[92].mxu0 }
 0x1fa   :  { %v5106_v54 = vpack.c.bf16 %v1076_v58, %v1075_v53  ;;  %v944_v3 = vpop.f32.mrb[93].mxu0  ;;  %v943_v5 = vadd.f32 %v942_v9, %v6670_v51  ;;  %v604_v53 = vpop.permute.xlu1 %603 }
 0x1fb   :  { %1545 = vmatmul.mubr.f32.gmra.mrb[26].mxu1 %v1147_v59  ;;  %v1188_v59 = vld [vmem:[#allocation3 + $0x2e8] sm:$0xff]  ;;  %v1187_v3 = vld [vmem:[#allocation3 + $0x2e0] sm:$0xff] }
 0x1fc   :  { %5107 = vmatpush1.bf16.msra.mxu1 %v5106_v54  ;;  %1549 = vmatprep.mubr.f32.mxu1 %v1152_v33  ;;  %v1077_v7 = vmax.f32 %v943_v5, 0.0 }
 0x1fd   :  { %v947_v44 = vpop.f32.mrb[94].mxu0  ;;  %5108 = vmatprep.subr.bf16.mxu1 %v5541_v1 }
 0x1fe   :  { %v948_v57 = vadd.f32 %v947_v44, %v6667_v41  ;;  %v949_v4 = vpop.f32.mrb[95].mxu0 }
 0x1ff   :  { %1550 = vmatmul.mubr.f32.gmra.mrb[28].mxu1 %v1151_v48  ;;  %v1192_v48 = vld [vmem:[#allocation3 + $0x308] sm:$0xff] }
 0x200   :  { %v1078_v39 = vmax.f32 %v948_v57, 0.0  ;;  %1554 = vmatprep.mubr.f32.mxu1 %v1156_v25 }
 0x201   :  { %v952_v35 = vpop.f32.mrb[96].mxu0 }
 0x202   :  { %v5109_v56 = vpack.c.bf16 %v1078_v39, %v1077_v7  ;;  %v954_v2 = vpop.f32.mrb[97].mxu0  ;;  %v953_v51 = vadd.f32 %v952_v35, %v6693_v31  ;;  %v1191_v7 = vld [vmem:[#allocation3 + $0x300] sm:$0xff]  ;;  %v614_v39 = vpop.permute.xlu1 %613  ;;  %v1196_v35 = vld [vmem:[#allocation3 + $0x328] sm:$0xff] }
 0x203   :  { %1555 = vmatmul.mubr.f32.gmra.mrb[30].mxu1 %v1155_v49 }
 0x204   :  { %5110 = vmatpush1.bf16.msra.mxu1 %v5109_v56  ;;  %1559 = vmatprep.mubr.f32.mxu1 %v1160_v46  ;;  %v1079_v12 = vmax.f32 %v953_v51, 0.0 }
 0x205   :  { %v957_v17 = vpop.f32.mrb[98].mxu0  ;;  %5111 = vmatprep.subr.bf16.mxu1 %v5541_v1 }
 0x206   :  { %v958_v41 = vadd.f32 %v957_v17, %v6687_v23  ;;  %v959_v0 = vpop.f32.mrb[99].mxu0 }
 0x207   :  { %1560 = vmatmul.mubr.f32.gmra.mrb[32].mxu1 %v1159_v63  ;;  %v1195_v63 = vld [vmem:[#allocation3 + $0x320] sm:$0xff] }
 0x208   :  { %v1080_v14 = vmax.f32 %v958_v41, 0.0  ;;  %1564 = vmatprep.mubr.f32.mxu1 %v1164_v62  ;;  %v1200_v62 = vld [vmem:[#allocation3 + $0x348] sm:$0xff] }
 0x209   :  { %v962_v60 = vpop.f32.mrb[100].mxu0 }
 0x20a   :  { %v5112_v34 = vpack.c.bf16 %v1080_v14, %v1079_v12  ;;  %v964_v19 = vpop.f32.mrb[101].mxu0  ;;  %v963_v31 = vadd.f32 %v962_v60, %v6717_v26  ;;  %v624_v60 = vpop.permute.xlu1 %623 }
 0x20b   :  { %1565 = vmatmul.mubr.f32.gmra.mrb[34].mxu1 %v1163_v61  ;;  %v1199_v61 = vld [vmem:[#allocation3 + $0x340] sm:$0xff] }
 0x20c   :  { %5113 = vmatpush1.bf16.msra.mxu1 %v5112_v34  ;;  %1569 = vmatprep.mubr.f32.mxu1 %v1168_v21  ;;  %v1081_v32 = vmax.f32 %v963_v31, 0.0  ;;  %v1204_v34 = vld [vmem:[#allocation3 + $0x368] sm:$0xff] }
 0x20d   :  { %v967_v45 = vpop.f32.mrb[102].mxu0  ;;  %5114 = vmatprep.subr.bf16.mxu1 %v5541_v1 }
 0x20e   :  { %v968_v23 = vadd.f32 %v967_v45, %v6712_v8  ;;  %v969_v13 = vpop.f32.mrb[103].mxu0 }
 0x20f   :  { %1570 = vmatmul.mubr.f32.gmra.mrb[36].mxu1 %v1167_v30  ;;  %v1208_v13 = vld [vmem:[#allocation3 + $0x388] sm:$0xff] }
 0x210   :  { %v1082_v20 = vmax.f32 %v968_v23, 0.0  ;;  %1574 = vmatprep.mubr.f32.mxu1 %v1172_v15  ;;  %v1203_v15 = vld [vmem:[#allocation3 + $0x360] sm:$0xff] }
 0x211   :  { %v972_v10 = vpop.f32.mrb[104].mxu0 }
 0x212   :  { %v5115_v16 = vpack.c.bf16 %v1082_v20, %v1081_v32  ;;  %v974_v47 = vpop.f32.mrb[105].mxu0  ;;  %v973_v26 = vadd.f32 %v972_v10, %v6742_v50  ;;  %v599_v50 = vpop.permute.xlu0 %598 }
 0x213   :  { %1575 = vmatmul.mubr.f32.gmra.mrb[38].mxu1 %v1171_v42 }
 0x214   :  { %5116 = vmatpush1.bf16.msra.mxu1 %v5115_v16  ;;  %1579 = vmatprep.mubr.f32.mxu1 %v1176_v24  ;;  %v1083_v22 = vmax.f32 %v973_v26, 0.0  ;;  %v1207_v24 = vld [vmem:[#allocation3 + $0x380] sm:$0xff]  ;;  %v634_v16 = vpop.permute.xlu1 %633  ;;  %v1212_v26 = vld [vmem:[#allocation3 + $0x3a8] sm:$0xff] }
 0x215   :  { %v977_v18 = vpop.f32.mrb[106].mxu0  ;;  %5117 = vmatprep.subr.bf16.mxu1 %v5541_v1 }
 0x216   :  { %v978_v8 = vadd.f32 %v977_v18, %v6737_v6  ;;  %v979_v11 = vpop.f32.mrb[107].mxu0  ;;  %v609_v57 = vpop.permute.xlu0 %608 }
 0x217   :  { %1580 = vmatmul.mubr.f32.gmra.mrb[40].mxu1 %v1175_v52  ;;  %v1211_v11 = vld [vmem:[#allocation3 + $0x3a0] sm:$0xff] }
 0x218   :  { %v1084_v40 = vmax.f32 %v978_v8, 0.0  ;;  %1584 = vmatprep.mubr.f32.mxu1 %v1180_v43 }
 0x219   :  { %v982_v38 = vpop.f32.mrb[108].mxu0 }
 0x21a   :  { %v5118_v36 = vpack.c.bf16 %v1084_v40, %v1083_v22  ;;  %v984_v27 = vpop.f32.mrb[109].mxu0  ;;  %v983_v37 = vadd.f32 %v982_v38, %v599_v50  ;;  %v619_v12 = vpop.permute.xlu0 %618  ;;  %v1216_v40 = vld [vmem:[#allocation3 + $0x3c8] sm:$0xff] }
 0x21b   :  { %1585 = vmatmul.mubr.f32.gmra.mrb[42].mxu1 %v1179_v29  ;;  %v1215_v27 = vld [vmem:[#allocation3 + $0x3c0] sm:$0xff]  ;;  %v644_v50 = vpop.permute.xlu1 %643 }
 0x21c   :  { %5119 = vmatpush1.bf16.msra.mxu1 %v5118_v36  ;;  %1589 = vmatprep.mubr.f32.mxu1 %v1184_v55  ;;  %v1085_v33 = vmax.f32 %v983_v37, 0.0 }
 0x21d   :  { %v987_v58 = vpop.f32.mrb[110].mxu0  ;;  %5120 = vmatprep.subr.bf16.mxu1 %v5541_v1 }
 0x21e   :  { %v988_v6 = vadd.f32 %v987_v58, %v604_v53  ;;  %v989_v9 = vpop.f32.mrb[111].mxu0  ;;  %v629_v42 = vpop.permute.xlu0 %628 }
 0x21f   :  { %1590 = vmatmul.mubr.f32.gmra.mrb[44].mxu1 %v1183_v28  ;;  %v1220_v28 = vld [vmem:[#allocation3 + $0x3e8] sm:$0xff]  ;;  %v1219_v9 = vld [vmem:[#allocation3 + $0x3e0] sm:$0xff] }
 0x220   :  { %v1086_v54 = vmax.f32 %v988_v6, 0.0  ;;  %1594 = vmatprep.mubr.f32.mxu1 %v1188_v59 }
 0x221   :  { %v992_v5 = vpop.f32.mrb[112].mxu0 }
 0x222   :  { %v5121_v44 = vpack.c.bf16 %v1086_v54, %v1085_v33  ;;  %v994_v25 = vpop.f32.mrb[113].mxu0  ;;  %v993_v4 = vadd.f32 %v992_v5, %v609_v57  ;;  %v639_v55 = vpop.permute.xlu0 %638  ;;  %v1098_v33 = vld [vmem:[#allocation3 + $0x18] sm:$0xff]  ;;  %v1109_v57 = vld [vmem:[#allocation3 + $0x70] sm:$0xff] }
 0x223   :  { %1595 = vmatmul.mubr.f32.gmra.mrb[46].mxu1 %v1187_v3  ;;  %v1097_v3 = vld [vmem:[#allocation3 + $0x10] sm:$0xff]  ;;  %v1102_v5 = vld [vmem:[#allocation3 + $0x38] sm:$0xff] }
 0x224   :  { %5122 = vmatpush1.bf16.msra.mxu1 %v5121_v44  ;;  %1599 = vmatprep.mubr.f32.mxu1 %v1192_v48  ;;  %v1087_v2 = vmax.f32 %v993_v4, 0.0  ;;  %v1101_v48 = vld [vmem:[#allocation3 + $0x30] sm:$0xff]  ;;  %v1106_v44 = vld [vmem:[#allocation3 + $0x58] sm:$0xff] }
 0x225   :  { %v997_v49 = vpop.f32.mrb[114].mxu0  ;;  %5123 = vmatprep.subr.bf16.mxu1 %v5541_v1  ;;  %v1110_v25 = vld [vmem:[#allocation3 + $0x78] sm:$0xff] }
 0x226   :  { %v998_v46 = vadd.f32 %v997_v49, %v614_v39  ;;  %v999_v56 = vpop.f32.mrb[115].mxu0  ;;  %v1114_v4 = vld [vmem:[#allocation3 + $0x98] sm:$0xff]  ;;  %v1117_v49 = vld [vmem:[#allocation3 + $0xb0] sm:$0xff] }
 0x227   :  { %1600 = vmatmul.mubr.f32.gmra.mrb[48].mxu1 %v1191_v7  ;;  %v1113_v7 = vld [vmem:[#allocation3 + $0x90] sm:$0xff]  ;;  %v1118_v39 = vld [vmem:[#allocation3 + $0xb8] sm:$0xff] }
 0x228   :  { %v1088_v51 = vmax.f32 %v998_v46, 0.0  ;;  %1604 = vmatprep.mubr.f32.mxu1 %v1196_v35  ;;  %v1122_v35 = vld [vmem:[#allocation3 + $0xd8] sm:$0xff]  ;;  %v1121_v46 = vld [vmem:[#allocation3 + $0xd0] sm:$0xff] }
 0x229   :  { %v1002_v17 = vpop.f32.mrb[116].mxu0  ;;  %v1126_v56 = vld [vmem:[#allocation3 + $0xf8] sm:$0xff] }
 0x22a   :  { %v5124_v41 = vpack.c.bf16 %v1088_v51, %v1087_v2  ;;  %v1004_v0 = vpop.f32.mrb[117].mxu0  ;;  %v1003_v14 = vadd.f32 %v1002_v17, %v619_v12  ;;  %v1125_v2 = vld [vmem:[#allocation3 + $0xf0] sm:$0xff]  ;;  %v1130_v51 = vld [vmem:[#allocation3 + $0x118] sm:$0xff] }
 0x22b   :  { %1605 = vmatmul.mubr.f32.gmra.mrb[50].mxu1 %v1195_v63  ;;  %v1129_v63 = vld [vmem:[#allocation3 + $0x110] sm:$0xff]  ;;  %v1134_v17 = vld [vmem:[#allocation3 + $0x138] sm:$0xff] }
 0x22c   :  { %5125 = vmatpush1.bf16.msra.mxu1 %v5124_v41  ;;  %1609 = vmatprep.mubr.f32.mxu1 %v1200_v62  ;;  %v1089_v30 = vmax.f32 %v1003_v14, 0.0  ;;  %v1133_v62 = vld [vmem:[#allocation3 + $0x130] sm:$0xff]  ;;  %v1138_v41 = vld [vmem:[#allocation3 + $0x158] sm:$0xff] }
 0x22d   :  { %v1007_v21 = vpop.f32.mrb[118].mxu0  ;;  %5126 = vmatprep.subr.bf16.mxu1 %v5541_v1  ;;  %v1137_v0 = vld [vmem:[#allocation3 + $0x150] sm:$0xff]  ;;  %v1142_v12 = vld [vmem:[#allocation3 + $0x178] sm:$0xff] }
 0x22e   :  { %v1008_v19 = vadd.f32 %v1007_v21, %v624_v60  ;;  %v1009_v31 = vpop.f32.mrb[119].mxu0  ;;  %v1141_v14 = vld [vmem:[#allocation3 + $0x170] sm:$0xff]  ;;  %v1150_v21 = vld [vmem:[#allocation3 + $0x1b8] sm:$0xff] }
 0x22f   :  { %1610 = vmatmul.mubr.f32.gmra.mrb[52].mxu1 %v1199_v61  ;;  %v1146_v61 = vld [vmem:[#allocation3 + $0x198] sm:$0xff]  ;;  %v1145_v60 = vld [vmem:[#allocation3 + $0x190] sm:$0xff] }
 0x230   :  { %v1090_v45 = vmax.f32 %v1008_v19, 0.0  ;;  %1614 = vmatprep.mubr.f32.mxu1 %v1204_v34  ;;  %v1149_v34 = vld [vmem:[#allocation3 + $0x1b0] sm:$0xff]  ;;  %v1154_v19 = vld [vmem:[#allocation3 + $0x1d8] sm:$0xff] }
 0x231   :  { %v1012_v23 = vpop.f32.mrb[120].mxu0  ;;  %v1153_v31 = vld [vmem:[#allocation3 + $0x1d0] sm:$0xff] }
 0x232   :  { %v5127_v32 = vpack.c.bf16 %v1090_v45, %v1089_v30  ;;  %v1014_v20 = vpop.f32.mrb[121].mxu0  ;;  %v1013_v10 = vadd.f32 %v1012_v23, %v629_v42  ;;  %v1158_v30 = vld [vmem:[#allocation3 + $0x1f8] sm:$0xff]  ;;  %v1157_v45 = vld [vmem:[#allocation3 + $0x1f0] sm:$0xff] }
 0x233   :  { %1615 = vmatmul.mubr.f32.gmra.mrb[54].mxu1 %v1203_v15  ;;  %v1162_v15 = vld [vmem:[#allocation3 + $0x218] sm:$0xff]  ;;  %v1161_v23 = vld [vmem:[#allocation3 + $0x210] sm:$0xff] }
 0x234   :  { %5128 = vmatpush1.bf16.msra.mxu1 %v5127_v32  ;;  %1619 = vmatprep.mubr.f32.mxu1 %v1208_v13  ;;  %v1091_v43 = vmax.f32 %v1013_v10, 0.0  ;;  %v1166_v13 = vld [vmem:[#allocation3 + $0x238] sm:$0xff]  ;;  %v1165_v32 = vld [vmem:[#allocation3 + $0x230] sm:$0xff] }
 0x235   :  { %v1017_v47 = vpop.f32.mrb[122].mxu0  ;;  %5129 = vmatprep.subr.bf16.mxu1 %v5541_v1  ;;  %v1170_v20 = vld [vmem:[#allocation3 + $0x258] sm:$0xff]  ;;  %v1169_v42 = vld [vmem:[#allocation3 + $0x250] sm:$0xff] }
 0x236   :  { %v1018_v52 = vadd.f32 %v1017_v47, %v634_v16  ;;  %v1019_v18 = vpop.f32.mrb[123].mxu0  ;;  %v1174_v10 = vld [vmem:[#allocation3 + $0x278] sm:$0xff]  ;;  %v1177_v47 = vld [vmem:[#allocation3 + $0x290] sm:$0xff] }
 0x237   :  { %1620 = vmatmul.mubr.f32.gmra.mrb[56].mxu1 %v1207_v24  ;;  %v1173_v24 = vld [vmem:[#allocation3 + $0x270] sm:$0xff]  ;;  %v1178_v16 = vld [vmem:[#allocation3 + $0x298] sm:$0xff] }
 0x238   :  { %v1092_v8 = vmax.f32 %v1018_v52, 0.0  ;;  %1624 = vmatprep.mubr.f32.mxu1 %v1212_v26  ;;  %v1182_v26 = vld [vmem:[#allocation3 + $0x2b8] sm:$0xff]  ;;  %v1181_v52 = vld [vmem:[#allocation3 + $0x2b0] sm:$0xff] }
 0x239   :  { %v1022_v22 = vpop.f32.mrb[124].mxu0  ;;  %v1186_v18 = vld [vmem:[#allocation3 + $0x2d8] sm:$0xff] }
 0x23a   :  { %v5130_v29 = vpack.c.bf16 %v1092_v8, %v1091_v43  ;;  %v1024_v38 = vpop.f32.mrb[125].mxu0  ;;  %v1023_v36 = vadd.f32 %v1022_v22, %v639_v55  ;;  %v1185_v43 = vld [vmem:[#allocation3 + $0x2d0] sm:$0xff]  ;;  %v1190_v8 = vld [vmem:[#allocation3 + $0x2f8] sm:$0xff] }
 0x23b   :  { %1625 = vmatmul.mubr.f32.gmra.mrb[58].mxu1 %v1211_v11  ;;  %v1189_v11 = vld [vmem:[#allocation3 + $0x2f0] sm:$0xff]  ;;  %v1194_v22 = vld [vmem:[#allocation3 + $0x318] sm:$0xff] }
 0x23c   :  { %5131 = vmatpush1.bf16.msra.mxu1 %v5130_v29  ;;  %1629 = vmatprep.mubr.f32.mxu1 %v1216_v40  ;;  %v1093_v59 = vmax.f32 %v1023_v36, 0.0  ;;  %v1193_v40 = vld [vmem:[#allocation3 + $0x310] sm:$0xff]  ;;  %v1198_v29 = vld [vmem:[#allocation3 + $0x338] sm:$0xff] }
 0x23d   :  { %v1027_v37 = vpop.f32.mrb[126].mxu0  ;;  %5132 = vmatprep.subr.bf16.mxu1 %v5541_v1  ;;  %v1105_v1 = vld [vmem:[#allocation3 + $0x50] sm:$0xff]  ;;  %v1202_v55 = vld [vmem:[#allocation3 + $0x358] sm:$0xff] }
 0x23e   :  { %v1028_v53 = vadd.f32 %v1027_v37, %v644_v50  ;;  %v1029_v58 = vpop.f32.mrb[127].mxu0  ;;  %v1197_v38 = vld [vmem:[#allocation3 + $0x330] sm:$0xff]  ;;  %v1210_v37 = vld [vmem:[#allocation3 + $0x398] sm:$0xff] }
 0x23f   :  { %1630 = vmatmul.mubr.f32.gmra.mrb[60].mxu1 %v1215_v27  ;;  %v1201_v36 = vld [vmem:[#allocation3 + $0x350] sm:$0xff]  ;;  %v1206_v27 = vld [vmem:[#allocation3 + $0x378] sm:$0xff] }
 0x240   :  { %v1094_v6 = vmax.f32 %v1028_v53, 0.0  ;;  %1634 = vmatprep.mubr.f32.mxu1 %v1220_v28  ;;  %v1205_v50 = vld [vmem:[#allocation3 + $0x370] sm:$0xff]  ;;  %v1214_v53 = vld [vmem:[#allocation3 + $0x3b8] sm:$0xff] }
 0x241   :  { %v1209_v28 = vld [vmem:[#allocation3 + $0x390] sm:$0xff] }
 0x242   :  { %v5133_v54 = vpack.c.bf16 %v1094_v6, %v1093_v59  ;;  %v1213_v58 = vld [vmem:[#allocation3 + $0x3b0] sm:$0xff]  ;;  %v1218_v59 = vld [vmem:[#allocation3 + $0x3d8] sm:$0xff] }
 0x243   :  { %1635 = vmatmul.mubr.f32.gmra.mrb[62].mxu1 %v1219_v9  ;;  %v1217_v6 = vld [vmem:[#allocation3 + $0x3d0] sm:$0xff]  ;;  %v1222_v9 = vld [vmem:[#allocation3 + $0x3f8] sm:$0xff] }
 0x244   :  { %5134 = vmatpush1.bf16.msra.mxu1 %v5133_v54  ;;  %1704 = vmatprep.mubr.f32.mxu1 %v1098_v33  ;;  %v1221_v33 = vld [vmem:[#allocation3 + $0x3f0] sm:$0xff]  ;;  %v6842_v54 = vpop.permute.xlu0 %1337 }
 0x247   :  { %1705 = vmatmul.mubr.f32.vlgmr.msra.gmra.mrb[0].mxu1 %v1097_v3  ;;  %v6844_v3 = vpop.permute.xlu1 %1342 }
 0x248   :  { %1709 = vmatprep.mubr.f32.mxu1 %v1102_v5  ;;  %v1258_v5 = vpop.permute.xlu0 %1257 }
 0x24b   :  { %1710 = vmatmul.mubr.f32.gmra.mrb[2].mxu1 %v1101_v48  ;;  %v1263_v48 = vpop.permute.xlu1 %1262 }
 0x24c   :  { %1714 = vmatprep.mubr.f32.mxu1 %v1106_v44  ;;  %v6846_v44 = vpop.permute.xlu0 %1347 }
 0x24f   :  { %1715 = vmatmul.mubr.f32.gmra.mrb[4].mxu1 %v1105_v1  ;;  %v6848_v1 = vpop.permute.xlu1 %1352 }
 0x250   :  { %1719 = vmatprep.mubr.f32.mxu1 %v1110_v25  ;;  %v1268_v25 = vpop.permute.xlu0 %1267 }
 0x253   :  { %1720 = vmatmul.mubr.f32.gmra.mrb[6].mxu1 %v1109_v57  ;;  %v1273_v57 = vpop.permute.xlu1 %1272 }
 0x254   :  { %1724 = vmatprep.mubr.f32.mxu1 %v1114_v4  ;;  %v6850_v4 = vpop.permute.xlu0 %1357 }
 0x257   :  { %1725 = vmatmul.mubr.f32.gmra.mrb[8].mxu1 %v1113_v7  ;;  %v6852_v7 = vpop.permute.xlu1 %1362 }
 0x258   :  { %1729 = vmatprep.mubr.f32.mxu1 %v1118_v39  ;;  %v1278_v39 = vpop.permute.xlu0 %1277 }
 0x25b   :  { %1730 = vmatmul.mubr.f32.gmra.mrb[10].mxu1 %v1117_v49  ;;  %v1283_v49 = vpop.permute.xlu1 %1282 }
 0x25c   :  { %1734 = vmatprep.mubr.f32.mxu1 %v1122_v35 }
 0x25f   :  { %1735 = vmatmul.mubr.f32.gmra.mrb[12].mxu1 %v1121_v46 }
 0x260   :  { %1739 = vmatprep.mubr.f32.mxu1 %v1126_v56 }
 0x263   :  { %1740 = vmatmul.mubr.f32.gmra.mrb[14].mxu1 %v1125_v2  ;;  %v6854_v2 = vpop.permute.xlu0 %1367 }
 0x264   :  { %1744 = vmatprep.mubr.f32.mxu1 %v1130_v51 }
 0x267   :  { %1745 = vmatmul.mubr.f32.gmra.mrb[16].mxu1 %v1129_v63  ;;  %v1898_v63 = vld [vmem:[%s7574_s14 + $0x8] sm:$0xff] }
 0x268   :  { %1749 = vmatprep.mubr.f32.mxu1 %v1134_v17  ;;  %1993 = vmatprep.mubr.f32.mxu0 %v1898_v63 }
 0x26b   :  { %1750 = vmatmul.mubr.f32.gmra.mrb[18].mxu1 %v1133_v62 }
 0x26c   :  { %1754 = vmatprep.mubr.f32.mxu1 %v1138_v41  ;;  %v6859_v41 = vpop.permute.xlu1 %1372 }
 0x26f   :  { %1755 = vmatmul.mubr.f32.gmra.mrb[20].mxu1 %v1137_v0 }
 0x270   :  { %1759 = vmatprep.mubr.f32.mxu1 %v1142_v12 }
 0x273   :  { %1760 = vmatmul.mubr.f32.gmra.mrb[22].mxu1 %v1141_v14 }
 0x274   :  { %1764 = vmatprep.mubr.f32.mxu1 %v1146_v61 }
 0x277   :  { %1765 = vmatmul.mubr.f32.gmra.mrb[24].mxu1 %v1145_v60 }
 0x278   :  { %1769 = vmatprep.mubr.f32.mxu1 %v1150_v21  ;;  %v1288_v21 = vpop.permute.xlu0 %1287 }
 0x27b   :  { %1770 = vmatmul.mubr.f32.gmra.mrb[26].mxu1 %v1149_v34 }
 0x27c   :  { %1774 = vmatprep.mubr.f32.mxu1 %v1154_v19  ;;  %v1293_v19 = vpop.permute.xlu1 %1292 }
 0x27f   :  { %1775 = vmatmul.mubr.f32.gmra.mrb[28].mxu1 %v1153_v31 }
 0x280   :  { %1779 = vmatprep.mubr.f32.mxu1 %v1158_v30 }
 0x283   :  { %1780 = vmatmul.mubr.f32.gmra.mrb[30].mxu1 %v1157_v45 }
 0x284   :  { %1784 = vmatprep.mubr.f32.mxu1 %v1162_v15 }
 0x287   :  { %1785 = vmatmul.mubr.f32.gmra.mrb[32].mxu1 %v1161_v23 }
 0x288   :  { %1789 = vmatprep.mubr.f32.mxu1 %v1166_v13  ;;  %v6863_v13 = vpop.permute.xlu0 %1377 }
 0x28b   :  { %1790 = vmatmul.mubr.f32.gmra.mrb[34].mxu1 %v1165_v32 }
 0x28c   :  { %1794 = vmatprep.mubr.f32.mxu1 %v1170_v20 }
 0x28f   :  { %1795 = vmatmul.mubr.f32.gmra.mrb[36].mxu1 %v1169_v42 }
 0x290   :  { %1799 = vmatprep.mubr.f32.mxu1 %v1174_v10  ;;  %v6867_v10 = vpop.permute.xlu1 %1382 }
 0x293   :  { %1800 = vmatmul.mubr.f32.gmra.mrb[38].mxu1 %v1173_v24 }
 0x294   :  { %1804 = vmatprep.mubr.f32.mxu1 %v1178_v16 }
 0x297   :  { %1805 = vmatmul.mubr.f32.gmra.mrb[40].mxu1 %v1177_v47 }
 0x298   :  { %1809 = vmatprep.mubr.f32.mxu1 %v1182_v26 }
 0x29b   :  { %1810 = vmatmul.mubr.f32.gmra.mrb[42].mxu1 %v1181_v52  ;;  %v1298_v52 = vpop.permute.xlu0 %1297 }
 0x29c   :  { %1814 = vmatprep.mubr.f32.mxu1 %v1186_v18 }
 0x29f   :  { %1815 = vmatmul.mubr.f32.gmra.mrb[44].mxu1 %v1185_v43 }
 0x2a0   :  { %1819 = vmatprep.mubr.f32.mxu1 %v1190_v8  ;;  %v1303_v8 = vpop.permute.xlu1 %1302 }
 0x2a3   :  { %1820 = vmatmul.mubr.f32.gmra.mrb[46].mxu1 %v1189_v11 }
 0x2a4   :  { %1824 = vmatprep.mubr.f32.mxu1 %v1194_v22 }
 0x2a7   :  { %1825 = vmatmul.mubr.f32.gmra.mrb[48].mxu1 %v1193_v40 }
 0x2a8   :  { %1829 = vmatprep.mubr.f32.mxu1 %v1198_v29 }
 0x2ab   :  { %1830 = vmatmul.mubr.f32.gmra.mrb[50].mxu1 %v1197_v38  ;;  %v6871_v38 = vpop.permute.xlu0 %1387 }
 0x2ac   :  { %1834 = vmatprep.mubr.f32.mxu1 %v1202_v55 }
 0x2af   :  { %1835 = vmatmul.mubr.f32.gmra.mrb[52].mxu1 %v1201_v36 }
 0x2b0   :  { %1839 = vmatprep.mubr.f32.mxu1 %v1206_v27 }
 0x2b3   :  { %1840 = vmatmul.mubr.f32.gmra.mrb[54].mxu1 %v1205_v50  ;;  %v6873_v50 = vpop.permute.xlu1 %1392 }
 0x2b4   :  { %1844 = vmatprep.mubr.f32.mxu1 %v1210_v37 }
 0x2b7   :  { %1845 = vmatmul.mubr.f32.gmra.mrb[56].mxu1 %v1209_v28 }
 0x2b8   :  { %1849 = vmatprep.mubr.f32.mxu1 %v1214_v53 }
 0x2bb   :  { %1850 = vmatmul.mubr.f32.gmra.mrb[58].mxu1 %v1213_v58 }
 0x2bc   :  { %1854 = vmatprep.mubr.f32.mxu1 %v1218_v59 }
 0x2bf   :  { %1855 = vmatmul.mubr.f32.gmra.mrb[60].mxu1 %v1217_v6  ;;  %v1308_v6 = vpop.permute.xlu0 %1307 }
 0x2c0   :  { %1859 = vmatprep.mubr.f32.mxu1 %v1222_v9 }
 0x2c3   :  { %1860 = vmatmul.mubr.f32.gmra.mrb[62].mxu1 %v1221_v33  ;;  %v1313_v33 = vpop.permute.xlu1 %1312 }
 0x31a   :  { %v1706_v35 = vpop.f32.mrb[0].mxu1 }
 0x31b   :  { %v1708_v46 = vpop.f32.mrb[1].mxu1  ;;  %v5247_v56 = vadd.f32 %v1706_v35, %v1258_v5 }
 0x31d   :  { %v1865_v0 = vmax.f32 %v5247_v56, 0.0 }
 0x31e   :  { %v1711_v51 = vpop.f32.mrb[2].mxu1 }
 0x31f   :  { %v5248_v17 = vadd.f32 %v1711_v51, %v1263_v48  ;;  %v1713_v62 = vpop.f32.mrb[3].mxu1  ;;  %v6881_v51 = vpop.permute.xlu1 %1402 }
 0x321   :  { %v1866_v12 = vmax.f32 %v5248_v17, 0.0 }
 0x322   :  { %v1716_v14 = vpop.f32.mrb[4].mxu1 }
 0x323   :  { %v6861_v61 = vpack.c.bf16 %v1866_v12, %v1865_v0  ;;  %v1718_v60 = vpop.f32.mrb[5].mxu1  ;;  %v5249_v34 = vadd.f32 %v1716_v14, %v1268_v25 }
 0x325   :  { %v1867_v15 = vmax.f32 %v5249_v34, 0.0 }
 0x326   :  { %v1721_v31 = vpop.f32.mrb[6].mxu1 }
 0x327   :  { %v5250_v30 = vadd.f32 %v1721_v31, %v1273_v57  ;;  %v1723_v45 = vpop.f32.mrb[7].mxu1 }
 0x329   :  { %v1868_v23 = vmax.f32 %v5250_v30, 0.0 }
 0x32a   :  { %v1726_v32 = vpop.f32.mrb[8].mxu1 }
 0x32b   :  { %v6865_v20 = vpack.c.bf16 %v1868_v23, %v1867_v15  ;;  %v1728_v42 = vpop.f32.mrb[9].mxu1  ;;  %v5251_v24 = vadd.f32 %v1726_v32, %v1278_v39 }
 0x32d   :  { %v1869_v18 = vmax.f32 %v5251_v24, 0.0 }
 0x32e   :  { %v1731_v16 = vpop.f32.mrb[10].mxu1 }
 0x32f   :  { %v5252_v47 = vadd.f32 %v1731_v16, %v1283_v49  ;;  %v1733_v26 = vpop.f32.mrb[11].mxu1  ;;  %v6877_v49 = vpop.permute.xlu0 %1397 }
 0x331   :  { %v1870_v43 = vmax.f32 %v5252_v47, 0.0 }
 0x332   :  { %v1736_v11 = vpop.f32.mrb[12].mxu1 }
 0x333   :  { %v6869_v22 = vpack.c.bf16 %v1870_v43, %v1869_v18  ;;  %v1738_v40 = vpop.f32.mrb[13].mxu1  ;;  %v5253_v29 = vadd.f32 %v1736_v11, %v1288_v21  ;;  %v1318_v12 = vpop.permute.xlu0 %1317 }
 0x334   :  { %v1323_v21 = vpop.permute.xlu1 %1322 }
 0x335   :  { %v1871_v37 = vmax.f32 %v5253_v29, 0.0 }
 0x336   :  { %v1741_v55 = vpop.f32.mrb[14].mxu1 }
 0x337   :  { %v5254_v36 = vadd.f32 %v1741_v55, %v1293_v19  ;;  %v1743_v27 = vpop.f32.mrb[15].mxu1  ;;  %v6885_v45 = vpop.permute.xlu0 %1407 }
 0x338   :  { %v6887_v42 = vpop.permute.xlu1 %1412 }
 0x339   :  { %v1872_v28 = vmax.f32 %v5254_v36, 0.0 }
 0x33a   :  { %v1746_v53 = vpop.f32.mrb[16].mxu1 }
 0x33b   :  { %v6875_v58 = vpack.c.bf16 %v1872_v28, %v1871_v37  ;;  %v1748_v59 = vpop.f32.mrb[17].mxu1  ;;  %v5255_v9 = vadd.f32 %v1746_v53, %v1298_v52  ;;  %v1328_v18 = vpop.permute.xlu0 %1327 }
 0x33d   :  { %v1873_v57 = vmax.f32 %v5255_v9, 0.0 }
 0x33e   :  { %v1751_v5 = vpop.f32.mrb[18].mxu1 }
 0x33f   :  { %v5256_v48 = vadd.f32 %v1751_v5, %v1303_v8  ;;  %v1753_v25 = vpop.f32.mrb[19].mxu1  ;;  %v1333_v8 = vpop.permute.xlu1 %1332 }
 0x341   :  { %v1874_v39 = vmax.f32 %v5256_v48, 0.0 }
 0x342   :  { %v1756_v35 = vpop.f32.mrb[20].mxu1 }
 0x343   :  { %v6879_v46 = vpack.c.bf16 %v1874_v39, %v1873_v57  ;;  %v1758_v56 = vpop.f32.mrb[21].mxu1  ;;  %v5257_v63 = vadd.f32 %v1756_v35, %v1308_v6 }
 0x345   :  { %v1875_v14 = vmax.f32 %v5257_v63, 0.0 }
 0x346   :  { %v1761_v17 = vpop.f32.mrb[22].mxu1 }
 0x347   :  { %v5258_v62 = vadd.f32 %v1761_v17, %v1313_v33  ;;  %v1763_v0 = vpop.f32.mrb[23].mxu1 }
 0x349   :  { %v1876_v60 = vmax.f32 %v5258_v62, 0.0 }
 0x34a   :  { %v1766_v34 = vpop.f32.mrb[24].mxu1 }
 0x34b   :  { %v6883_v19 = vpack.c.bf16 %v1876_v60, %v1875_v14  ;;  %v1768_v31 = vpop.f32.mrb[25].mxu1  ;;  %v5259_v30 = vadd.f32 %v1766_v34, %v1318_v12 }
 0x34d   :  { %v1877_v24 = vmax.f32 %v5259_v30, 0.0 }
 0x34e   :  { %v1771_v15 = vpop.f32.mrb[26].mxu1 }
 0x34f   :  { %v5260_v23 = vadd.f32 %v1771_v15, %v1323_v21  ;;  %v1773_v32 = vpop.f32.mrb[27].mxu1 }
 0x351   :  { %v1878_v16 = vmax.f32 %v5260_v23, 0.0 }
 0x352   :  { %v1776_v47 = vpop.f32.mrb[28].mxu1 }
 0x353   :  { %v6889_v26 = vpack.c.bf16 %v1878_v16, %v1877_v24  ;;  %v1778_v52 = vpop.f32.mrb[29].mxu1  ;;  %v5261_v43 = vadd.f32 %v1776_v47, %v1328_v18 }
 0x355   :  { %v1879_v55 = vmax.f32 %v5261_v43, 0.0 }
 0x356   :  { %v1781_v11 = vpop.f32.mrb[30].mxu1 }
 0x357   :  { %v5262_v40 = vadd.f32 %v1781_v11, %v1333_v8  ;;  %v1783_v29 = vpop.f32.mrb[31].mxu1 }
 0x359   :  { %v1880_v36 = vmax.f32 %v5262_v40, 0.0 }
 0x35a   :  { %v1786_v27 = vpop.f32.mrb[32].mxu1 }
 0x35b   :  { %v6891_v37 = vpack.c.bf16 %v1880_v36, %v1879_v55  ;;  %v1788_v28 = vpop.f32.mrb[33].mxu1  ;;  %v5263_v53 = vadd.f32 %v1786_v27, %v6842_v54 }
 0x35d   :  { %v1881_v33 = vmax.f32 %v5263_v53, 0.0 }
 0x35e   :  { %v1791_v59 = vpop.f32.mrb[34].mxu1 }
 0x35f   :  { %v5264_v6 = vadd.f32 %v1791_v59, %v6844_v3  ;;  %v1793_v9 = vpop.f32.mrb[35].mxu1 }
 0x361   :  { %v1882_v5 = vmax.f32 %v5264_v6, 0.0 }
 0x362   :  { %v1796_v48 = vpop.f32.mrb[36].mxu1 }
 0x363   :  { %v5135_v25 = vpack.c.bf16 %v1882_v5, %v1881_v33  ;;  %v1798_v57 = vpop.f32.mrb[37].mxu1  ;;  %v5265_v39 = vadd.f32 %v1796_v48, %v6846_v44 }
 0x365   :  { %5136 = vmatprep.subr.bf16.mxu0 %v5135_v25  ;;  %v1883_v17 = vmax.f32 %v5265_v39, 0.0 }
 0x366   :  { %v1801_v35 = vpop.f32.mrb[38].mxu1  ;;  %5138 = vmatpush3.bf16.msra.mxu0 %v6861_v61 }
 0x367   :  { %v5266_v56 = vadd.f32 %v1801_v35, %v6848_v1  ;;  %v1803_v63 = vpop.f32.mrb[39].mxu1 }
 0x368   :  { %v1903_v63 = vld [vmem:[%s7574_s14 + $0x30] sm:$0xff] }
 0x369   :  { %v1884_v54 = vmax.f32 %v5266_v56, 0.0  ;;  %v1904_v56 = vld [vmem:[%s7574_s14 + $0x38] sm:$0xff] }
 0x36a   :  { %v1806_v62 = vpop.f32.mrb[40].mxu1 }
 0x36b   :  { %v5139_v0 = vpack.c.bf16 %v1884_v54, %v1883_v17  ;;  %v1808_v3 = vpop.f32.mrb[41].mxu1  ;;  %v5267_v12 = vadd.f32 %v1806_v62, %v6850_v4  ;;  %v2014_v17 = vld [vmem:[%s7575_s22] sm:$0xff] }
 0x36c   :  { %4773 = vmatprep.mubr.msk.f32.mxu1 %vm2070_vm0, %v2014_v17 }
 0x36d   :  { %5140 = vmatprep.subr.bf16.mxu0 %v5139_v0  ;;  %v1885_v21 = vmax.f32 %v5267_v12, 0.0 }
 0x36e   :  { %v1811_v14 = vpop.f32.mrb[42].mxu1  ;;  %5142 = vmatpush3.bf16.msra.mxu0 %v6865_v20 }
 0x36f   :  { %v5268_v44 = vadd.f32 %v1811_v14, %v6852_v7  ;;  %v1813_v60 = vpop.f32.mrb[43].mxu1 }
 0x370   :  { %v1912_v60 = vpop.permute.xlu0 %1911 }
 0x371   :  { %v1886_v34 = vmax.f32 %v5268_v44, 0.0  ;;  %v1917_v44 = vpop.permute.xlu1 %1916 }
 0x372   :  { %v1816_v61 = vpop.f32.mrb[44].mxu1 }
 0x373   :  { %v5143_v31 = vpack.c.bf16 %v1886_v34, %v1885_v21  ;;  %v1818_v1 = vpop.f32.mrb[45].mxu1  ;;  %v5269_v30 = vadd.f32 %v1816_v61, %v6854_v2 }
 0x375   :  { %5144 = vmatprep.subr.bf16.mxu0 %v5143_v31  ;;  %v1887_v32 = vmax.f32 %v5269_v30, 0.0 }
 0x376   :  { %v1821_v15 = vpop.f32.mrb[46].mxu1  ;;  %5146 = vmatpush3.bf16.msra.mxu0 %v6869_v22 }
 0x377   :  { %v5270_v4 = vadd.f32 %v1821_v15, %v6859_v41  ;;  %v1823_v23 = vpop.f32.mrb[47].mxu1 }
 0x379   :  { %v1888_v24 = vmax.f32 %v5270_v4, 0.0 }
 0x37a   :  { %v1826_v20 = vpop.f32.mrb[48].mxu1 }
 0x37b   :  { %v5147_v16 = vpack.c.bf16 %v1888_v24, %v1887_v32  ;;  %v1828_v7 = vpop.f32.mrb[49].mxu1  ;;  %v5271_v47 = vadd.f32 %v1826_v20, %v6863_v13  ;;  %v1927_v32 = vpop.permute.xlu1 %1926 }
 0x37c   :  { %v1922_v24 = vpop.permute.xlu0 %1921 }
 0x37d   :  { %5148 = vmatprep.subr.bf16.mxu0 %v5147_v16  ;;  %v1889_v43 = vmax.f32 %v5271_v47, 0.0  ;;  %v2015_v47 = vld [vmem:[%s7575_s22 + $0x8] sm:$0xff] }
 0x37e   :  { %v1831_v52 = vpop.f32.mrb[50].mxu1  ;;  %5150 = vmatpush3.bf16.msra.mxu0 %v6875_v58 }
 0x37f   :  { %v5272_v2 = vadd.f32 %v1831_v52, %v6867_v10  ;;  %v1833_v18 = vpop.f32.mrb[51].mxu1  ;;  %v2016_v52 = vld [vmem:[%s7575_s22 + $0x10] sm:$0xff] }
 0x380   :  { %v2018_v18 = vld [vmem:[%s7575_s22 + $0x20] sm:$0xff] }
 0x381   :  { %v1890_v8 = vmax.f32 %v5272_v2, 0.0  ;;  %v2017_v2 = vld [vmem:[%s7575_s22 + $0x18] sm:$0xff] }
 0x382   :  { %v1836_v22 = vpop.f32.mrb[52].mxu1 }
 0x383   :  { %v5151_v11 = vpack.c.bf16 %v1890_v8, %v1889_v43  ;;  %v1838_v41 = vpop.f32.mrb[53].mxu1  ;;  %v5273_v40 = vadd.f32 %v1836_v22, %v6871_v38  ;;  %v2019_v43 = vld [vmem:[%s7575_s22 + $0x28] sm:$0xff]  ;;  %v2020_v8 = vld [vmem:[%s7575_s22 + $0x30] sm:$0xff]  ;;  %v2021_v22 = vld [vmem:[%s7575_s22 + $0x38] sm:$0xff] }
 0x384   :  { %v2038_v41 = vpop.permute.xlu1 %2037 }
 0x385   :  { %5152 = vmatprep.subr.bf16.mxu0 %v5151_v11  ;;  %v1891_v36 = vmax.f32 %v5273_v40, 0.0  ;;  %v2208_v11 = vld [vmem:[%s7576_s1] sm:$0xff]  ;;  %v2033_v40 = vpop.permute.xlu0 %2032 }
 0x386   :  { %v1841_v29 = vpop.f32.mrb[54].mxu1  ;;  %5154 = vmatpush3.bf16.msra.mxu0 %v6879_v46 }
 0x387   :  { %v5274_v13 = vadd.f32 %v1841_v29, %v6873_v50  ;;  %v1843_v55 = vpop.f32.mrb[55].mxu1 }
 0x388   :  { %v2048_v29 = vpop.permute.xlu1 %2047 }
 0x389   :  { %v1892_v27 = vmax.f32 %v5274_v13, 0.0  ;;  %v2043_v55 = vpop.permute.xlu0 %2042 }
 0x38a   :  { %v1846_v58 = vpop.f32.mrb[56].mxu1 }
 0x38b   :  { %v5155_v28 = vpack.c.bf16 %v1892_v27, %v1891_v36  ;;  %v1848_v10 = vpop.f32.mrb[57].mxu1  ;;  %v5275_v53 = vadd.f32 %v1846_v58, %v6877_v49 }
 0x38d   :  { %5156 = vmatprep.subr.bf16.mxu0 %v5155_v28  ;;  %v1893_v9 = vmax.f32 %v5275_v53, 0.0 }
 0x38e   :  { %v1851_v59 = vpop.f32.mrb[58].mxu1  ;;  %5158 = vmatpush3.bf16.msra.mxu0 %v6883_v19 }
 0x38f   :  { %v5276_v38 = vadd.f32 %v1851_v59, %v6881_v51  ;;  %v1853_v6 = vpop.f32.mrb[59].mxu1  ;;  %v1897_v51 = vld [vmem:[%s7574_s14] sm:$0xff] }
 0x390   :  { %v2058_v6 = vpop.permute.xlu1 %2057 }
 0x391   :  { %v1894_v33 = vmax.f32 %v5276_v38, 0.0 }
 0x392   :  { %v1856_v46 = vpop.f32.mrb[60].mxu1 }
 0x393   :  { %v5159_v5 = vpack.c.bf16 %v1894_v33, %v1893_v9  ;;  %v1858_v50 = vpop.f32.mrb[61].mxu1  ;;  %v5277_v48 = vadd.f32 %v1856_v46, %v6885_v45  ;;  %v1900_v45 = vld [vmem:[%s7574_s14 + $0x18] sm:$0xff]  ;;  %v2053_v46 = vpop.permute.xlu0 %2052 }
 0x395   :  { %5160 = vmatprep.subr.bf16.mxu0 %v5159_v5  ;;  %v1895_v39 = vmax.f32 %v5277_v48, 0.0 }
 0x396   :  { %v1861_v25 = vpop.f32.mrb[62].mxu1  ;;  %5162 = vmatpush3.bf16.msra.mxu0 %v6889_v26  ;;  %v1902_v26 = vld [vmem:[%s7574_s14 + $0x28] sm:$0xff] }
 0x397   :  { %v5278_v49 = vadd.f32 %v1861_v25, %v6887_v42  ;;  %v1863_v57 = vpop.f32.mrb[63].mxu1  ;;  %v1899_v42 = vld [vmem:[%s7574_s14 + $0x10] sm:$0xff] }
 0x399   :  { %v1896_v35 = vmax.f32 %v5278_v49, 0.0 }
 0x39b   :  { %v5163_v19 = vpack.c.bf16 %v1896_v35, %v1895_v39 }
 0x39d   :  { %5164 = vmatprep.subr.bf16.mxu0 %v5163_v19  ;;  %v2068_v19 = vpop.permute.xlu1 %2067 }
 0x39e   :  { %5166 = vmatpush3.bf16.msra.mxu0 %v6891_v37  ;;  %v1901_v37 = vld [vmem:[%s7574_s14 + $0x20] sm:$0xff] }
 0x3a1   :  { %1994 = vmatmul.mubr.f32.vlgmr.msra.gmra.mrb[128].mxu0 %v1897_v51 }
 0x3a2   :  { %1998 = vmatprep.mubr.f32.mxu0 %v1900_v45 }
 0x3a5   :  { %1999 = vmatmul.mubr.f32.gmra.mrb[130].mxu0 %v1899_v42  ;;  %v2063_v42 = vpop.permute.xlu0 %2062 }
 0x3a6   :  { %2003 = vmatprep.mubr.f32.mxu0 %v1902_v26 }
 0x3a9   :  { %2004 = vmatmul.mubr.f32.gmra.mrb[132].mxu0 %v1901_v37 }
 0x3aa   :  { %2008 = vmatprep.mubr.f32.mxu0 %v1904_v56 }
 0x3ad   :  { %2009 = vmatmul.mubr.f32.gmra.mrb[134].mxu0 %v1903_v63 }
 0x3ae   :  { %4801 = vmatprep.mubr.msk.f32.mxu0 %vm2236_vm1, %v2208_v11  ;;  %v7061_v11 = vld [vmem:[%s7510_s15 + $0x28] sm:$0xff] }
 0x474   :  { %v4622_v54 = vpop.f32.mrb[128].mxu0 }
 0x475   :  { %v4623_v62 = vpop.f32.mrb[129].mxu0 }
 0x476   :  { %v4624_v0 = vadd.f32 %v4623_v62, %v4622_v54 }
 0x478   :  { %v4625_v3 = vpop.f32.mrb[130].mxu0  ;;  %v1996_v21 = vadd.f32 %v4624_v0, %v1912_v60  ;;  %v6985_v0 = vld [vmem:[%s7507_s12] sm:$0x3]  ;;  %v2219_v60 = vpop.permute.xlu0 %2218 }
 0x479   :  { %v4626_v12 = vpop.f32.mrb[131].mxu0 }
 0x47a   :  { %v4627_v14 = vadd.f32 %v4626_v12, %v4625_v3  ;;  %v2209_v3 = vld [vmem:[%s7576_s1 + $0x8] sm:$0xff]  ;;  %v2210_v12 = vld [vmem:[%s7576_s1 + $0x10] sm:$0xff] }
 0x47c   :  { %v2001_v34 = vadd.f32 %v4627_v14, %v1917_v44  ;;  %v4628_v61 = vpop.f32.mrb[132].mxu0  ;;  %v2211_v14 = vld [vmem:[%s7576_s1 + $0x18] sm:$0xff]  ;;  %v2224_v44 = vpop.permute.xlu1 %2223 }
 0x47d   :  { %v4629_v31 = vpop.f32.mrb[133].mxu0 }
 0x47e   :  { %v6942_v1 = vpack.c.bf16 %v2001_v34, %v1996_v21  ;;  %v4630_v30 = vadd.f32 %v4629_v31, %v4628_v61  ;;  %v2229_v34 = vpop.permute.xlu0 %2228 }
 0x480   :  { %v4631_v15 = vpop.f32.mrb[134].mxu0  ;;  %5168 = vmatprep.subr.bf16.mxu1 %v6942_v1  ;;  %v2006_v20 = vadd.f32 %v4630_v30, %v1922_v24  ;;  %v2234_v21 = vpop.permute.xlu1 %2233 }
 0x481   :  { %v4632_v4 = vpop.f32.mrb[135].mxu0  ;;  %5170 = vmatpush3.bf16.msra.mxu1 %v6942_v1 }
 0x482   :  { %v4633_v23 = vadd.f32 %v4632_v4, %v4631_v15 }
 0x484   :  { %v2011_v16 = vadd.f32 %v4633_v23, %v1927_v32  ;;  %v7004_v15 = vpop.permute.xlu1 %2502  ;;  %v7006_v23 = vpop.permute.xlu0 %2497 }
 0x486   :  { %v6946_v7 = vpack.c.bf16 %v2011_v16, %v2006_v20 }
 0x488   :  { %5172 = vmatprep.subr.bf16.mxu1 %v6946_v7 }
 0x489   :  { %5174 = vmatpush3.bf16.msra.mxu1 %v6946_v7 }
 0x48c   :  { %4774 = vmatmul.mubr.msk.f32.vlgmr.msra.gmra.mrb[64].mxu1 %vm2070_vm0, %v2015_v47  ;;  %v7015_v47 = vld [vmem:[%s7510_s15] sm:$0xff] }
 0x48d   :  { %4776 = vmatprep.mubr.msk.f32.mxu1 %vm2070_vm0, %v2016_v52  ;;  %v5199_v52 = vpack.c.bf16 %v7004_v15, %v7006_v23 }
 0x490   :  { %4777 = vmatmul.mubr.msk.f32.gmra.mrb[66].mxu1 %vm2070_vm0, %v2017_v2  ;;  %v7021_v2 = vpop.permute.xlu1 %2512 }
 0x491   :  { %4779 = vmatprep.mubr.msk.f32.mxu1 %vm2070_vm0, %v2018_v18  ;;  %v7023_v18 = vpop.permute.xlu0 %2507 }
 0x494   :  { %4780 = vmatmul.mubr.msk.f32.gmra.mrb[68].mxu1 %vm2070_vm0, %v2019_v43  ;;  %v7036_v43 = vld [vmem:[%s7510_s15 + $0x10] sm:$0xff] }
 0x495   :  { %4782 = vmatprep.mubr.msk.f32.mxu1 %vm2070_vm0, %v2020_v8  ;;  %v5203_v8 = vpack.c.bf16 %v7021_v2, %v7023_v18 }
 0x498   :  { %4783 = vmatmul.mubr.msk.f32.gmra.mrb[70].mxu1 %vm2070_vm0, %v2021_v22  ;;  %v7052_v22 = vld [vmem:[%s7510_s15 + $0x20] sm:$0xff] }
 0x55f   :  { %v4775_v13 = vpop.f32.mrb[64].mxu1 }
 0x560   :  { %v2167_v36 = vadd.f32 %v4775_v13, %v2038_v41  ;;  %v2161_v27 = vpop.f32.mrb[65].mxu1  ;;  %v7066_v41 = vld [vmem:[%s7510_s15 + $0x30] sm:$0xff]  ;;  %v7089_v13 = vld [vmem:[%s7510_s15 + $0x48] sm:$0xff] }
 0x561   :  { %v2162_v58 = vadd.f32 %v2161_v27, %v2033_v40  ;;  %v7075_v40 = vld [vmem:[%s7510_s15 + $0x38] sm:$0xff]  ;;  %v7108_v27 = vld [vmem:[%s7511_s16] sm:$0xff] }
 0x562   :  { %v2201_v28 = vmax.f32 %v2167_v36, 0.0  ;;  %v7103_v36 = vld [vmem:[%s7510_s15 + $0x58] sm:$0xff] }
 0x563   :  { %v2200_v10 = vmax.f32 %v2162_v58, 0.0  ;;  %v4778_v53 = vpop.f32.mrb[66].mxu1  ;;  %v7117_v58 = vld [vmem:[%s7511_s16 + $0x8] sm:$0xff] }
 0x564   :  { %v2177_v59 = vadd.f32 %v4778_v53, %v2048_v29  ;;  %v2171_v38 = vpop.f32.mrb[67].mxu1  ;;  %v7080_v29 = vld [vmem:[%s7510_s15 + $0x40] sm:$0xff] }
 0x565   :  { %v5175_v9 = vpack.c.bf16 %v2201_v28, %v2200_v10  ;;  %v2172_v33 = vadd.f32 %v2171_v38, %v2043_v55  ;;  %v7094_v55 = vld [vmem:[%s7510_s15 + $0x50] sm:$0xff]  ;;  %v7131_v10 = vld [vmem:[%s7511_s16 + $0x18] sm:$0xff]  ;;  %v7136_v53 = vld [vmem:[%s7511_s16 + $0x20] sm:$0xff] }
 0x566   :  { %v2203_v5 = vmax.f32 %v2177_v59, 0.0  ;;  %v7122_v28 = vld [vmem:[%s7511_s16 + $0x10] sm:$0xff]  ;;  %v7145_v59 = vld [vmem:[%s7511_s16 + $0x28] sm:$0xff] }
 0x567   :  { %v2202_v50 = vmax.f32 %v2172_v33, 0.0  ;;  %v4781_v48 = vpop.f32.mrb[68].mxu1  ;;  %5176 = vmatprep.subr.bf16.mxu0 %v5175_v9  ;;  %v7150_v38 = vld [vmem:[%s7511_s16 + $0x30] sm:$0xff]  ;;  %v7173_v33 = vld [vmem:[%s7511_s16 + $0x48] sm:$0xff] }
 0x568   :  { %v2187_v25 = vadd.f32 %v4781_v48, %v2058_v6  ;;  %v2181_v49 = vpop.f32.mrb[69].mxu1  ;;  %5178 = vmatpush3.bf16.msra.mxu0 %v5175_v9  ;;  %v7159_v6 = vld [vmem:[%s7511_s16 + $0x38] sm:$0xff]  ;;  %v7164_v9 = vld [vmem:[%s7511_s16 + $0x40] sm:$0xff]  ;;  %v2439_v48 = vlaneseq }
 0x569   :  { %v5179_v57 = vpack.c.bf16 %v2203_v5, %v2202_v50  ;;  %v2182_v39 = vadd.f32 %v2181_v49, %v2053_v46  ;;  %v7178_v46 = vld [vmem:[%s7511_s16 + $0x50] sm:$0xff]  ;;  %v7187_v5 = vld [vmem:[%s7511_s16 + $0x58] sm:$0xff]  ;;  %v3089_v50 = vld [vmem:[%s7514_s19] sm:$0xff] }
 0x56a   :  { %v2205_v35 = vmax.f32 %v2187_v25, 0.0  ;;  %4875 = vmatprep.mubr.msk.f32.mxu1 %vm2070_vm0, %v3089_v50  ;;  %v7195_v25 = vshrl.u32 %v2439_v48, 7 }
 0x56b   :  { %v2204_v51 = vmax.f32 %v2182_v39, 0.0  ;;  %v4784_v45 = vpop.f32.mrb[70].mxu1  ;;  %5180 = vmatprep.subr.bf16.mxu0 %v5179_v57 }
 0x56c   :  { %v2197_v26 = vadd.f32 %v4784_v45, %v2068_v19  ;;  %v2191_v37 = vpop.f32.mrb[71].mxu1  ;;  %5182 = vmatpush3.bf16.msra.mxu0 %v5179_v57  ;;  %v2446_v49 = vsub.s32 1, %v7195_v25  ;;  %v2438_v57 = vld [vmem:[%s7577_s25] sm:$0x3]  ;;  %v2441_v39 = vsub.s32 0, %v7195_v25  ;;  %v2547_v19 = vpop.permute.xlu1 %2546  ;;  %vm2483_vm8 = vcmp.lt.s32.totalorder %v7195_v25, 4 }
 0x56d   :  { %v5183_v56 = vpack.c.bf16 %v2205_v35, %v2204_v51  ;;  %v2192_v63 = vadd.f32 %v2191_v37, %v2063_v42  ;;  %v2542_v45 = vpop.permute.xlu0 %2541 }
 0x56e   :  { %v2207_v17 = vmax.f32 %v2197_v26, 0.0  ;;  %v2447_v35 = vrot.slane %v2438_v57, %v2446_v49  ;;  %v2442_v51 = vrot.slane %v2438_v57, %v2441_v39 }
 0x56f   :  { %v2206_v54 = vmax.f32 %v2192_v63, 0.0  ;;  %5184 = vmatprep.subr.bf16.mxu0 %v5183_v56 }
 0x570   :  { %5186 = vmatpush3.bf16.msra.mxu0 %v5183_v56 }
 0x571   :  { %v5187_v62 = vpack.c.bf16 %v2207_v17, %v2206_v54  ;;  %v2792_v17 = vpop.permute.xlu1 %2791 }
 0x573   :  { %5188 = vmatprep.subr.bf16.mxu0 %v5187_v62 }
 0x574   :  { %5190 = vmatpush3.bf16.msra.mxu0 %v5187_v62 }
 0x575   :  { %4807 = vmatprep.subr.msk.mxu0 %vm2347_vm2, %v6985_v0 }
 0x577   :  { %4802 = vmatmul.mubr.msk.f32.vlgmr.msra.gmra.mrb[136].mxu0 %vm2236_vm1, %v2209_v3  ;;  %v2787_v3 = vpop.permute.xlu0 %2786 }
 0x578   :  { %4808 = vmatpush3.msk.msra.mxu0 %vm2347_vm2, %v6985_v0  ;;  %4804 = vmatprep.mubr.msk.f32.mxu0 %vm2236_vm1, %v2210_v12 }
 0x579   :  { %5192 = vmatprep.subr.bf16.mxu0 %v6942_v1 }
 0x57b   :  { %4805 = vmatmul.mubr.msk.f32.gmra.mrb[138].mxu0 %vm2236_vm1, %v2211_v14 }
 0x64a   :  { %v4803_v61 = vpop.f32.mrb[136].mxu0 }
 0x64b   :  { %v2315_v31 = vpop.f32.mrb[137].mxu0  ;;  %v2321_v4 = vadd.f32 %v4803_v61, %v2224_v44 }
 0x64c   :  { %v2316_v30 = vadd.f32 %v2315_v31, %v2219_v60 }
 0x64e   :  { %v4806_v32 = vpop.f32.mrb[138].mxu0  ;;  %4809 = vmatprep.mubr.msk.f32.mxu0 %vm2334_vm3, %v2316_v30 }
 0x64f   :  { %v2325_v24 = vpop.f32.mrb[139].mxu0  ;;  %4810 = vmatmul.mubr.msk.f32.vlgmr.msra.gmra.mrb[140].mxu0 %vm2334_vm3, %v2321_v4  ;;  %v2331_v16 = vadd.f32 %v4806_v32, %v2234_v21  ;;  %v2557_v32 = vpop.permute.xlu1 %2556 }
 0x650   :  { %v2326_v20 = vadd.f32 %v2325_v24, %v2229_v34  ;;  %5194 = vmatpush3.bf16.msra.mxu0 %v6942_v1  ;;  %v7031_v1 = vld [vmem:[%s7510_s15 + $0x8] sm:$0xff]  ;;  %v2552_v24 = vpop.permute.xlu0 %2551 }
 0x651   :  { %5196 = vmatprep.subr.bf16.mxu0 %v6946_v7 }
 0x652   :  { %4812 = vmatprep.mubr.msk.f32.mxu0 %vm2334_vm3, %v2326_v20 }
 0x653   :  { %4813 = vmatmul.mubr.msk.f32.gmra.mrb[142].mxu0 %vm2334_vm3, %v2331_v16  ;;  %v2802_v48 = vpop.permute.xlu1 %2801 }
 0x654   :  { %5198 = vmatpush3.bf16.msra.mxu0 %v6946_v7  ;;  %4823 = vmatprep.mubr.msk.f32.mxu0 %vm2070_vm0, %v7015_v47  ;;  %v7047_v7 = vld [vmem:[%s7510_s15 + $0x18] sm:$0xff]  ;;  %v2797_v49 = vpop.permute.xlu0 %2796 }
 0x655   :  { %5200 = vmatprep.subr.bf16.mxu0 %v5199_v52 }
 0x657   :  { %4824 = vmatmul.mubr.msk.f32.vlgmr.msra.gmra.mrb[144].mxu0 %vm2070_vm0, %v7031_v1 }
 0x658   :  { %5202 = vmatpush3.bf16.msra.mxu0 %v5199_v52  ;;  %4826 = vmatprep.mubr.msk.f32.mxu0 %vm2070_vm0, %v7036_v43 }
 0x659   :  { %5204 = vmatprep.subr.bf16.mxu0 %v5203_v8 }
 0x65b   :  { %4827 = vmatmul.mubr.msk.f32.gmra.mrb[146].mxu0 %vm2070_vm0, %v7047_v7 }
 0x65c   :  { %5206 = vmatpush3.bf16.msra.mxu0 %v5203_v8  ;;  %4829 = vmatprep.mubr.msk.f32.mxu0 %vm2070_vm0, %v7052_v22 }
 0x65f   :  { %4830 = vmatmul.mubr.msk.f32.gmra.mrb[148].mxu0 %vm2070_vm0, %v7061_v11 }
 0x660   :  { %4832 = vmatprep.mubr.msk.f32.mxu0 %vm2070_vm0, %v7066_v41 }
 0x663   :  { %4833 = vmatmul.mubr.msk.f32.gmra.mrb[150].mxu0 %vm2070_vm0, %v7075_v40 }
 0x664   :  { %4835 = vmatprep.mubr.msk.f32.mxu0 %vm2070_vm0, %v7080_v29 }
 0x667   :  { %4836 = vmatmul.mubr.msk.f32.gmra.mrb[152].mxu0 %vm2070_vm0, %v7089_v13 }
 0x668   :  { %4838 = vmatprep.mubr.msk.f32.mxu0 %vm2070_vm0, %v7094_v55 }
 0x66b   :  { %4839 = vmatmul.mubr.msk.f32.gmra.mrb[154].mxu0 %vm2070_vm0, %v7103_v36 }
 0x66c   :  { %4849 = vmatprep.mubr.msk.f32.mxu0 %vm2070_vm0, %v7108_v27 }
 0x66f   :  { %4850 = vmatmul.mubr.msk.f32.vlgmr.msra.gmra.mrb[144].mxu0 %vm2070_vm0, %v7117_v58 }
 0x670   :  { %4852 = vmatprep.mubr.msk.f32.mxu0 %vm2070_vm0, %v7122_v28 }
 0x673   :  { %4853 = vmatmul.mubr.msk.f32.gmra.mrb[146].mxu0 %vm2070_vm0, %v7131_v10 }
 0x674   :  { %4855 = vmatprep.mubr.msk.f32.mxu0 %vm2070_vm0, %v7136_v53 }
 0x677   :  { %4856 = vmatmul.mubr.msk.f32.gmra.mrb[148].mxu0 %vm2070_vm0, %v7145_v59 }
 0x678   :  { %4858 = vmatprep.mubr.msk.f32.mxu0 %vm2070_vm0, %v7150_v38 }
 0x67b   :  { %4859 = vmatmul.mubr.msk.f32.gmra.mrb[150].mxu0 %vm2070_vm0, %v7159_v6 }
 0x67c   :  { %4861 = vmatprep.mubr.msk.f32.mxu0 %vm2070_vm0, %v7164_v9 }
 0x67f   :  { %4862 = vmatmul.mubr.msk.f32.gmra.mrb[156].mxu0 %vm2070_vm0, %v7173_v33 }
 0x680   :  { %4864 = vmatprep.mubr.msk.f32.mxu0 %vm2070_vm0, %v7178_v46 }
 0x683   :  { %4865 = vmatmul.mubr.msk.f32.gmra.mrb[158].mxu0 %vm2070_vm0, %v7187_v5 }
 0x722   :  { %v4811_v42 = vpop.f32.mrb[140].mxu0 }
 0x723   :  { %v2448_v26 = vsub.f32 %v2447_v35, %v4811_v42  ;;  %v2417_v37 = vpop.f32.mrb[141].mxu0 }
 0x724   :  { %v2443_v56 = vsub.f32 %v2442_v51, %v2417_v37  ;;  %v2567_v51 = vpop.permute.xlu1 %2566 }
 0x725   :  { %v2450_v63 = vmul.f32 %v2448_v26, %v2448_v26  ;;  %v2463_v12 = vand.u32 2147483647, %v2448_v26  ;;  %v2562_v26 = vpop.permute.xlu0 %2561 }
 0x726   :  { %v2449_v54 = vmul.f32 %v2443_v56, %v2443_v56  ;;  %v4814_v62 = vpop.f32.mrb[142].mxu0  ;;  %v2461_v21 = vand.u32 2147483647, %v2443_v56 }
 0x727   :  { %v2437_v14 = vand.u32 2147483647, %v4814_v62  ;;  %v2427_v44 = vpop.f32.mrb[143].mxu0 }
 0x728   :  { %v2451_v60 = vadd.f32 %v2450_v63, %v2449_v54  ;;  %v2436_v34 = vand.u32 2147483647, %v2427_v44 }
 0x729   :  { %v2464_v61 = vsub.f32 %v2463_v12, %v2437_v14  ;;  %v2812_v12 = vpop.permute.xlu1 %2811 }
 0x72a   :  { %v2452_v31 = vadd.f32 1e-12, %v2451_v60  ;;  %v2462_v30 = vsub.f32 %v2461_v21, %v2436_v34  ;;  %v2807_v60 = vpop.permute.xlu0 %2806 }
 0x72b   :  { %v2467_v4 = vmax.f32 %v2464_v61, 0.0 }
 0x72c   :  { %5400 = vrsqrt.f32 %v2452_v31  ;;  %v2465_v16 = vmax.f32 %v2462_v30, 0.0  ;;  %v2478_v52 = vmax.f32 %v2462_v30, %v2464_v61  ;;  %vm2455_vm4 = vcmp.eq.f32.partialorder %v2452_v31, inf }
 0x72d   :  { %v2468_v20 = vmul.f32 %v2467_v4, %v2467_v4  ;;  %v2458_v42 = vand.u32 2147483648, %v2452_v31  ;;  %vm2457_vm5 = vcmp.eq.f32.partialorder %v2452_v31, 0.0  ;;  %v7210_v30 = vadd.f32 %v2792_v17, %v2547_v19 }
 0x72e   :  { %v2466_v8 = vmul.f32 %v2465_v16, %v2465_v16  ;;  %v2479_v16 = vmin.f32 %v2478_v52, 0.0  ;;  %v7217_v19 = vadd.f32 %v2802_v48, %v2557_v32  ;;  %v2572_v17 = vpop.permute.xlu0 %2571  ;;  %v7227_v32 = vadd.f32 %v2807_v60, %v2562_v26 }
 0x730   :  { %v2469_v50 = vadd.f32 %v2468_v20, %v2466_v8  ;;  %v7212_v20 = vadd.f32 %v2787_v3, %v2542_v45  ;;  %v7219_v45 = vadd.f32 %v2797_v49, %v2552_v24  ;;  %7579 = vst [vmem:[#allocation7_spill] sm:$0xff] %v7227_v32 }
 0x732   :  { %v2470_v57 = vadd.f32 1e-12, %v2469_v50  ;;  %v2817_v49 = vpop.permute.xlu0 %2816 }
 0x734   :  { %5402 = vrsqrt.f32 %v2470_v57  ;;  %vm2473_vm6 = vcmp.eq.f32.partialorder %v2470_v57, inf  ;;  %v2476_v4 = vand.u32 2147483648, %v2470_v57  ;;  %vm2475_vm7 = vcmp.eq.f32.partialorder %v2470_v57, 0.0 }
 0x736   :  { %v5401_v39 = vpop.eup %5400 }
 0x737   :  { %v2454_v35 = vmul.f32 %v5401_v39, %v2452_v31 }
 0x739   :  { %v2456_v37 = vsel %vm2455_vm4, %v2452_v31, %v2454_v35  ;;  %v2577_v35 = vpop.permute.xlu1 %2576 }
 0x73a   :  { %v2459_v56 = vsel %vm2457_vm5, %v2458_v42, %v2456_v37  ;;  %v7202_v63 = vpop.f32.mrb[152].mxu0 }
 0x73b   :  { %v2460_v54 = vsub.f32 %v2459_v56, %v2436_v34  ;;  %v7204_v62 = vpop.f32.mrb[153].mxu0 }
 0x73d   :  { %v2822_v48 = vpop.permute.xlu1 %2821 }
 0x73e   :  { %v7206_v14 = vpop.f32.mrb[154].mxu0  ;;  %v5403_v44 = vpop.eup %5402 }
 0x73f   :  { %v7208_v21 = vpop.f32.mrb[155].mxu0  ;;  %v2472_v61 = vmul.f32 %v5403_v44, %v2470_v57 }
 0x741   :  { %v2474_v31 = vsel %vm2473_vm6, %v2470_v57, %v2472_v61 }
 0x742   :  { %v4851_v34 = vpop.f32.mrb[144].mxu0  ;;  %v2477_v8 = vsel %vm2475_vm7, %v2476_v4, %v2474_v31  ;;  %v7225_v4 = vadd.f32 %v2812_v12, %v2567_v51 }
 0x743   :  { %v5280_v50 = vadd.f32 %v7210_v30, %v4851_v34  ;;  %v2946_v39 = vpop.f32.mrb[145].mxu0  ;;  %v2480_v42 = vadd.f32 %v2479_v16, %v2477_v8 }
 0x744   :  { %v5282_v37 = vadd.f32 %v7212_v20, %v2946_v39  ;;  %7578 = vst [vmem:[#allocation6_spill] sm:$0xff] %v7225_v4 }
 0x745   :  { %v4523_v56 = vmul.f32 -1.442695, %v5280_v50  ;;  %v7221_v3 = vsel %vm2483_vm8, %v2460_v54, %v2480_v42  ;;  %v7231_v50 = vadd.f32 %v2822_v48, %v2577_v35  ;;  %v7233_v42 = vadd.f32 %v2817_v49, %v2572_v17 }
 0x746   :  { %v4522_v52 = vmul.f32 -1.442695, %v5282_v37  ;;  %v4854_v57 = vpop.f32.mrb[146].mxu0  ;;  %v7236_v37 = vpop.permute.xlu1 %2831 }
 0x747   :  { %5404 = vpow2.f32 %v4523_v56  ;;  %v5284_v25 = vadd.f32 %v7217_v19, %v4854_v57  ;;  %v2956_v44 = vpop.f32.mrb[147].mxu0  ;;  %7580 = vst [vmem:[#allocation8_spill] sm:$0xff] %v7231_v50  ;;  %7581 = vst [vmem:[#allocation9_spill] sm:$0xff] %v7233_v42  ;;  %v7239_v57 = vpop.permute.xlu0 %2826 }
 0x748   :  { %5406 = vpow2.f32 %v4522_v52  ;;  %v5286_v61 = vadd.f32 %v7219_v45, %v2956_v44  ;;  %7582 = vst [vmem:[#allocation10_spill] sm:$0xff] %v7236_v37  ;;  %7583 = vst [vmem:[#allocation11_spill] sm:$0xff] %v7239_v57 }
 0x749   :  { %v4525_v31 = vmul.f32 -1.442695, %v5284_v25 }
 0x74a   :  { %v4524_v16 = vmul.f32 -1.442695, %v5286_v61  ;;  %v4857_v24 = vpop.f32.mrb[148].mxu0  ;;  %v7241_v49 = vpop.permute.xlu1 %2586 }
 0x74b   :  { %5408 = vpow2.f32 %v4525_v31  ;;  %v5288_v54 = vadd.f32 %v7225_v4, %v4857_v24  ;;  %v2966_v34 = vpop.f32.mrb[149].mxu0  ;;  %7584 = vst [vmem:[#allocation12_spill] sm:$0xff] %v7241_v49 }
 0x74c   :  { %5410 = vpow2.f32 %v4524_v16  ;;  %v5290_v8 = vadd.f32 %v7227_v32, %v2966_v34 }
 0x74d   :  { %v4527_v39 = vmul.f32 -1.442695, %v5288_v54 }
 0x74e   :  { %v4526_v51 = vmul.f32 -1.442695, %v5290_v8  ;;  %v4860_v12 = vpop.f32.mrb[150].mxu0  ;;  %v7243_v8 = vpop.permute.xlu0 %2581 }
 0x74f   :  { %5412 = vpow2.f32 %v4527_v39  ;;  %v5292_v26 = vadd.f32 %v7231_v50, %v4860_v12  ;;  %v2976_v60 = vpop.f32.mrb[151].mxu0  ;;  %7585 = vst [vmem:[#allocation13_spill] sm:$0xff] %v7243_v8  ;;  %v2742_v50 = vadd.f32 %v7204_v62, %v7243_v8 }
 0x750   :  { %5414 = vpow2.f32 %v4526_v51  ;;  %v5294_v56 = vadd.f32 %v7233_v42, %v2976_v60  ;;  %v7245_v60 = vpop.permute.xlu1 %2841 }
 0x751   :  { %v5405_v52 = vpop.eup %5404  ;;  %v4529_v25 = vmul.f32 -1.442695, %v5292_v26  ;;  %7586 = vst [vmem:[#allocation14_spill] sm:$0xff] %v7245_v60 }
 0x752   :  { %v5407_v35 = vpop.eup %5406  ;;  %v3022_v44 = vadd.f32 1.0, %v5405_v52  ;;  %v4528_v61 = vmul.f32 -1.442695, %v5294_v56  ;;  %v4863_v17 = vpop.f32.mrb[156].mxu0 }
 0x753   :  { %v3021_v31 = vadd.f32 1.0, %v5407_v35  ;;  %5416 = vpow2.f32 %v4529_v25  ;;  %v2986_v48 = vpop.f32.mrb[157].mxu0  ;;  %v7247_v25 = vpop.permute.xlu0 %2836 }
 0x754   :  { %5418 = vrcp.f32 %v3022_v44  ;;  %7587 = vst [vmem:[#allocation15_spill] sm:$0xff] %v7247_v25  ;;  %v2992_v44 = vadd.f32 %v4863_v17, %v7236_v37 }
 0x755   :  { %v5409_v16 = vpop.eup %5408  ;;  %5420 = vrcp.f32 %v3021_v31 }
 0x756   :  { %v5411_v24 = vpop.eup %5410  ;;  %v3024_v54 = vadd.f32 1.0, %v5409_v16  ;;  %5422 = vpow2.f32 %v4528_v61  ;;  %v4866_v34 = vpop.f32.mrb[158].mxu0  ;;  %v2987_v16 = vadd.f32 %v2986_v48, %v7239_v57 }
 0x757   :  { %v3023_v39 = vadd.f32 1.0, %v5411_v24  ;;  %v2996_v51 = vpop.f32.mrb[159].mxu0  ;;  %v2747_v24 = vadd.f32 %v7202_v63, %v7241_v49  ;;  %v3002_v17 = vadd.f32 %v4866_v34, %v7245_v60 }
 0x758   :  { %5424 = vrcp.f32 %v3024_v54  ;;  %v2997_v57 = vadd.f32 %v2996_v51, %v7247_v25 }
 0x759   :  { %v5413_v12 = vpop.eup %5412  ;;  %5426 = vrcp.f32 %v3023_v39 }
 0x75a   :  { %v5415_v26 = vpop.eup %5414  ;;  %v3050_v56 = vadd.f32 1.0, %v5413_v12 }
 0x75b   :  { %v3049_v35 = vadd.f32 1.0, %v5415_v26 }
 0x75c   :  { %5428 = vrcp.f32 %v3050_v56 }
 0x75d   :  { %v5417_v52 = vpop.eup %5416  ;;  %5430 = vrcp.f32 %v3049_v35 }
 0x75e   :  { %v5419_v31 = vpop.eup %5418  ;;  %v3052_v61 = vadd.f32 1.0, %v5417_v52  ;;  %v7256_v52 = vpop.permute.xlu1 %2596 }
 0x75f   :  { %v5421_v42 = vpop.eup %5420  ;;  %v3062_v54 = vmul.f32 %v5419_v31, %v2992_v44  ;;  %7588 = vst [vmem:[#allocation16_spill] sm:$0xff] %v7256_v52  ;;  %v7259_v44 = vpop.permute.xlu0 %2591  ;;  %v2757_v62 = vadd.f32 %v7206_v14, %v7256_v52 }
 0x760   :  { %v5423_v39 = vpop.eup %5422  ;;  %v3061_v12 = vmul.f32 %v5421_v42, %v2987_v16  ;;  %5432 = vrcp.f32 %v3052_v61  ;;  %7589 = vst [vmem:[#allocation17_spill] sm:$0xff] %v7259_v44  ;;  %v2752_v56 = vadd.f32 %v7208_v21, %v7259_v44 }
 0x761   :  { %v3051_v32 = vadd.f32 1.0, %v5423_v39  ;;  %v3066_v26 = vadd.f32 %v3062_v54, %v2747_v24 }
 0x762   :  { %v5425_v37 = vpop.eup %5424  ;;  %v3065_v48 = vadd.f32 %v3061_v12, %v2742_v50 }
 0x763   :  { %v5427_v63 = vpop.eup %5426  ;;  %5434 = vrcp.f32 %v3051_v32  ;;  %v3064_v42 = vmul.f32 %v5425_v37, %v3002_v17 }
 0x764   :  { %5436 = vtanh.f32 %v3066_v26  ;;  %v3063_v34 = vmul.f32 %v5427_v63, %v2997_v57 }
 0x765   :  { %5438 = vtanh.f32 %v3065_v48  ;;  %v3068_v35 = vadd.f32 %v3064_v42, %v2757_v62 }
 0x766   :  { %v3067_v31 = vadd.f32 %v3063_v34, %v2752_v56  ;;  %v5429_v50 = vpop.eup %5428 }
 0x767   :  { %5440 = vtanh.f32 %v3068_v35  ;;  %v5431_v51 = vpop.eup %5430  ;;  %v3074_v24 = vsub.f32 1.0, %v5429_v50  ;;  %v3082_v37 = vmul.f32 %v5429_v50, %v7004_v15 }
 0x768   :  { %5442 = vtanh.f32 %v3067_v31  ;;  %v3073_v39 = vsub.f32 1.0, %v5431_v51  ;;  %v3081_v21 = vmul.f32 %v5431_v51, %v7006_v23  ;;  %v3092_v51 = vld [vmem:[%s7514_s19 + $0x18] sm:$0xff] }
 0x76a   :  { %v5433_v61 = vpop.eup %5432 }
 0x76b   :  { %v3076_v57 = vsub.f32 1.0, %v5433_v61  ;;  %v3084_v56 = vmul.f32 %v5433_v61, %v7021_v2  ;;  %v3090_v2 = vld [vmem:[%s7514_s19 + $0x8] sm:$0xff]  ;;  %v7540_v61 = vmov 0.0  }
 0x76d   :  { %v5435_v16 = vpop.eup %5434 }
 0x76e   :  { %v5437_v54 = vpop.eup %5436  ;;  %v3075_v48 = vsub.f32 1.0, %v5435_v16  ;;  %v3083_v35 = vmul.f32 %v5435_v16, %v7023_v18  ;;  %v3091_v18 = vld [vmem:[%s7514_s19 + $0x10] sm:$0xff]  ;;  %v3105_v16 = vpop.permute.xlu1 %3104 }
 0x76f   :  { %v5439_v14 = vpop.eup %5438  ;;  %v3078_v32 = vmul.f32 %v5437_v54, %v3074_v24  ;;  %v3100_v24 = vpop.permute.xlu0 %3099 }
 0x770   :  { %v3077_v12 = vmul.f32 %v5439_v14, %v3073_v39 }
 0x771   :  { %v5441_v26 = vpop.eup %5440  ;;  %v7267_v17 = vadd.f32 %v3082_v37, %v3078_v32 }
 0x772   :  { %v5443_v63 = vpop.eup %5442  ;;  %v7269_v62 = vadd.f32 %v3081_v21, %v3077_v12  ;;  %v3080_v42 = vmul.f32 %v5441_v26, %v3076_v57  ;;  %v3115_v12 = vpop.permute.xlu1 %3114 }
 0x773   :  { %7590 = vst [vmem:[#allocation18_spill] sm:$0xff] %v7267_v17  ;;  %v3079_v34 = vmul.f32 %v5443_v63, %v3075_v48  ;;  %v3110_v48 = vpop.permute.xlu0 %3109 }
 0x774   :  { %7591 = vst [vmem:[#allocation19_spill] sm:$0xff] %v7269_v62  ;;  %v7275_v15 = vpack.c.bf16 %v7267_v17, %v7269_v62  ;;  %v7277_v31 = vadd.f32 %v3084_v56, %v3080_v42 }
 0x775   :  { %v7279_v23 = vadd.f32 %v3083_v35, %v3079_v34 }
 0x776   :  { %7592 = vst [vmem:[#allocation20_spill] sm:$0xff] %v7277_v31  ;;  %5208 = vmatprep.subr.bf16.mxu1 %v7275_v15 }
 0x777   :  { %7593 = vst [vmem:[#allocation21_spill] sm:$0xff] %v7279_v23  ;;  %5210 = vmatpush3.bf16.msra.mxu1 %v7275_v15  ;;  %v7285_v50 = vpack.c.bf16 %v7277_v31, %v7279_v23 }
 0x779   :  { %5212 = vmatprep.subr.bf16.mxu1 %v7285_v50 }
 0x77b   :  { %5214 = vmatpush3.bf16.msra.mxu1 %v7285_v50 }
 0x77c   :  { %4881 = vmatprep.subr.mxu1 %v7540_v61 }
 0x77e   :  { %4876 = vmatmul.mubr.msk.f32.vlgmr.msra.gmra.mrb[72].mxu1 %vm2070_vm0, %v3090_v2 }
 0x77f   :  { %4878 = vmatprep.mubr.msk.f32.mxu1 %vm2070_vm0, %v3091_v18  ;;  %4882 = vmatpush3.msk.msra.mxu1 %vm2347_vm2, %v6985_v0 }
 0x780   :  { %4886 = vmatprep.subr.mxu1 %v7540_v61 }
 0x782   :  { %4879 = vmatmul.mubr.msk.f32.gmra.mrb[74].mxu1 %vm2070_vm0, %v3092_v51 }
 0x783   :  { %4883 = vmatprep.mubr.msk.f32.mxu1 %vm5543_vm9, %v7540_v61 }
 0x851   :  { %v4877_v54 = vpop.f32.mrb[72].mxu1 }
 0x852   :  { %v3201_v39 = vadd.f32 %v4877_v54, %v3105_v16  ;;  %v3195_v14 = vpop.f32.mrb[73].mxu1 }
 0x853   :  { %v3196_v32 = vadd.f32 %v3195_v14, %v3100_v24 }
 0x854   :  { %v3313_v37 = vsel %vm2334_vm3, %v3201_v39, -inf }
 0x855   :  { %v3314_v21 = vrot.slane %v3313_v37, 4  ;;  %v3214_v57 = vsel %vm2334_vm3, %v3196_v32, -inf  ;;  %v4880_v26 = vpop.f32.mrb[74].mxu1 }
 0x856   :  { %v3215_v63 = vrot.slane %v3214_v57, 4  ;;  %v3211_v42 = vadd.f32 %v4880_v26, %v3115_v12  ;;  %v3205_v56 = vpop.f32.mrb[75].mxu1 }
 0x857   :  { %v3315_v34 = vmax.f32 %v3313_v37, %v3314_v21  ;;  %v3206_v35 = vadd.f32 %v3205_v56, %v3110_v48 }
 0x858   :  { %v3216_v2 = vmax.f32 %v3214_v57, %v3215_v63  ;;  %v3511_v18 = vsel %vm2334_vm3, %v3211_v42, -inf }
 0x859   :  { %v3316_v51 = vrot.slane %v3315_v34, 2  ;;  %v3512_v16 = vrot.slane %v3511_v18, 4  ;;  %v3412_v24 = vsel %vm2334_vm3, %v3206_v35, -inf }
 0x85a   :  { %v3217_v54 = vrot.slane %v3216_v2, 2  ;;  %v3413_v14 = vrot.slane %v3412_v24, 4 }
 0x85b   :  { %v3317_v61 = vmax.f32 %v3315_v34, %v3316_v51  ;;  %v3513_v23 = vmax.f32 %v3511_v18, %v3512_v16 }
 0x85c   :  { %v3218_v31 = vmax.f32 %v3216_v2, %v3217_v54  ;;  %v3414_v62 = vmax.f32 %v3412_v24, %v3413_v14 }
 0x85d   :  { %v3318_v17 = vrot.slane %v3317_v61, 1  ;;  %v3514_v44 = vrot.slane %v3513_v23, 2 }
 0x85e   :  { %v3219_v52 = vrot.slane %v3218_v31, 1  ;;  %v3415_v12 = vrot.slane %v3414_v62, 2 }
 0x85f   :  { %v3319_v26 = vmax.f32 %v3317_v61, %v3318_v17  ;;  %v3515_v37 = vmax.f32 %v3513_v23, %v3514_v44 }
 0x860   :  { %v3220_v21 = vmax.f32 %v3218_v31, %v3219_v52  ;;  %v3416_v57 = vmax.f32 %v3414_v62, %v3415_v12 }
 0x861   :  { %v3320_v48 = vsub.f32 %v3201_v39, %v3319_v26  ;;  %v3516_v63 = vrot.slane %v3515_v37, 1 }
 0x862   :  { %v3221_v56 = vsub.f32 %v3196_v32, %v3220_v21  ;;  %v3417_v25 = vrot.slane %v3416_v57, 1 }
 0x863   :  { %v3321_v60 = vmul.f32 1.442695, %v3320_v48  ;;  %v3517_v8 = vmax.f32 %v3515_v37, %v3516_v63 }
 0x864   :  { %v3222_v49 = vmul.f32 1.442695, %v3221_v56  ;;  %v3418_v4 = vmax.f32 %v3416_v57, %v3417_v25 }
 0x865   :  { %5444 = vpow2.f32 %v3321_v60  ;;  %v3518_v34 = vsub.f32 %v3211_v42, %v3517_v8 }
 0x866   :  { %5446 = vpow2.f32 %v3222_v49  ;;  %v3419_v2 = vsub.f32 %v3206_v35, %v3418_v4 }
 0x867   :  { %v3519_v18 = vmul.f32 1.442695, %v3518_v34 }
 0x868   :  { %v3420_v51 = vmul.f32 1.442695, %v3419_v2 }
 0x869   :  { %5448 = vpow2.f32 %v3519_v18 }
 0x86a   :  { %5450 = vpow2.f32 %v3420_v51 }
 0x86f   :  { %v5445_v17 = vpop.eup %5444 }
 0x870   :  { %v5447_v44 = vpop.eup %5446  ;;  %v3323_v52 = vsel %vm2334_vm3, %v5445_v17, 0.0 }
 0x871   :  { %v3324_v62 = vrot.slane %v3323_v52, 4  ;;  %v3224_v31 = vsel %vm2334_vm3, %v5447_v44, 0.0 }
 0x872   :  { %v3225_v23 = vrot.slane %v3224_v31, 4 }
 0x873   :  { %v5449_v61 = vpop.eup %5448  ;;  %v3325_v39 = vadd.f32 %v3324_v62, %v3323_v52 }
 0x874   :  { %v5451_v32 = vpop.eup %5450  ;;  %v3226_v25 = vadd.f32 %v3225_v23, %v3224_v31  ;;  %v3521_v8 = vsel %vm2334_vm3, %v5449_v61, 0.0 }
 0x875   :  { %v3326_v49 = vrot.slane %v3325_v39, 2  ;;  %v3522_v4 = vrot.slane %v3521_v8, 4  ;;  %v3422_v60 = vsel %vm2334_vm3, %v5451_v32, 0.0 }
 0x876   :  { %v3227_v42 = vrot.slane %v3226_v25, 2  ;;  %v3423_v35 = vrot.slane %v3422_v60, 4 }
 0x877   :  { %v3327_v16 = vadd.f32 %v3326_v49, %v3325_v39  ;;  %v3523_v24 = vadd.f32 %v3522_v4, %v3521_v8  ;;  %v7594_v49 = vmov 0.0  }
 0x878   :  { %v3228_v54 = vadd.f32 %v3227_v42, %v3226_v25  ;;  %v3424_v14 = vadd.f32 %v3423_v35, %v3422_v60 }
 0x879   :  { %v3328_v12 = vrot.slane %v3327_v16, 1  ;;  %v3524_v26 = vrot.slane %v3523_v24, 2 }
 0x87a   :  { %v3229_v37 = vrot.slane %v3228_v54, 1  ;;  %v3425_v21 = vrot.slane %v3424_v14, 2 }
 0x87b   :  { %v3329_v57 = vadd.f32 %v3328_v12, %v3327_v16  ;;  %v3525_v48 = vadd.f32 %v3524_v26, %v3523_v24 }
 0x87c   :  { %v3230_v63 = vadd.f32 %v3229_v37, %v3228_v54  ;;  %v3426_v56 = vadd.f32 %v3425_v21, %v3424_v14 }
 0x87d   :  { %5452 = vrcp.f32 %v3329_v57  ;;  %v3526_v34 = vrot.slane %v3525_v48, 1 }
 0x87e   :  { %5454 = vrcp.f32 %v3230_v63  ;;  %v3427_v2 = vrot.slane %v3426_v56, 1 }
 0x87f   :  { %v3527_v18 = vadd.f32 %v3526_v34, %v3525_v48 }
 0x880   :  { %v3428_v51 = vadd.f32 %v3427_v2, %v3426_v56 }
 0x881   :  { %5456 = vrcp.f32 %v3527_v18 }
 0x882   :  { %5458 = vrcp.f32 %v3428_v51 }
 0x887   :  { %v5453_v52 = vpop.eup %5452 }
 0x888   :  { %v5455_v62 = vpop.eup %5454  ;;  %v3331_v31 = vmul.f32 %v5453_v52, %v5445_v17  ;;  %v3639_v17 = vld [vmem:[%s7516_s21] sm:$0xff] }
 0x889   :  { %v3232_v23 = vmul.f32 %v5455_v62, %v5447_v44  ;;  %v3640_v44 = vld [vmem:[%s7516_s21 + $0x8] sm:$0xff] }
 0x88b   :  { %v5457_v39 = vpop.eup %5456  ;;  %4884 = vmatmul.mubr.msk.f32.vlgmr.msra.gmra.mrb[76].mxu1 %vm2334_vm3, %v3232_v23  ;;  %v5215_v25 = vpack.c.bf16 %v3331_v31, %v3232_v23 }
 0x88c   :  { %v5459_v8 = vpop.eup %5458  ;;  %4887 = vmatpush3.msk.msra.mxu1 %vm2347_vm2, %v6985_v0  ;;  %4888 = vmatprep.mubr.msk.f32.mxu1 %vm5543_vm9, %v7594_v49  ;;  %v3529_v4 = vmul.f32 %v5457_v39, %v5449_v61  ;;  %v3642_v61 = vld [vmem:[%s7516_s21 + $0x18] sm:$0xff] }
 0x88d   :  { %4891 = vmatprep.subr.mxu1 %v7594_v49  ;;  %v3430_v60 = vmul.f32 %v5459_v8, %v5451_v32  ;;  %v2486_v32 = vstv %s7508_s13 }
 0x88e   :  { %v2487_v35 = vmul.f32 %v2486_v32, %v7221_v3  ;;  %v3655_v32 = vpop.permute.xlu1 %3654 }
 0x88f   :  { %4889 = vmatmul.mubr.msk.f32.vlgmr.msra.gmra.mrb[78].mxu1 %vm2334_vm3, %v3331_v31  ;;  %v5219_v42 = vpack.c.bf16 %v3529_v4, %v3430_v60 }
 0x890   :  { %4892 = vmatpush3.msk.msra.mxu1 %vm2347_vm2, %v6985_v0  ;;  %4893 = vmatprep.mubr.msk.f32.mxu1 %vm5543_vm9, %v7594_v49  ;;  %v2488_v16 = vmax.f32 %v2487_v35, 0.0  ;;  %v3650_v35 = vpop.permute.xlu0 %3649 }
 0x891   :  { %4896 = vmatprep.subr.mxu1 %v7594_v49 }
 0x892   :  { %v2489_v24 = vmin.f32 %v2488_v16, 1.0 }
 0x893   :  { %4894 = vmatmul.mubr.msk.f32.vlgmr.msra.gmra.mrb[80].mxu1 %vm2334_vm3, %v3430_v60 }
 0x894   :  { %4897 = vmatpush3.msk.msra.mxu1 %vm2347_vm2, %v6985_v0  ;;  %4898 = vmatprep.mubr.msk.f32.mxu1 %vm5543_vm9, %v7594_v49  ;;  %v3641_v0 = vld [vmem:[%s7516_s21 + $0x10] sm:$0xff]  ;;  %v7355_v54 = vsub.f32 1.0, %v2489_v24 }
 0x895   :  { %5216 = vmatprep.subr.bf16.mxu1 %v5215_v25 }
 0x897   :  { %4899 = vmatmul.mubr.msk.f32.vlgmr.msra.gmra.mrb[82].mxu1 %vm2334_vm3, %v3529_v4 }
 0x898   :  { %5218 = vmatpush3.bf16.msra.mxu1 %v5215_v25  ;;  %4909 = vmatprep.mubr.msk.f32.mxu1 %vm2070_vm0, %v3639_v17 }
 0x899   :  { %5220 = vmatprep.subr.bf16.mxu1 %v5219_v42 }
 0x89c   :  { %5222 = vmatpush3.bf16.msra.mxu1 %v5219_v42 }
 0x89f   :  { %4910 = vmatmul.mubr.msk.f32.vlgmr.msra.gmra.mrb[84].mxu1 %vm2070_vm0, %v3640_v44 }
 0x8a0   :  { %4912 = vmatprep.mubr.msk.f32.mxu1 %vm2070_vm0, %v3641_v0 }
 0x8a3   :  { %4913 = vmatmul.mubr.msk.f32.gmra.mrb[86].mxu1 %vm2070_vm0, %v3642_v61 }
 0x8a4   :  { %4923 = vmatprep.mubr.msk.f32.mxu1 %vm2070_vm0, %v7015_v47 }
 0x95e   :  { %v3302_v14 = vpop.f32.mrb[76].mxu1 }
 0x95f   :  { %v3306_v12 = vmul.f32 %v3302_v14, %v7355_v54  ;;  %v4885_v26 = vpop.f32.mrb[77].mxu1 }
 0x961   :  { %v3307_v37 = vrot.slane %v3306_v12, 4 }
 0x962   :  { %v3401_v21 = vpop.f32.mrb[78].mxu1 }
 0x963   :  { %v3308_v57 = vadd.f32 %v3307_v37, %v3306_v12  ;;  %v3405_v48 = vmul.f32 %v3401_v21, %v7355_v54  ;;  %v4890_v47 = vpop.f32.mrb[79].mxu1 }
 0x964   :  { %v3665_v47 = vpop.permute.xlu1 %3664 }
 0x965   :  { %v3309_v63 = vrot.slane %v3308_v57, 2  ;;  %v3406_v56 = vrot.slane %v3405_v48, 4 }
 0x966   :  { %v3500_v34 = vpop.f32.mrb[80].mxu1 }
 0x967   :  { %v3310_v2 = vadd.f32 %v3309_v63, %v3308_v57  ;;  %v3407_v18 = vadd.f32 %v3406_v56, %v3405_v48  ;;  %v3504_v3 = vmul.f32 %v3500_v34, %v7355_v54  ;;  %v4895_v51 = vpop.f32.mrb[81].mxu1  ;;  %v3660_v34 = vpop.permute.xlu0 %3659 }
 0x969   :  { %v3408_v52 = vrot.slane %v3407_v18, 2  ;;  %v3505_v62 = vrot.slane %v3504_v3, 4  ;;  %v3311_v23 = vrot.slane %v3310_v2, 1 }
 0x96a   :  { %v3599_v31 = vpop.f32.mrb[82].mxu1 }
 0x96b   :  { %v3409_v39 = vadd.f32 %v3408_v52, %v3407_v18  ;;  %v3506_v25 = vadd.f32 %v3505_v62, %v3504_v3  ;;  %v3603_v8 = vmul.f32 %v3599_v31, %v7355_v54  ;;  %v4900_v49 = vpop.f32.mrb[83].mxu1  ;;  %v3312_v17 = vadd.f32 %v3311_v23, %v3310_v2 }
 0x96d   :  { %v3410_v4 = vrot.slane %v3409_v39, 1  ;;  %v3507_v60 = vrot.slane %v3506_v25, 2  ;;  %v3604_v42 = vrot.slane %v3603_v8, 4 }
 0x96f   :  { %v3411_v44 = vadd.f32 %v3410_v4, %v3409_v39  ;;  %v3508_v0 = vadd.f32 %v3507_v60, %v3506_v25  ;;  %v3605_v61 = vadd.f32 %v3604_v42, %v3603_v8 }
 0x971   :  { %v3606_v16 = vrot.slane %v3605_v61, 2  ;;  %v3611_v24 = vsel %vm3610_vm10, %v3312_v17, %v3411_v44  ;;  %v3509_v12 = vrot.slane %v3508_v0, 1 }
 0x972   :  { %v4911_v14 = vpop.f32.mrb[84].mxu1 }
 0x973   :  { %v3607_v26 = vadd.f32 %v3606_v16, %v3605_v61  ;;  %v3751_v37 = vadd.f32 %v4911_v14, %v3655_v32  ;;  %v3745_v21 = vpop.f32.mrb[85].mxu1  ;;  %v3510_v2 = vadd.f32 %v3509_v12, %v3508_v0  ;;  %v7598_v12 = vld [vmem:[#allocation8_spill] sm:$0xff] }
 0x974   :  { %v3746_v57 = vadd.f32 %v3745_v21, %v3650_v35 }
 0x975   :  { %v3608_v48 = vrot.slane %v3607_v26, 1 }
 0x976   :  { %v5223_v63 = vpack.c.bf16 %v3751_v37, %v3746_v57  ;;  %v4914_v56 = vpop.f32.mrb[86].mxu1  ;;  %v7599_v37 = vld [vmem:[#allocation9_spill] sm:$0xff] }
 0x977   :  { %v3609_v18 = vadd.f32 %v3608_v48, %v3607_v26  ;;  %v3761_v3 = vadd.f32 %v4914_v56, %v3665_v47  ;;  %v3755_v51 = vpop.f32.mrb[87].mxu1 }
 0x978   :  { %v3756_v52 = vadd.f32 %v3755_v51, %v3660_v34  ;;  %5224 = vmatprep.subr.bf16.mxu1 %v5223_v63 }
 0x979   :  { %5226 = vmatpush3.bf16.msra.mxu1 %v5223_v63  ;;  %v3612_v62 = vsel %vm3610_vm10, %v3510_v2, %v3609_v18 }
 0x97a   :  { %v5227_v31 = vpack.c.bf16 %v3761_v3, %v3756_v52  ;;  %v3613_v23 = vadd.f32 %v3612_v62, %v3611_v24  ;;  %v3619_v39 = vsub.f32 %v3611_v24, %v3612_v62  ;;  %v3622_v25 = vsub.f32 %v3612_v62, %v3611_v24 }
 0x97c   :  { %5228 = vmatprep.subr.bf16.mxu1 %v5227_v31  ;;  %v4542_v8 = vadd.f32 -1.0, %v3613_v23  ;;  %v3620_v49 = vmax.f32 %v3619_v39, 0.0  ;;  %v3623_v4 = vmax.f32 %v3622_v25, 0.0  ;;  %v3614_v60 = vmax.f32 %v3613_v23, 0.0 }
 0x97d   :  { %5230 = vmatpush3.bf16.msra.mxu1 %v5227_v31 }
 0x97e   :  { %5232 = vmatprep.subr.bf16.mxu1 %v7275_v15  ;;  %v3617_v42 = vmax.f32 %v4542_v8, 0.0  ;;  %v3621_v17 = vmin.f32 %v3620_v49, 1.0  ;;  %v3624_v0 = vmin.f32 %v3623_v4, 1.0  ;;  %v3615_v61 = vmin.f32 %v3614_v60, 1.0  ;;  %v7600_v4 = vld [vmem:[#allocation10_spill] sm:$0xff] }
 0x980   :  { %4924 = vmatmul.mubr.msk.f32.vlgmr.msra.gmra.mrb[88].mxu1 %vm2070_vm0, %v7031_v1  ;;  %v3618_v44 = vmin.f32 %v3617_v42, 1.0  ;;  %v3629_v35 = vrot.slane %v3621_v17, 4  ;;  %v3632_v16 = vrot.slane %v3624_v0, 2 }
 0x981   :  { %5234 = vmatpush3.bf16.msra.mxu1 %v7275_v15  ;;  %4926 = vmatprep.mubr.msk.f32.mxu1 %vm2070_vm0, %v7036_v43 }
 0x982   :  { %5236 = vmatprep.subr.bf16.mxu1 %v7285_v50  ;;  %v3626_v32 = vrot.slane %v3618_v44, 6  ;;  %v7601_v44 = vld [vmem:[#allocation11_spill] sm:$0xff] }
 0x984   :  { %4927 = vmatmul.mubr.msk.f32.gmra.mrb[90].mxu1 %vm2070_vm0, %v7047_v7  ;;  %v3634_v1 = vsel %vm2347_vm2, %v3615_v61, %v3626_v32  ;;  %v4098_v7 = vld [vmem:[%s7595_s23] sm:$0xff]  ;;  %v7602_v32 = vld [vmem:[#allocation12_spill] sm:$0xff] }
 0x985   :  { %5238 = vmatpush3.bf16.msra.mxu1 %v7285_v50  ;;  %4929 = vmatprep.mubr.msk.f32.mxu1 %vm2070_vm0, %v7052_v22  ;;  %v3636_v15 = vsel %vm3635_vm11, %v3634_v1, %v3629_v35 }
 0x986   :  { %v7376_v43 = vsel %vm3637_vm12, %v3636_v15, %v3632_v16  ;;  %4975 = vmatprep.mubr.msk.f32.mxu0 %vm2070_vm0, %v4098_v7  ;;  %v7603_v15 = vld [vmem:[#allocation13_spill] sm:$0xff] }
 0x988   :  { %4930 = vmatmul.mubr.msk.f32.gmra.mrb[92].mxu1 %vm2070_vm0, %v7061_v11 }
 0x989   :  { %4932 = vmatprep.mubr.msk.f32.mxu1 %vm2070_vm0, %v7066_v41 }
 0x98c   :  { %4933 = vmatmul.mubr.msk.f32.gmra.mrb[94].mxu1 %vm2070_vm0, %v7075_v40 }
 0x98d   :  { %4935 = vmatprep.mubr.msk.f32.mxu1 %vm2070_vm0, %v7080_v29 }
 0x990   :  { %4936 = vmatmul.mubr.msk.f32.gmra.mrb[96].mxu1 %vm2070_vm0, %v7089_v13 }
 0x991   :  { %4938 = vmatprep.mubr.msk.f32.mxu1 %vm2070_vm0, %v7094_v55 }
 0x994   :  { %4939 = vmatmul.mubr.msk.f32.gmra.mrb[98].mxu1 %vm2070_vm0, %v7103_v36 }
 0x995   :  { %4949 = vmatprep.mubr.msk.f32.mxu1 %vm2070_vm0, %v7108_v27 }
 0x998   :  { %4950 = vmatmul.mubr.msk.f32.vlgmr.msra.gmra.mrb[88].mxu1 %vm2070_vm0, %v7117_v58 }
 0x999   :  { %4952 = vmatprep.mubr.msk.f32.mxu1 %vm2070_vm0, %v7122_v28 }
 0x99c   :  { %4953 = vmatmul.mubr.msk.f32.gmra.mrb[90].mxu1 %vm2070_vm0, %v7131_v10 }
 0x99d   :  { %4955 = vmatprep.mubr.msk.f32.mxu1 %vm2070_vm0, %v7136_v53 }
 0x9a0   :  { %4956 = vmatmul.mubr.msk.f32.gmra.mrb[92].mxu1 %vm2070_vm0, %v7145_v59 }
 0x9a1   :  { %4958 = vmatprep.mubr.msk.f32.mxu1 %vm2070_vm0, %v7150_v38 }
 0x9a4   :  { %4959 = vmatmul.mubr.msk.f32.gmra.mrb[94].mxu1 %vm2070_vm0, %v7159_v6 }
 0x9a5   :  { %4961 = vmatprep.mubr.msk.f32.mxu1 %vm2070_vm0, %v7164_v9 }
 0x9a8   :  { %4962 = vmatmul.mubr.msk.f32.gmra.mrb[100].mxu1 %vm2070_vm0, %v7173_v33  ;;  %v7596_v33 = vld [vmem:[#allocation6_spill] sm:$0xff] }
 0x9a9   :  { %4964 = vmatprep.mubr.msk.f32.mxu1 %vm2070_vm0, %v7178_v46 }
 0x9ac   :  { %4965 = vmatmul.mubr.msk.f32.gmra.mrb[102].mxu1 %vm2070_vm0, %v7187_v5 }
 0xa63   :  { %v4937_v22 = vpop.f32.mrb[96].mxu1 }
 0xa64   :  { %v7420_v11 = vpop.f32.mrb[97].mxu1  ;;  %v3876_v35 = vadd.f32 %v4937_v22, %v7602_v32 }
 0xa65   :  { %v3871_v7 = vadd.f32 %v7420_v11, %v7603_v15 }
 0xa67   :  { %v7422_v41 = vpop.f32.mrb[98].mxu1 }
 0xa68   :  { %v7424_v40 = vpop.f32.mrb[99].mxu1 }
 0xa6b   :  { %v4951_v29 = vpop.f32.mrb[88].mxu1 }
 0xa6c   :  { %v5296_v13 = vadd.f32 %v7210_v30, %v4951_v29  ;;  %v3955_v55 = vpop.f32.mrb[89].mxu1  ;;  %v7597_v30 = vld [vmem:[#allocation7_spill] sm:$0xff] }
 0xa6d   :  { %v5298_v36 = vadd.f32 %v7212_v20, %v3955_v55 }
 0xa6e   :  { %v4572_v27 = vmul.f32 -1.442695, %v5296_v13 }
 0xa6f   :  { %v4571_v58 = vmul.f32 -1.442695, %v5298_v36  ;;  %v4954_v28 = vpop.f32.mrb[90].mxu1  ;;  %v7604_v36 = vld [vmem:[#allocation14_spill] sm:$0xff] }
 0xa70   :  { %5460 = vpow2.f32 %v4572_v27  ;;  %v5300_v10 = vadd.f32 %v7217_v19, %v4954_v28  ;;  %v3965_v53 = vpop.f32.mrb[91].mxu1 }
 0xa71   :  { %5462 = vpow2.f32 %v4571_v58  ;;  %v5302_v59 = vadd.f32 %v7219_v45, %v3965_v53 }
 0xa72   :  { %v4574_v38 = vmul.f32 -1.442695, %v5300_v10  ;;  %v7605_v10 = vld [vmem:[#allocation15_spill] sm:$0xff] }
 0xa73   :  { %v4573_v6 = vmul.f32 -1.442695, %v5302_v59  ;;  %v4957_v9 = vpop.f32.mrb[92].mxu1 }
 0xa74   :  { %5464 = vpow2.f32 %v4574_v38  ;;  %v5304_v46 = vadd.f32 %v7596_v33, %v4957_v9  ;;  %v3975_v5 = vpop.f32.mrb[93].mxu1  ;;  %v7606_v38 = vld [vmem:[#allocation16_spill] sm:$0xff]  ;;  %v7607_v9 = vld [vmem:[#allocation17_spill] sm:$0xff] }
 0xa75   :  { %5466 = vpow2.f32 %v4573_v6  ;;  %v5306_v20 = vadd.f32 %v7597_v30, %v3975_v5  ;;  %v3886_v22 = vadd.f32 %v7422_v41, %v7606_v38  ;;  %v3881_v11 = vadd.f32 %v7424_v40, %v7607_v9  ;;  %v7609_v40 = vld [vmem:[#allocation19_spill] sm:$0xff] }
 0xa76   :  { %v4576_v50 = vmul.f32 -1.442695, %v5304_v46 }
 0xa77   :  { %v4575_v24 = vmul.f32 -1.442695, %v5306_v20  ;;  %v4960_v14 = vpop.f32.mrb[94].mxu1 }
 0xa78   :  { %5468 = vpow2.f32 %v4576_v50  ;;  %v5308_v19 = vadd.f32 %v7598_v12, %v4960_v14  ;;  %v3985_v26 = vpop.f32.mrb[95].mxu1 }
 0xa79   :  { %5470 = vpow2.f32 %v4575_v24  ;;  %v5310_v45 = vadd.f32 %v7599_v37, %v3985_v26  ;;  %v7608_v37 = vld [vmem:[#allocation18_spill] sm:$0xff] }
 0xa7a   :  { %v5461_v21 = vpop.eup %5460  ;;  %v4578_v57 = vmul.f32 -1.442695, %v5308_v19 }
 0xa7b   :  { %v5463_v48 = vpop.eup %5462  ;;  %v4031_v47 = vadd.f32 1.0, %v5461_v21  ;;  %v4577_v63 = vmul.f32 -1.442695, %v5310_v45  ;;  %v4963_v56 = vpop.f32.mrb[100].mxu1 }
 0xa7c   :  { %v4030_v34 = vadd.f32 1.0, %v5463_v48  ;;  %5472 = vpow2.f32 %v4578_v57  ;;  %v3995_v2 = vpop.f32.mrb[101].mxu1  ;;  %v4001_v60 = vadd.f32 %v4963_v56, %v7600_v4  ;;  %v4100_v4 = vld [vmem:[%s7595_s23 + $0x10] sm:$0xff] }
 0xa7d   :  { %5474 = vrcp.f32 %v4031_v47  ;;  %v3996_v0 = vadd.f32 %v3995_v2, %v7601_v44  ;;  %v4109_v44 = vpop.permute.xlu0 %4108 }
 0xa7e   :  { %v5465_v18 = vpop.eup %5464  ;;  %5476 = vrcp.f32 %v4030_v34 }
 0xa7f   :  { %v5467_v3 = vpop.eup %5466  ;;  %v4033_v51 = vadd.f32 1.0, %v5465_v18  ;;  %5478 = vpow2.f32 %v4577_v63  ;;  %v4966_v52 = vpop.f32.mrb[102].mxu1 }
 0xa80   :  { %v4032_v62 = vadd.f32 1.0, %v5467_v3  ;;  %v4005_v31 = vpop.f32.mrb[103].mxu1  ;;  %v4011_v27 = vadd.f32 %v4966_v52, %v7604_v36  ;;  %v7610_v3 = vld [vmem:[#allocation20_spill] sm:$0xff] }
 0xa81   :  { %5480 = vrcp.f32 %v4033_v51  ;;  %v4006_v53 = vadd.f32 %v4005_v31, %v7605_v10 }
 0xa82   :  { %v5469_v23 = vpop.eup %5468  ;;  %5482 = vrcp.f32 %v4032_v62  ;;  %v7611_v62 = vld [vmem:[#allocation21_spill] sm:$0xff] }
 0xa83   :  { %v5471_v39 = vpop.eup %5470  ;;  %v4059_v25 = vadd.f32 1.0, %v5469_v23 }
 0xa84   :  { %v4058_v49 = vadd.f32 1.0, %v5471_v39 }
 0xa85   :  { %5484 = vrcp.f32 %v4059_v25 }
 0xa86   :  { %v5473_v8 = vpop.eup %5472  ;;  %5486 = vrcp.f32 %v4058_v49  ;;  %v4099_v49 = vld [vmem:[%s7595_s23 + $0x8] sm:$0xff] }
 0xa87   :  { %v5475_v42 = vpop.eup %5474  ;;  %v4061_v17 = vadd.f32 1.0, %v5473_v8 }
 0xa88   :  { %v5477_v61 = vpop.eup %5476  ;;  %v4071_v16 = vmul.f32 %v5475_v42, %v4001_v60  ;;  %v7458_v60 = vld [vmem:[%s7507_s12] sm:$0x3]  ;;  %v4101_v42 = vld [vmem:[%s7595_s23 + $0x18] sm:$0xff] }
 0xa89   :  { %v5479_v1 = vpop.eup %5478  ;;  %v4070_v29 = vmul.f32 %v5477_v61, %v3996_v0  ;;  %5488 = vrcp.f32 %v4061_v17  ;;  %v4114_v17 = vpop.permute.xlu1 %4113 }
 0xa8a   :  { %v4060_v13 = vadd.f32 1.0, %v5479_v1  ;;  %v4075_v55 = vadd.f32 %v4071_v16, %v3876_v35 }
 0xa8b   :  { %v5481_v58 = vpop.eup %5480  ;;  %v4074_v28 = vadd.f32 %v4070_v29, %v3871_v7  ;;  %v4119_v29 = vpop.permute.xlu0 %4118 }
 0xa8c   :  { %v5483_v59 = vpop.eup %5482  ;;  %5490 = vrcp.f32 %v4060_v13  ;;  %v4073_v6 = vmul.f32 %v5481_v58, %v4011_v27 }
 0xa8d   :  { %5492 = vtanh.f32 %v4075_v55  ;;  %v4072_v33 = vmul.f32 %v5483_v59, %v4006_v53  ;;  %v4124_v1 = vpop.permute.xlu1 %4123 }
 0xa8e   :  { %5494 = vtanh.f32 %v4074_v28  ;;  %v4077_v46 = vadd.f32 %v4073_v6, %v3886_v22 }
 0xa8f   :  { %v4076_v5 = vadd.f32 %v4072_v33, %v3881_v11  ;;  %v5485_v30 = vpop.eup %5484 }
 0xa90   :  { %5496 = vtanh.f32 %v4077_v46  ;;  %v5487_v20 = vpop.eup %5486  ;;  %v4083_v14 = vsub.f32 1.0, %v5485_v30  ;;  %v4091_v45 = vmul.f32 %v5485_v30, %v7608_v37 }
 0xa91   :  { %5498 = vtanh.f32 %v4076_v5  ;;  %v4082_v19 = vsub.f32 1.0, %v5487_v20  ;;  %v4090_v57 = vmul.f32 %v5487_v20, %v7609_v40 }
 0xa93   :  { %v5489_v50 = vpop.eup %5488 }
 0xa94   :  { %v4085_v48 = vsub.f32 1.0, %v5489_v50  ;;  %v4093_v51 = vmul.f32 %v5489_v50, %v7610_v3 }
 0xa96   :  { %v5491_v24 = vpop.eup %5490 }
 0xa97   :  { %v5493_v12 = vpop.eup %5492  ;;  %v4084_v56 = vsub.f32 1.0, %v5491_v24  ;;  %v4092_v31 = vmul.f32 %v5491_v24, %v7611_v62 }
 0xa98   :  { %v5495_v41 = vpop.eup %5494  ;;  %v4087_v26 = vmul.f32 %v5493_v12, %v4083_v14 }
 0xa99   :  { %v4086_v21 = vmul.f32 %v5495_v41, %v4082_v19 }
 0xa9a   :  { %v5497_v47 = vpop.eup %5496  ;;  %v4095_v63 = vadd.f32 %v4091_v45, %v4087_v26 }
 0xa9b   :  { %v5499_v34 = vpop.eup %5498  ;;  %v4094_v2 = vadd.f32 %v4090_v57, %v4086_v21  ;;  %v4089_v18 = vmul.f32 %v5497_v47, %v4085_v48 }
 0xa9c   :  { %v4088_v52 = vmul.f32 %v5499_v34, %v4084_v56 }
 0xa9d   :  { %v5239_v23 = vpack.c.bf16 %v4095_v63, %v4094_v2  ;;  %v4097_v39 = vadd.f32 %v4093_v51, %v4089_v18 }
 0xa9e   :  { %v4096_v25 = vadd.f32 %v4092_v31, %v4088_v52 }
 0xa9f   :  { %5240 = vmatprep.subr.bf16.mxu0 %v5239_v23 }
 0xaa0   :  { %5242 = vmatpush3.bf16.msra.mxu0 %v5239_v23  ;;  %v5243_v8 = vpack.c.bf16 %v4097_v39, %v4096_v25 }
 0xaa2   :  { %5244 = vmatprep.subr.bf16.mxu0 %v5243_v8 }
 0xaa4   :  { %5246 = vmatpush3.bf16.msra.mxu0 %v5243_v8 }
 0xaa5   :  { %4981 = vmatprep.subr.msk.mxu0 %vm2347_vm2, %v7458_v60 }
 0xaa7   :  { %4976 = vmatmul.mubr.msk.f32.vlgmr.msra.gmra.mrb[160].mxu0 %vm2070_vm0, %v4099_v49 }
 0xaa8   :  { %4978 = vmatprep.mubr.msk.f32.mxu0 %vm2070_vm0, %v4100_v4  ;;  %4982 = vmatpush3.msk.msra.mxu0 %vm2347_vm2, %v7458_v60 }
 0xaa9   :  { %4986 = vmatprep.subr.msk.mxu0 %vm2347_vm2, %v7458_v60 }
 0xaab   :  { %4979 = vmatmul.mubr.msk.f32.gmra.mrb[162].mxu0 %vm2070_vm0, %v4101_v42 }
 0xb7a   :  { %v4977_v0 = vpop.f32.mrb[160].mxu0 }
 0xb7b   :  { %v4210_v61 = vadd.f32 %v4977_v0, %v4114_v17  ;;  %v4204_v32 = vpop.f32.mrb[161].mxu0 }
 0xb7c   :  { %v4205_v35 = vadd.f32 %v4204_v32, %v4109_v44 }
 0xb7d   :  { %v4224_v16 = vsel %vm2334_vm3, %v4210_v61, -inf }
 0xb7e   :  { %v4223_v15 = vsel %vm2334_vm3, %v4205_v35, -inf  ;;  %v4980_v7 = vpop.f32.mrb[162].mxu0 }
 0xb7f   :  { %v4225_v13 = vmax.f32 %v4223_v15, %v4224_v16  ;;  %v4220_v55 = vadd.f32 %v4980_v7, %v4124_v1  ;;  %v4214_v36 = vpop.f32.mrb[163].mxu0 }
 0xb80   :  { %v4215_v27 = vadd.f32 %v4214_v36, %v4119_v29 }
 0xb81   :  { %v4226_v58 = vrot.slane %v4225_v13, 4  ;;  %v4341_v28 = vsel %vm2334_vm3, %v4220_v55, -inf }
 0xb82   :  { %v4340_v10 = vsel %vm2334_vm3, %v4215_v27, -inf }
 0xb83   :  { %v4227_v53 = vmax.f32 %v4225_v13, %v4226_v58  ;;  %v4342_v59 = vmax.f32 %v4340_v10, %v4341_v28 }
 0xb85   :  { %v4228_v38 = vrot.slane %v4227_v53, 2  ;;  %v4343_v22 = vrot.slane %v4342_v59, 4 }
 0xb87   :  { %v4229_v6 = vmax.f32 %v4227_v53, %v4228_v38  ;;  %v4344_v9 = vmax.f32 %v4342_v59, %v4343_v22 }
 0xb89   :  { %v4230_v11 = vrot.slane %v4229_v6, 1  ;;  %v4345_v33 = vrot.slane %v4344_v9, 2 }
 0xb8b   :  { %v4231_v46 = vmax.f32 %v4229_v6, %v4230_v11  ;;  %v4346_v5 = vmax.f32 %v4344_v9, %v4345_v33 }
 0xb8d   :  { %v4232_v30 = vsub.f32 %v4205_v35, %v4231_v46  ;;  %v4233_v20 = vsub.f32 %v4210_v61, %v4231_v46  ;;  %v4347_v50 = vrot.slane %v4346_v5, 1 }
 0xb8f   :  { %v4234_v24 = vmul.f32 1.442695, %v4232_v30  ;;  %v4236_v14 = vmul.f32 1.442695, %v4233_v20  ;;  %v4348_v12 = vmax.f32 %v4346_v5, %v4347_v50 }
 0xb91   :  { %5500 = vpow2.f32 %v4234_v24  ;;  %v4349_v19 = vsub.f32 %v4215_v27, %v4348_v12  ;;  %v4350_v41 = vsub.f32 %v4220_v55, %v4348_v12 }
 0xb92   :  { %5502 = vpow2.f32 %v4236_v14 }
 0xb93   :  { %v4351_v26 = vmul.f32 1.442695, %v4349_v19  ;;  %v4353_v37 = vmul.f32 1.442695, %v4350_v41 }
 0xb95   :  { %5504 = vpow2.f32 %v4351_v26 }
 0xb96   :  { %5506 = vpow2.f32 %v4353_v37 }
 0xb9b   :  { %v5501_v45 = vpop.eup %5500 }
 0xb9c   :  { %v5503_v21 = vpop.eup %5502  ;;  %v4238_v40 = vsel %vm2334_vm3, %v5501_v45, 0.0 }
 0xb9d   :  { %v4239_v57 = vsel %vm2334_vm3, %v5503_v21, 0.0 }
 0xb9e   :  { %v4240_v48 = vadd.f32 %v4239_v57, %v4238_v40 }
 0xb9f   :  { %v5505_v47 = vpop.eup %5504 }
 0xba0   :  { %v5507_v63 = vpop.eup %5506  ;;  %v4241_v56 = vrot.slane %v4240_v48, 4  ;;  %v4355_v34 = vsel %vm2334_vm3, %v5505_v47, 0.0 }
 0xba1   :  { %v4356_v2 = vsel %vm2334_vm3, %v5507_v63, 0.0 }
 0xba2   :  { %v4242_v18 = vadd.f32 %v4241_v56, %v4240_v48  ;;  %v4357_v3 = vadd.f32 %v4356_v2, %v4355_v34 }
 0xba4   :  { %v4243_v51 = vrot.slane %v4242_v18, 2  ;;  %v4358_v52 = vrot.slane %v4357_v3, 4 }
 0xba6   :  { %v4244_v62 = vadd.f32 %v4243_v51, %v4242_v18  ;;  %v4359_v31 = vadd.f32 %v4358_v52, %v4357_v3 }
 0xba8   :  { %v4360_v23 = vrot.slane %v4359_v31, 2  ;;  %v4245_v39 = vrot.slane %v4244_v62, 1 }
 0xbaa   :  { %v4361_v25 = vadd.f32 %v4360_v23, %v4359_v31  ;;  %v4246_v8 = vadd.f32 %v4245_v39, %v4244_v62 }
 0xbac   :  { %5508 = vrcp.f32 %v4246_v8  ;;  %v4362_v49 = vrot.slane %v4361_v25, 1 }
 0xbae   :  { %v4363_v4 = vadd.f32 %v4362_v49, %v4361_v25 }
 0xbb0   :  { %5510 = vrcp.f32 %v4363_v4 }
 0xbb6   :  { %v5509_v42 = vpop.eup %5508 }
 0xbb7   :  { %v4248_v17 = vmul.f32 %v5509_v42, %v5501_v45  ;;  %v4249_v44 = vmul.f32 %v5509_v42, %v5503_v21 }
 0xbb9   :  { %4983 = vmatprep.mubr.msk.f32.mxu0 %vm2334_vm3, %v4248_v17 }
 0xbba   :  { %v5511_v0 = vpop.eup %5510  ;;  %4984 = vmatmul.mubr.msk.f32.vlgmr.msra.gmra.mrb[164].mxu0 %vm2334_vm3, %v4249_v44 }
 0xbbb   :  { %4987 = vmatpush3.msk.msra.mxu0 %vm2347_vm2, %v7458_v60  ;;  %v4365_v61 = vmul.f32 %v5511_v0, %v5505_v47  ;;  %v4366_v32 = vmul.f32 %v5511_v0, %v5507_v63 }
 0xbbd   :  { %4988 = vmatprep.mubr.msk.f32.mxu0 %vm2334_vm3, %v4365_v61 }
 0xbbe   :  { %4989 = vmatmul.mubr.msk.f32.vlgmr.msra.gmra.mrb[166].mxu0 %vm2334_vm3, %v4366_v32 }
 0xc8d   :  { %v4985_v35 = vpop.f32.mrb[164].mxu0 }
 0xc8e   :  { %v4332_v16 = vmul.f32 %v4985_v35, %v7355_v54  ;;  %v4322_v1 = vpop.f32.mrb[165].mxu0 }
 0xc8f   :  { %v4331_v15 = vmul.f32 %v4322_v1, %v7376_v43 }
 0xc91   :  { %v4333_v7 = vadd.f32 %v4332_v16, %v4331_v15  ;;  %v4990_v29 = vpop.f32.mrb[166].mxu0 }
 0xc92   :  { %v4449_v13 = vmul.f32 %v4990_v29, %v7355_v54  ;;  %v4439_v55 = vpop.f32.mrb[167].mxu0 }
 0xc93   :  { %v4334_v36 = vrot.slane %v4333_v7, 4  ;;  %v4448_v60 = vmul.f32 %v4439_v55, %v7376_v43 }
 0xc95   :  { %v4335_v27 = vadd.f32 %v4334_v36, %v4333_v7  ;;  %v4450_v58 = vadd.f32 %v4449_v13, %v4448_v60 }
 0xc97   :  { %v4336_v28 = vrot.slane %v4335_v27, 2  ;;  %v4451_v10 = vrot.slane %v4450_v58, 4 }
 0xc99   :  { %v4337_v53 = vadd.f32 %v4336_v28, %v4335_v27  ;;  %v4452_v59 = vadd.f32 %v4451_v10, %v4450_v58 }
 0xc9b   :  { %v4453_v38 = vrot.slane %v4452_v59, 2  ;;  %v4338_v22 = vrot.slane %v4337_v53, 1 }
 0xc9d   :  { %v4454_v6 = vadd.f32 %v4453_v38, %v4452_v59  ;;  %v4339_v11 = vadd.f32 %v4338_v22, %v4337_v53 }
 0xc9f   :  { %v4455_v9 = vrot.slane %v4454_v6, 1 }
 0xca1   :  { %v4456_v33 = vadd.f32 %v4455_v9, %v4454_v6 }
 0xca3   :  { %v4457_v46 = vadd.f32 %v4456_v33, %v4339_v11  ;;  %v4463_v5 = vsub.f32 %v4339_v11, %v4456_v33  ;;  %v4466_v30 = vsub.f32 %v4456_v33, %v4339_v11 }
 0xca5   :  { %v4458_v54 = vmax.f32 %v4457_v46, 0.0  ;;  %v4589_v20 = vadd.f32 -1.0, %v4457_v46  ;;  %v4464_v50 = vmax.f32 %v4463_v5, 0.0  ;;  %v4467_v43 = vmax.f32 %v4466_v30, 0.0 }
 0xca7   :  { %v4461_v24 = vmax.f32 %v4589_v20, 0.0  ;;  %v4459_v14 = vmin.f32 %v4458_v54, 1.0  ;;  %v4465_v19 = vmin.f32 %v4464_v50, 1.0  ;;  %v4468_v41 = vmin.f32 %v4467_v43, 1.0 }
 0xca9   :  { %v4462_v12 = vmin.f32 %v4461_v24, 1.0 }
 0xcab   :  { %v4469_v26 = vsel %vm3610_vm10, %v4459_v14, %v4462_v12 }
 0xcac   :  { %v4470_v37 = vsel %vm2347_vm2, %v4469_v26, %v4465_v19 }
 0xcad   :  { %v4472_v45 = vsel %vm4471_vm13, %v4470_v37, %v4468_v41 }
 0xcae   :  { %v4473_v21 = vmax.f32 %v4472_v45, 0.0 }
 0xcb0   :  { %v4474_v40 = vmin.f32 %v4473_v21, 1.0 }
 0xcb2   :  { %4475 = vst [vmem:[%s7522_s27] sm:$0x1] %v4474_v40 }
 0xcb3   :  { %4480 = vsyncpa [#allocation4], 1 }

</bundles_post_ra>
